<compile_context>
chip_gen: v5e
topology: v5e:2x2
jax: 0.10.0
libtpu: 0.0.40
codegen_flags: <defaults>
</compile_context>

<pallas_src>
import functools

import jax
import jax.numpy as jnp
from jax.experimental import pallas as pl
from jax.experimental.pallas import tpu as pltpu


# ---------------------------------------------------------------------------
# Shared conv + activation helper (operates on in-register values in-kernel).
# ---------------------------------------------------------------------------
def _conv7x7_gate(pooled, w_ref, H, W):
    """pooled: (B, 2, H*W) f32 -> sigmoid(leaky_relu(conv7x7(pooled))), (B,1,H*W) f32."""
    HW = H * W
    B = pooled.shape[0]
    PADH = 3                  # horizontal zero pad (columns)
    PADV = 3 * W              # vertical zero pad (3 rows, flattened)
    L = HW + 2 * PADV         # length of the vertically padded map

    zpad = jnp.zeros((B, 2, PADV + PADH), jnp.float32)
    wide = jnp.concatenate([zpad, pooled, zpad], axis=-1)     # (B, 2, L + 2*PADH)

    # Column id of each flattened position, computed once at (1, 1, L).  The
    # dy row-offsets below are multiples of W, so they preserve the column.
    col = jax.lax.broadcasted_iota(jnp.int32, (1, 1, L), 2) % W

    # 7 horizontally shifted + column-masked copies (one per dx); each dy tap
    # is then a row-offset slice (lane-aligned whenever W % 128 == 0).
    dy_acc = [None] * 7
    for dx in range(7):
        o = dx - 3
        sh = wide[:, :, PADH + o:PADH + o + L]                # (B, 2, L)
        if o < 0:
            sh = jnp.where(col >= -o, sh, 0.0)
        elif o > 0:
            sh = jnp.where(col <= (W - 1 - o), sh, 0.0)
        for dy in range(7):
            win = sh[:, :, dy * W:dy * W + HW]                # (B, 2, HW)
            t = (w_ref[dy * 7 + dx] * win[:, 0:1, :]          # in-channel 0: max map
                 + w_ref[49 + dy * 7 + dx] * win[:, 1:2, :])  # in-channel 1: mean map
            dy_acc[dy] = t if dy_acc[dy] is None else dy_acc[dy] + t

    conv = ((dy_acc[0] + dy_acc[1]) + (dy_acc[2] + dy_acc[3])
            + (dy_acc[4] + dy_acc[5]) + dy_acc[6])            # (B, 1, HW) f32
    act = jnp.where(conv >= 0, conv, 0.1 * conv)              # LeakyReLU(0.1)
    return jax.nn.sigmoid(act)                                # (B, 1, HW) f32


# ---------------------------------------------------------------------------
# Fused kernel: whole (B_blk, C, HW) image block per grid step.
# ---------------------------------------------------------------------------
def _fused_kernel(w_ref, x_ref, o_ref, *, H, W, C):
    """w_ref: (98,) SMEM (scalar prefetch); x_ref/o_ref: (B_blk, C, H*W) VMEM."""
    x = x_ref[...]                                            # (B, C, HW), input dtype
    pmax = jnp.max(x, axis=1, keepdims=True).astype(jnp.float32)
    pmean = jnp.sum(x, axis=1, keepdims=True, dtype=jnp.float32) * (1.0 / C)
    pooled = jnp.concatenate([pmax, pmean], axis=1)           # (B, 2, HW) f32
    scale = _conv7x7_gate(pooled, w_ref, H, W)                # (B, 1, HW) f32
    # Cast the gate to the input dtype first: keeps the dominant multiply in
    # the input dtype instead of upcasting the whole block to f32.
    o_ref[...] = (x * scale.astype(x.dtype)).astype(o_ref.dtype)


# ---------------------------------------------------------------------------
# Multi-pass kernels (large C*HW): pool -> conv gate -> apply.
# ---------------------------------------------------------------------------
def _pool_kernel(x_ref, p_ref, *, C):
    """Channel max / f32-sum over a (1, TC, THW) tile; p_ref accumulates (1, 2, THW)."""
    c = pl.program_id(2)
    x = x_ref[...]
    tmax = jnp.max(x, axis=1, keepdims=True).astype(jnp.float32)   # (1, 1, THW)
    tsum = jnp.sum(x, axis=1, keepdims=True, dtype=jnp.float32)    # (1, 1, THW)

    @pl.when(c == 0)
    def _():
        p_ref[:, 0:1, :] = tmax
        p_ref[:, 1:2, :] = tsum

    @pl.when(c > 0)
    def _():
        p_ref[:, 0:1, :] = jnp.maximum(p_ref[:, 0:1, :], tmax)
        p_ref[:, 1:2, :] = p_ref[:, 1:2, :] + tsum

    @pl.when(c == pl.num_programs(2) - 1)
    def _():
        p_ref[:, 1:2, :] = p_ref[:, 1:2, :] * (1.0 / C)


def _gate_kernel(w_ref, p_ref, s_ref, *, H, W):
    s_ref[...] = _conv7x7_gate(p_ref[...], w_ref, H, W).astype(s_ref.dtype)


def _apply_kernel(x_ref, s_ref, o_ref):
    o_ref[...] = (x_ref[...] * s_ref[...]).astype(o_ref.dtype)


# ---------------------------------------------------------------------------
# Wrapper.
# ---------------------------------------------------------------------------
def _divisors_desc(n):
    ds = set()
    i = 1
    while i * i <= n:
        if n % i == 0:
            ds.add(i)
            ds.add(n // i)
        i += 1
    return sorted(ds, reverse=True)


def _pick_tile(total, unit, bytes_per_elem, cap):
    """Largest divisor of `total` that is a multiple of `unit` (or `total` itself,
    to satisfy the (8,128) block rule) and fits within `cap` bytes."""
    cands = [d for d in _divisors_desc(total) if d % unit == 0 or d == total]
    for d in cands:
        if d * bytes_per_elem <= cap:
            return d
    return cands[-1]


def _vmem_limit_bytes():
    """Generation-aware scoped-VMEM budget (~48 MiB on v7x, ~96 MiB on v5e/v6e)."""
    try:
        info = pltpu.get_tpu_info()
        cap = int(getattr(info, "vmem_capacity_bytes", 64 * 1024 * 1024))
    except Exception:
        cap = 64 * 1024 * 1024          # conservative fallback (v7x per-core VMEM)
    return (cap * 3) // 4


def spatial_gate(x, conv_w, *, max_block_bytes=None):
    """x: (N, C, H, W); conv_w: (1, 2, 7, 7) f32 (PyTorch OIHW).  Returns x * scale."""
    N, C, H, W = x.shape
    HW = H * W
    itemsize = x.dtype.itemsize
    x_flat = x.reshape(N, C, HW)                       # lane-dense layout
    w_flat = conv_w.reshape(-1).astype(jnp.float32)    # (2*7*7,)

    vmem_limit = _vmem_limit_bytes()
    budget = vmem_limit // 2                           # per-step working-set target
    if max_block_bytes is not None:                    # test hook: force multi-pass
        budget = min(budget, int(max_block_bytes))

    def fused_step_bytes(b):
        io = 2 * 2 * b * C * HW * itemsize             # double-buffered in + out blocks
        f32_tmp = 24 * b * HW * 4                      # pooled/shifts/accumulators/scale
        return io + f32_tmp

    # ------------------------------------------------------------------ #
    # Fused path: whole (B_blk, C, HW) image block fits comfortably.
    # ------------------------------------------------------------------ #
    if fused_step_bytes(1) <= budget:
        fold_cap = min(budget, 8 * 1024 * 1024)        # keep >1 grid step when big
        b_blk = 1
        for d in _divisors_desc(N):
            if fused_step_bytes(d) <= fold_cap:
                b_blk = d
                break
        cost = pl.CostEstimate(
            flops=int(N * HW * (3 * C + 4 * 49)),
            transcendentals=int(N * HW),
            bytes_accessed=int(2 * N * C * HW * itemsize + w_flat.size * 4))
        out_flat = pl.pallas_call(
            functools.partial(_fused_kernel, H=H, W=W, C=C),
            out_shape=jax.ShapeDtypeStruct((N, C, HW), x.dtype),
            grid_spec=pltpu.PrefetchScalarGridSpec(
                num_scalar_prefetch=1,                 # weights -> SMEM once
                grid=(N // b_blk,),
                in_specs=[pl.BlockSpec((b_blk, C, HW), lambda n, ws: (n, 0, 0))],
                out_specs=pl.BlockSpec((b_blk, C, HW), lambda n, ws: (n, 0, 0)),
            ),
            compiler_params=pltpu.CompilerParams(
                dimension_semantics=("parallel",),
                vmem_limit_bytes=vmem_limit),
            cost_estimate=cost,
        )(w_flat, x_flat)
        return out_flat.reshape(N, C, H, W)

    # ------------------------------------------------------------------ #
    # Multi-pass path (large C*HW): decouple VMEM from C and HW entirely.
    # ------------------------------------------------------------------ #
    thw = _pick_tile(HW, 128, max(C, 16) * itemsize * 4, budget)
    tc = _pick_tile(C, 8, thw * itemsize * 4, budget)
    n_hw = HW // thw
    n_c = C // tc

    # Pass 1: pooled = [max_c(x), mean_c(x)] in f32 (resident accumulator over c).
    pooled = pl.pallas_call(
        functools.partial(_pool_kernel, C=C),
        out_shape=jax.ShapeDtypeStruct((N, 2, HW), jnp.float32),
        grid_spec=pltpu.PrefetchScalarGridSpec(
            num_scalar_prefetch=0,
            grid=(N, n_hw, n_c),                       # reduction (c) axis last
            in_specs=[pl.BlockSpec((1, tc, thw), lambda n, h, c: (n, c, h))],
            out_specs=pl.BlockSpec((1, 2, thw), lambda n, h, c: (n, 0, h)),
        ),
        compiler_params=pltpu.CompilerParams(
            dimension_semantics=("parallel", "parallel", "arbitrary"),
            vmem_limit_bytes=vmem_limit),
    )(x_flat)

    # Pass 2: scale = sigmoid(leaky_relu(conv7x7(pooled))) on the tiny pooled map.
    scale = pl.pallas_call(
        functools.partial(_gate_kernel, H=H, W=W),
        out_shape=jax.ShapeDtypeStruct((N, 1, HW), x.dtype),
        grid_spec=pltpu.PrefetchScalarGridSpec(
            num_scalar_prefetch=1,
            grid=(N,),
            in_specs=[pl.BlockSpec((1, 2, HW), lambda n, ws: (n, 0, 0))],
            out_specs=pl.BlockSpec((1, 1, HW), lambda n, ws: (n, 0, 0)),
        ),
        compiler_params=pltpu.CompilerParams(
            dimension_semantics=("parallel",),
            vmem_limit_bytes=vmem_limit),
    )(w_flat, pooled)

    # Pass 3: out = x * scale (pure HBM stream, all axes parallel).
    out_flat = pl.pallas_call(
        _apply_kernel,
        out_shape=jax.ShapeDtypeStruct((N, C, HW), x.dtype),
        grid_spec=pltpu.PrefetchScalarGridSpec(
            num_scalar_prefetch=0,
            grid=(N, n_c, n_hw),
            in_specs=[pl.BlockSpec((1, tc, thw), lambda n, c, h: (n, c, h)),
                      pl.BlockSpec((1, 1, thw), lambda n, c, h: (n, 0, h))],
            out_specs=pl.BlockSpec((1, tc, thw), lambda n, c, h: (n, c, h)),
        ),
        compiler_params=pltpu.CompilerParams(
            dimension_semantics=("parallel", "parallel", "parallel"),
            vmem_limit_bytes=vmem_limit),
    )(x_flat, scale)
    return out_flat.reshape(N, C, H, W)


def spatial_gate_reference(x, conv_w):
    """Pure-JAX reference matching the PyTorch module."""
    pooled = jnp.concatenate(
        [jnp.max(x, axis=1, keepdims=True), jnp.mean(x, axis=1, keepdims=True)],
        axis=1)
    conv = jax.lax.conv_general_dilated(
        pooled, conv_w, window_strides=(1, 1), padding=((3, 3), (3, 3)),
        dimension_numbers=("NCHW", "OIHW", "NCHW"))
    act = jnp.where(conv >= 0, conv, 0.1 * conv)
    return x * jax.nn.sigmoid(act)


if __name__ == "__main__":
    key = jax.random.PRNGKey(0)
    kx, kw = jax.random.split(key)

    N, C, H, W = 2, 4, 16, 16
    x = jax.random.normal(kx, (N, C, H, W), dtype=jnp.float32)
    # Conv2d(2, 1, kernel_size=7, bias=False) weights, OIHW = (1, 2, 7, 7).
    conv_w = 0.1 * jax.random.normal(kw, (1, 2, 7, 7), dtype=jnp.float32)

    ref = jax.block_until_ready(spatial_gate_reference(x, conv_w))

    # Fused path (default at this size).
    out = jax.block_until_ready(spatial_gate(x, conv_w))
    assert out.shape == x.shape and out.dtype == x.dtype
    assert jnp.allclose(out, ref, atol=1e-5, rtol=1e-5), (
        float(jnp.max(jnp.abs(out - ref))))

    # Exercise the large-C*HW multi-pass path by forcing a tiny block budget.
    out_mp = jax.block_until_ready(spatial_gate(x, conv_w, max_block_bytes=4096))
    assert jnp.allclose(out_mp, ref, atol=1e-5, rtol=1e-5), (
        float(jnp.max(jnp.abs(out_mp - ref))))

    print("KERNEL_OK")
</pallas_src>

<mosaic_0001>
module attributes {stable_mosaic.version = 11 : i64} {
  func.func @_fused_kernel(%arg0: i32, %arg1: memref<98xf32, #tpu.memory_space<smem>>, %arg2: memref<2x4x256xf32, #tpu.memory_space<vmem>>, %arg3: memref<2x4x256xf32, #tpu.memory_space<vmem>>) attributes {dimension_semantics = [#tpu.dimension_semantics<parallel>], iteration_bounds = array<i64: 1>, scalar_prefetch = 1 : i64, scratch_operands = 0 : i64, tpu.core_type = #tpu.core_type<tc>, window_params = [{transform_indices = @transform_0, window_bounds = array<i64: 2, 4, 256>}, {transform_indices = @transform_1, window_bounds = array<i64: 2, 4, 256>}]} {
    %c0 = arith.constant 0 : index
    %c0_0 = arith.constant 0 : index
    %c0_1 = arith.constant 0 : index
    %0 = vector.load %arg2[%c0, %c0_0, %c0_1] : memref<2x4x256xf32, #tpu.memory_space<vmem>>, vector<2x4x256xf32>
    %cst = arith.constant dense<0xFF800000> : vector<2x256xf32>
    %1 = vector.multi_reduction <maximumf>, %0, %cst [1] : vector<2x4x256xf32> to vector<2x256xf32>
    %2 = vector.shape_cast %1 : vector<2x256xf32> to vector<2x1x256xf32>
    %cst_2 = arith.constant dense<0.000000e+00> : vector<2x256xf32>
    %3 = vector.multi_reduction <add>, %0, %cst_2 [1] : vector<2x4x256xf32> to vector<2x256xf32>
    %4 = vector.shape_cast %3 : vector<2x256xf32> to vector<2x1x256xf32>
    %cst_3 = arith.constant 2.500000e-01 : f32
    %5 = vector.broadcast %cst_3 : f32 to vector<2x1x256xf32>
    %6 = arith.mulf %4, %5 : vector<2x1x256xf32>
    %7 = tpu.concatenate %2, %6 in 1 : vector<2x1x256xf32>, vector<2x1x256xf32> -> vector<2x2x256xf32>
    %cst_4 = arith.constant 0.000000e+00 : f32
    %8 = vector.broadcast %cst_4 : f32 to vector<2x2x51xf32>
    %9 = tpu.concatenate %8, %7, %8 in 2 : vector<2x2x51xf32>, vector<2x2x256xf32>, vector<2x2x51xf32> -> vector<2x2x358xf32>
    %10 = tpu.iota {dimensions = array<i32: 2>} : vector<1x1x352xi32>
    %c16_i32 = arith.constant 16 : i32
    %c0_i32 = arith.constant 0 : i32
    %11 = arith.cmpi eq, %c16_i32, %c0_i32 : i32
    %c1_i32 = arith.constant 1 : i32
    %12 = arith.select %11, %c1_i32, %c16_i32 : i32
    %13 = vector.broadcast %12 : i32 to vector<1x1x352xi32>
    %14 = arith.remsi %10, %13 : vector<1x1x352xi32>
    %c0_i32_5 = arith.constant 0 : i32
    %15 = vector.broadcast %c0_i32_5 : i32 to vector<1x1x352xi32>
    %16 = arith.cmpi ne, %14, %15 : vector<1x1x352xi32>
    %c0_i32_6 = arith.constant 0 : i32
    %17 = vector.broadcast %c0_i32_6 : i32 to vector<1x1x352xi32>
    %18 = arith.cmpi slt, %14, %17 : vector<1x1x352xi32>
    %c0_i32_7 = arith.constant 0 : i32
    %19 = arith.cmpi slt, %12, %c0_i32_7 : i32
    %20 = vector.broadcast %19 : i1 to vector<1x1x352xi1>
    %21 = vector.broadcast %20 : vector<1x1x352xi1> to vector<1x1x352xi1>
    %22 = arith.xori %18, %21 : vector<1x1x352xi1>
    %23 = arith.andi %22, %16 : vector<1x1x352xi1>
    %24 = vector.broadcast %12 : i32 to vector<1x1x352xi32>
    %25 = arith.addi %14, %24 : vector<1x1x352xi32>
    %26 = arith.select %23, %25, %14 : vector<1x1x352xi1>, vector<1x1x352xi32>
    %27 = vector.extract_strided_slice %9 {offsets = [0, 0, 0], sizes = [2, 2, 352], strides = [1, 1, 1]} : vector<2x2x358xf32> to vector<2x2x352xf32>
    %c3_i32 = arith.constant 3 : i32
    %28 = vector.broadcast %c3_i32 : i32 to vector<1x1x352xi32>
    %29 = arith.cmpi sge, %26, %28 : vector<1x1x352xi32>
    %cst_8 = arith.constant 0.000000e+00 : f32
    %30 = vector.shape_cast %29 : vector<1x1x352xi1> to vector<1x1x352xi1>
    %31 = vector.broadcast %30 : vector<1x1x352xi1> to vector<2x2x352xi1>
    %32 = vector.broadcast %cst_8 : f32 to vector<2x2x352xf32>
    %33 = arith.select %31, %27, %32 : vector<2x2x352xi1>, vector<2x2x352xf32>
    %34 = vector.extract_strided_slice %33 {offsets = [0, 0, 0], sizes = [2, 2, 256], strides = [1, 1, 1]} : vector<2x2x352xf32> to vector<2x2x256xf32>
    %c0_9 = arith.constant 0 : index
    %35 = memref.load %arg1[%c0_9] : memref<98xf32, #tpu.memory_space<smem>>
    %36 = vector.extract_strided_slice %34 {offsets = [0, 0, 0], sizes = [2, 1, 256], strides = [1, 1, 1]} : vector<2x2x256xf32> to vector<2x1x256xf32>
    %37 = vector.broadcast %35 : f32 to vector<2x1x256xf32>
    %38 = arith.mulf %37, %36 : vector<2x1x256xf32>
    %c49 = arith.constant 49 : index
    %39 = memref.load %arg1[%c49] : memref<98xf32, #tpu.memory_space<smem>>
    %40 = vector.extract_strided_slice %34 {offsets = [0, 1, 0], sizes = [2, 1, 256], strides = [1, 1, 1]} : vector<2x2x256xf32> to vector<2x1x256xf32>
    %41 = vector.broadcast %39 : f32 to vector<2x1x256xf32>
    %42 = arith.mulf %41, %40 : vector<2x1x256xf32>
    %43 = arith.addf %38, %42 : vector<2x1x256xf32>
    %44 = vector.extract_strided_slice %33 {offsets = [0, 0, 16], sizes = [2, 2, 256], strides = [1, 1, 1]} : vector<2x2x352xf32> to vector<2x2x256xf32>
    %c7 = arith.constant 7 : index
    %45 = memref.load %arg1[%c7] : memref<98xf32, #tpu.memory_space<smem>>
    %46 = vector.extract_strided_slice %44 {offsets = [0, 0, 0], sizes = [2, 1, 256], strides = [1, 1, 1]} : vector<2x2x256xf32> to vector<2x1x256xf32>
    %47 = vector.broadcast %45 : f32 to vector<2x1x256xf32>
    %48 = arith.mulf %47, %46 : vector<2x1x256xf32>
    %c56 = arith.constant 56 : index
    %49 = memref.load %arg1[%c56] : memref<98xf32, #tpu.memory_space<smem>>
    %50 = vector.extract_strided_slice %44 {offsets = [0, 1, 0], sizes = [2, 1, 256], strides = [1, 1, 1]} : vector<2x2x256xf32> to vector<2x1x256xf32>
    %51 = vector.broadcast %49 : f32 to vector<2x1x256xf32>
    %52 = arith.mulf %51, %50 : vector<2x1x256xf32>
    %53 = arith.addf %48, %52 : vector<2x1x256xf32>
    %54 = vector.extract_strided_slice %33 {offsets = [0, 0, 32], sizes = [2, 2, 256], strides = [1, 1, 1]} : vector<2x2x352xf32> to vector<2x2x256xf32>
    %c14 = arith.constant 14 : index
    %55 = memref.load %arg1[%c14] : memref<98xf32, #tpu.memory_space<smem>>
    %56 = vector.extract_strided_slice %54 {offsets = [0, 0, 0], sizes = [2, 1, 256], strides = [1, 1, 1]} : vector<2x2x256xf32> to vector<2x1x256xf32>
    %57 = vector.broadcast %55 : f32 to vector<2x1x256xf32>
    %58 = arith.mulf %57, %56 : vector<2x1x256xf32>
    %c63 = arith.constant 63 : index
    %59 = memref.load %arg1[%c63] : memref<98xf32, #tpu.memory_space<smem>>
    %60 = vector.extract_strided_slice %54 {offsets = [0, 1, 0], sizes = [2, 1, 256], strides = [1, 1, 1]} : vector<2x2x256xf32> to vector<2x1x256xf32>
    %61 = vector.broadcast %59 : f32 to vector<2x1x256xf32>
    %62 = arith.mulf %61, %60 : vector<2x1x256xf32>
    %63 = arith.addf %58, %62 : vector<2x1x256xf32>
    %64 = vector.extract_strided_slice %33 {offsets = [0, 0, 48], sizes = [2, 2, 256], strides = [1, 1, 1]} : vector<2x2x352xf32> to vector<2x2x256xf32>
    %c21 = arith.constant 21 : index
    %65 = memref.load %arg1[%c21] : memref<98xf32, #tpu.memory_space<smem>>
    %66 = vector.extract_strided_slice %64 {offsets = [0, 0, 0], sizes = [2, 1, 256], strides = [1, 1, 1]} : vector<2x2x256xf32> to vector<2x1x256xf32>
    %67 = vector.broadcast %65 : f32 to vector<2x1x256xf32>
    %68 = arith.mulf %67, %66 : vector<2x1x256xf32>
    %c70 = arith.constant 70 : index
    %69 = memref.load %arg1[%c70] : memref<98xf32, #tpu.memory_space<smem>>
    %70 = vector.extract_strided_slice %64 {offsets = [0, 1, 0], sizes = [2, 1, 256], strides = [1, 1, 1]} : vector<2x2x256xf32> to vector<2x1x256xf32>
    %71 = vector.broadcast %69 : f32 to vector<2x1x256xf32>
    %72 = arith.mulf %71, %70 : vector<2x1x256xf32>
    %73 = arith.addf %68, %72 : vector<2x1x256xf32>
    %74 = vector.extract_strided_slice %33 {offsets = [0, 0, 64], sizes = [2, 2, 256], strides = [1, 1, 1]} : vector<2x2x352xf32> to vector<2x2x256xf32>
    %c28 = arith.constant 28 : index
    %75 = memref.load %arg1[%c28] : memref<98xf32, #tpu.memory_space<smem>>
    %76 = vector.extract_strided_slice %74 {offsets = [0, 0, 0], sizes = [2, 1, 256], strides = [1, 1, 1]} : vector<2x2x256xf32> to vector<2x1x256xf32>
    %77 = vector.broadcast %75 : f32 to vector<2x1x256xf32>
    %78 = arith.mulf %77, %76 : vector<2x1x256xf32>
    %c77 = arith.constant 77 : index
    %79 = memref.load %arg1[%c77] : memref<98xf32, #tpu.memory_space<smem>>
    %80 = vector.extract_strided_slice %74 {offsets = [0, 1, 0], sizes = [2, 1, 256], strides = [1, 1, 1]} : vector<2x2x256xf32> to vector<2x1x256xf32>
    %81 = vector.broadcast %79 : f32 to vector<2x1x256xf32>
    %82 = arith.mulf %81, %80 : vector<2x1x256xf32>
    %83 = arith.addf %78, %82 : vector<2x1x256xf32>
    %84 = vector.extract_strided_slice %33 {offsets = [0, 0, 80], sizes = [2, 2, 256], strides = [1, 1, 1]} : vector<2x2x352xf32> to vector<2x2x256xf32>
    %c35 = arith.constant 35 : index
    %85 = memref.load %arg1[%c35] : memref<98xf32, #tpu.memory_space<smem>>
    %86 = vector.extract_strided_slice %84 {offsets = [0, 0, 0], sizes = [2, 1, 256], strides = [1, 1, 1]} : vector<2x2x256xf32> to vector<2x1x256xf32>
    %87 = vector.broadcast %85 : f32 to vector<2x1x256xf32>
    %88 = arith.mulf %87, %86 : vector<2x1x256xf32>
    %c84 = arith.constant 84 : index
    %89 = memref.load %arg1[%c84] : memref<98xf32, #tpu.memory_space<smem>>
    %90 = vector.extract_strided_slice %84 {offsets = [0, 1, 0], sizes = [2, 1, 256], strides = [1, 1, 1]} : vector<2x2x256xf32> to vector<2x1x256xf32>
    %91 = vector.broadcast %89 : f32 to vector<2x1x256xf32>
    %92 = arith.mulf %91, %90 : vector<2x1x256xf32>
    %93 = arith.addf %88, %92 : vector<2x1x256xf32>
    %94 = vector.extract_strided_slice %33 {offsets = [0, 0, 96], sizes = [2, 2, 256], strides = [1, 1, 1]} : vector<2x2x352xf32> to vector<2x2x256xf32>
    %c42 = arith.constant 42 : index
    %95 = memref.load %arg1[%c42] : memref<98xf32, #tpu.memory_space<smem>>
    %96 = vector.extract_strided_slice %94 {offsets = [0, 0, 0], sizes = [2, 1, 256], strides = [1, 1, 1]} : vector<2x2x256xf32> to vector<2x1x256xf32>
    %97 = vector.broadcast %95 : f32 to vector<2x1x256xf32>
    %98 = arith.mulf %97, %96 : vector<2x1x256xf32>
    %c91 = arith.constant 91 : index
    %99 = memref.load %arg1[%c91] : memref<98xf32, #tpu.memory_space<smem>>
    %100 = vector.extract_strided_slice %94 {offsets = [0, 1, 0], sizes = [2, 1, 256], strides = [1, 1, 1]} : vector<2x2x256xf32> to vector<2x1x256xf32>
    %101 = vector.broadcast %99 : f32 to vector<2x1x256xf32>
    %102 = arith.mulf %101, %100 : vector<2x1x256xf32>
    %103 = arith.addf %98, %102 : vector<2x1x256xf32>
    %104 = vector.extract_strided_slice %9 {offsets = [0, 0, 1], sizes = [2, 2, 352], strides = [1, 1, 1]} : vector<2x2x358xf32> to vector<2x2x352xf32>
    %c2_i32 = arith.constant 2 : i32
    %105 = vector.broadcast %c2_i32 : i32 to vector<1x1x352xi32>
    %106 = arith.cmpi sge, %26, %105 : vector<1x1x352xi32>
    %cst_10 = arith.constant 0.000000e+00 : f32
    %107 = vector.shape_cast %106 : vector<1x1x352xi1> to vector<1x1x352xi1>
    %108 = vector.broadcast %107 : vector<1x1x352xi1> to vector<2x2x352xi1>
    %109 = vector.broadcast %cst_10 : f32 to vector<2x2x352xf32>
    %110 = arith.select %108, %104, %109 : vector<2x2x352xi1>, vector<2x2x352xf32>
    %111 = vector.extract_strided_slice %110 {offsets = [0, 0, 0], sizes = [2, 2, 256], strides = [1, 1, 1]} : vector<2x2x352xf32> to vector<2x2x256xf32>
    %c1 = arith.constant 1 : index
    %112 = memref.load %arg1[%c1] : memref<98xf32, #tpu.memory_space<smem>>
    %113 = vector.extract_strided_slice %111 {offsets = [0, 0, 0], sizes = [2, 1, 256], strides = [1, 1, 1]} : vector<2x2x256xf32> to vector<2x1x256xf32>
    %114 = vector.broadcast %112 : f32 to vector<2x1x256xf32>
    %115 = arith.mulf %114, %113 : vector<2x1x256xf32>
    %c50 = arith.constant 50 : index
    %116 = memref.load %arg1[%c50] : memref<98xf32, #tpu.memory_space<smem>>
    %117 = vector.extract_strided_slice %111 {offsets = [0, 1, 0], sizes = [2, 1, 256], strides = [1, 1, 1]} : vector<2x2x256xf32> to vector<2x1x256xf32>
    %118 = vector.broadcast %116 : f32 to vector<2x1x256xf32>
    %119 = arith.mulf %118, %117 : vector<2x1x256xf32>
    %120 = arith.addf %115, %119 : vector<2x1x256xf32>
    %121 = arith.addf %43, %120 : vector<2x1x256xf32>
    %122 = vector.extract_strided_slice %110 {offsets = [0, 0, 16], sizes = [2, 2, 256], strides = [1, 1, 1]} : vector<2x2x352xf32> to vector<2x2x256xf32>
    %c8 = arith.constant 8 : index
    %123 = memref.load %arg1[%c8] : memref<98xf32, #tpu.memory_space<smem>>
    %124 = vector.extract_strided_slice %122 {offsets = [0, 0, 0], sizes = [2, 1, 256], strides = [1, 1, 1]} : vector<2x2x256xf32> to vector<2x1x256xf32>
    %125 = vector.broadcast %123 : f32 to vector<2x1x256xf32>
    %126 = arith.mulf %125, %124 : vector<2x1x256xf32>
    %c57 = arith.constant 57 : index
    %127 = memref.load %arg1[%c57] : memref<98xf32, #tpu.memory_space<smem>>
    %128 = vector.extract_strided_slice %122 {offsets = [0, 1, 0], sizes = [2, 1, 256], strides = [1, 1, 1]} : vector<2x2x256xf32> to vector<2x1x256xf32>
    %129 = vector.broadcast %127 : f32 to vector<2x1x256xf32>
    %130 = arith.mulf %129, %128 : vector<2x1x256xf32>
    %131 = arith.addf %126, %130 : vector<2x1x256xf32>
    %132 = arith.addf %53, %131 : vector<2x1x256xf32>
    %133 = vector.extract_strided_slice %110 {offsets = [0, 0, 32], sizes = [2, 2, 256], strides = [1, 1, 1]} : vector<2x2x352xf32> to vector<2x2x256xf32>
    %c15 = arith.constant 15 : index
    %134 = memref.load %arg1[%c15] : memref<98xf32, #tpu.memory_space<smem>>
    %135 = vector.extract_strided_slice %133 {offsets = [0, 0, 0], sizes = [2, 1, 256], strides = [1, 1, 1]} : vector<2x2x256xf32> to vector<2x1x256xf32>
    %136 = vector.broadcast %134 : f32 to vector<2x1x256xf32>
    %137 = arith.mulf %136, %135 : vector<2x1x256xf32>
    %c64 = arith.constant 64 : index
    %138 = memref.load %arg1[%c64] : memref<98xf32, #tpu.memory_space<smem>>
    %139 = vector.extract_strided_slice %133 {offsets = [0, 1, 0], sizes = [2, 1, 256], strides = [1, 1, 1]} : vector<2x2x256xf32> to vector<2x1x256xf32>
    %140 = vector.broadcast %138 : f32 to vector<2x1x256xf32>
    %141 = arith.mulf %140, %139 : vector<2x1x256xf32>
    %142 = arith.addf %137, %141 : vector<2x1x256xf32>
    %143 = arith.addf %63, %142 : vector<2x1x256xf32>
    %144 = vector.extract_strided_slice %110 {offsets = [0, 0, 48], sizes = [2, 2, 256], strides = [1, 1, 1]} : vector<2x2x352xf32> to vector<2x2x256xf32>
    %c22 = arith.constant 22 : index
    %145 = memref.load %arg1[%c22] : memref<98xf32, #tpu.memory_space<smem>>
    %146 = vector.extract_strided_slice %144 {offsets = [0, 0, 0], sizes = [2, 1, 256], strides = [1, 1, 1]} : vector<2x2x256xf32> to vector<2x1x256xf32>
    %147 = vector.broadcast %145 : f32 to vector<2x1x256xf32>
    %148 = arith.mulf %147, %146 : vector<2x1x256xf32>
    %c71 = arith.constant 71 : index
    %149 = memref.load %arg1[%c71] : memref<98xf32, #tpu.memory_space<smem>>
    %150 = vector.extract_strided_slice %144 {offsets = [0, 1, 0], sizes = [2, 1, 256], strides = [1, 1, 1]} : vector<2x2x256xf32> to vector<2x1x256xf32>
    %151 = vector.broadcast %149 : f32 to vector<2x1x256xf32>
    %152 = arith.mulf %151, %150 : vector<2x1x256xf32>
    %153 = arith.addf %148, %152 : vector<2x1x256xf32>
    %154 = arith.addf %73, %153 : vector<2x1x256xf32>
    %155 = vector.extract_strided_slice %110 {offsets = [0, 0, 64], sizes = [2, 2, 256], strides = [1, 1, 1]} : vector<2x2x352xf32> to vector<2x2x256xf32>
    %c29 = arith.constant 29 : index
    %156 = memref.load %arg1[%c29] : memref<98xf32, #tpu.memory_space<smem>>
    %157 = vector.extract_strided_slice %155 {offsets = [0, 0, 0], sizes = [2, 1, 256], strides = [1, 1, 1]} : vector<2x2x256xf32> to vector<2x1x256xf32>
    %158 = vector.broadcast %156 : f32 to vector<2x1x256xf32>
    %159 = arith.mulf %158, %157 : vector<2x1x256xf32>
    %c78 = arith.constant 78 : index
    %160 = memref.load %arg1[%c78] : memref<98xf32, #tpu.memory_space<smem>>
    %161 = vector.extract_strided_slice %155 {offsets = [0, 1, 0], sizes = [2, 1, 256], strides = [1, 1, 1]} : vector<2x2x256xf32> to vector<2x1x256xf32>
    %162 = vector.broadcast %160 : f32 to vector<2x1x256xf32>
    %163 = arith.mulf %162, %161 : vector<2x1x256xf32>
    %164 = arith.addf %159, %163 : vector<2x1x256xf32>
    %165 = arith.addf %83, %164 : vector<2x1x256xf32>
    %166 = vector.extract_strided_slice %110 {offsets = [0, 0, 80], sizes = [2, 2, 256], strides = [1, 1, 1]} : vector<2x2x352xf32> to vector<2x2x256xf32>
    %c36 = arith.constant 36 : index
    %167 = memref.load %arg1[%c36] : memref<98xf32, #tpu.memory_space<smem>>
    %168 = vector.extract_strided_slice %166 {offsets = [0, 0, 0], sizes = [2, 1, 256], strides = [1, 1, 1]} : vector<2x2x256xf32> to vector<2x1x256xf32>
    %169 = vector.broadcast %167 : f32 to vector<2x1x256xf32>
    %170 = arith.mulf %169, %168 : vector<2x1x256xf32>
    %c85 = arith.constant 85 : index
    %171 = memref.load %arg1[%c85] : memref<98xf32, #tpu.memory_space<smem>>
    %172 = vector.extract_strided_slice %166 {offsets = [0, 1, 0], sizes = [2, 1, 256], strides = [1, 1, 1]} : vector<2x2x256xf32> to vector<2x1x256xf32>
    %173 = vector.broadcast %171 : f32 to vector<2x1x256xf32>
    %174 = arith.mulf %173, %172 : vector<2x1x256xf32>
    %175 = arith.addf %170, %174 : vector<2x1x256xf32>
    %176 = arith.addf %93, %175 : vector<2x1x256xf32>
    %177 = vector.extract_strided_slice %110 {offsets = [0, 0, 96], sizes = [2, 2, 256], strides = [1, 1, 1]} : vector<2x2x352xf32> to vector<2x2x256xf32>
    %c43 = arith.constant 43 : index
    %178 = memref.load %arg1[%c43] : memref<98xf32, #tpu.memory_space<smem>>
    %179 = vector.extract_strided_slice %177 {offsets = [0, 0, 0], sizes = [2, 1, 256], strides = [1, 1, 1]} : vector<2x2x256xf32> to vector<2x1x256xf32>
    %180 = vector.broadcast %178 : f32 to vector<2x1x256xf32>
    %181 = arith.mulf %180, %179 : vector<2x1x256xf32>
    %c92 = arith.constant 92 : index
    %182 = memref.load %arg1[%c92] : memref<98xf32, #tpu.memory_space<smem>>
    %183 = vector.extract_strided_slice %177 {offsets = [0, 1, 0], sizes = [2, 1, 256], strides = [1, 1, 1]} : vector<2x2x256xf32> to vector<2x1x256xf32>
    %184 = vector.broadcast %182 : f32 to vector<2x1x256xf32>
    %185 = arith.mulf %184, %183 : vector<2x1x256xf32>
    %186 = arith.addf %181, %185 : vector<2x1x256xf32>
    %187 = arith.addf %103, %186 : vector<2x1x256xf32>
    %188 = vector.extract_strided_slice %9 {offsets = [0, 0, 2], sizes = [2, 2, 352], strides = [1, 1, 1]} : vector<2x2x358xf32> to vector<2x2x352xf32>
    %c1_i32_11 = arith.constant 1 : i32
    %189 = vector.broadcast %c1_i32_11 : i32 to vector<1x1x352xi32>
    %190 = arith.cmpi sge, %26, %189 : vector<1x1x352xi32>
    %cst_12 = arith.constant 0.000000e+00 : f32
    %191 = vector.shape_cast %190 : vector<1x1x352xi1> to vector<1x1x352xi1>
    %192 = vector.broadcast %191 : vector<1x1x352xi1> to vector<2x2x352xi1>
    %193 = vector.broadcast %cst_12 : f32 to vector<2x2x352xf32>
    %194 = arith.select %192, %188, %193 : vector<2x2x352xi1>, vector<2x2x352xf32>
    %195 = vector.extract_strided_slice %194 {offsets = [0, 0, 0], sizes = [2, 2, 256], strides = [1, 1, 1]} : vector<2x2x352xf32> to vector<2x2x256xf32>
    %c2 = arith.constant 2 : index
    %196 = memref.load %arg1[%c2] : memref<98xf32, #tpu.memory_space<smem>>
    %197 = vector.extract_strided_slice %195 {offsets = [0, 0, 0], sizes = [2, 1, 256], strides = [1, 1, 1]} : vector<2x2x256xf32> to vector<2x1x256xf32>
    %198 = vector.broadcast %196 : f32 to vector<2x1x256xf32>
    %199 = arith.mulf %198, %197 : vector<2x1x256xf32>
    %c51 = arith.constant 51 : index
    %200 = memref.load %arg1[%c51] : memref<98xf32, #tpu.memory_space<smem>>
    %201 = vector.extract_strided_slice %195 {offsets = [0, 1, 0], sizes = [2, 1, 256], strides = [1, 1, 1]} : vector<2x2x256xf32> to vector<2x1x256xf32>
    %202 = vector.broadcast %200 : f32 to vector<2x1x256xf32>
    %203 = arith.mulf %202, %201 : vector<2x1x256xf32>
    %204 = arith.addf %199, %203 : vector<2x1x256xf32>
    %205 = arith.addf %121, %204 : vector<2x1x256xf32>
    %206 = vector.extract_strided_slice %194 {offsets = [0, 0, 16], sizes = [2, 2, 256], strides = [1, 1, 1]} : vector<2x2x352xf32> to vector<2x2x256xf32>
    %c9 = arith.constant 9 : index
    %207 = memref.load %arg1[%c9] : memref<98xf32, #tpu.memory_space<smem>>
    %208 = vector.extract_strided_slice %206 {offsets = [0, 0, 0], sizes = [2, 1, 256], strides = [1, 1, 1]} : vector<2x2x256xf32> to vector<2x1x256xf32>
    %209 = vector.broadcast %207 : f32 to vector<2x1x256xf32>
    %210 = arith.mulf %209, %208 : vector<2x1x256xf32>
    %c58 = arith.constant 58 : index
    %211 = memref.load %arg1[%c58] : memref<98xf32, #tpu.memory_space<smem>>
    %212 = vector.extract_strided_slice %206 {offsets = [0, 1, 0], sizes = [2, 1, 256], strides = [1, 1, 1]} : vector<2x2x256xf32> to vector<2x1x256xf32>
    %213 = vector.broadcast %211 : f32 to vector<2x1x256xf32>
    %214 = arith.mulf %213, %212 : vector<2x1x256xf32>
    %215 = arith.addf %210, %214 : vector<2x1x256xf32>
    %216 = arith.addf %132, %215 : vector<2x1x256xf32>
    %217 = vector.extract_strided_slice %194 {offsets = [0, 0, 32], sizes = [2, 2, 256], strides = [1, 1, 1]} : vector<2x2x352xf32> to vector<2x2x256xf32>
    %c16 = arith.constant 16 : index
    %218 = memref.load %arg1[%c16] : memref<98xf32, #tpu.memory_space<smem>>
    %219 = vector.extract_strided_slice %217 {offsets = [0, 0, 0], sizes = [2, 1, 256], strides = [1, 1, 1]} : vector<2x2x256xf32> to vector<2x1x256xf32>
    %220 = vector.broadcast %218 : f32 to vector<2x1x256xf32>
    %221 = arith.mulf %220, %219 : vector<2x1x256xf32>
    %c65 = arith.constant 65 : index
    %222 = memref.load %arg1[%c65] : memref<98xf32, #tpu.memory_space<smem>>
    %223 = vector.extract_strided_slice %217 {offsets = [0, 1, 0], sizes = [2, 1, 256], strides = [1, 1, 1]} : vector<2x2x256xf32> to vector<2x1x256xf32>
    %224 = vector.broadcast %222 : f32 to vector<2x1x256xf32>
    %225 = arith.mulf %224, %223 : vector<2x1x256xf32>
    %226 = arith.addf %221, %225 : vector<2x1x256xf32>
    %227 = arith.addf %143, %226 : vector<2x1x256xf32>
    %228 = vector.extract_strided_slice %194 {offsets = [0, 0, 48], sizes = [2, 2, 256], strides = [1, 1, 1]} : vector<2x2x352xf32> to vector<2x2x256xf32>
    %c23 = arith.constant 23 : index
    %229 = memref.load %arg1[%c23] : memref<98xf32, #tpu.memory_space<smem>>
    %230 = vector.extract_strided_slice %228 {offsets = [0, 0, 0], sizes = [2, 1, 256], strides = [1, 1, 1]} : vector<2x2x256xf32> to vector<2x1x256xf32>
    %231 = vector.broadcast %229 : f32 to vector<2x1x256xf32>
    %232 = arith.mulf %231, %230 : vector<2x1x256xf32>
    %c72 = arith.constant 72 : index
    %233 = memref.load %arg1[%c72] : memref<98xf32, #tpu.memory_space<smem>>
    %234 = vector.extract_strided_slice %228 {offsets = [0, 1, 0], sizes = [2, 1, 256], strides = [1, 1, 1]} : vector<2x2x256xf32> to vector<2x1x256xf32>
    %235 = vector.broadcast %233 : f32 to vector<2x1x256xf32>
    %236 = arith.mulf %235, %234 : vector<2x1x256xf32>
    %237 = arith.addf %232, %236 : vector<2x1x256xf32>
    %238 = arith.addf %154, %237 : vector<2x1x256xf32>
    %239 = vector.extract_strided_slice %194 {offsets = [0, 0, 64], sizes = [2, 2, 256], strides = [1, 1, 1]} : vector<2x2x352xf32> to vector<2x2x256xf32>
    %c30 = arith.constant 30 : index
    %240 = memref.load %arg1[%c30] : memref<98xf32, #tpu.memory_space<smem>>
    %241 = vector.extract_strided_slice %239 {offsets = [0, 0, 0], sizes = [2, 1, 256], strides = [1, 1, 1]} : vector<2x2x256xf32> to vector<2x1x256xf32>
    %242 = vector.broadcast %240 : f32 to vector<2x1x256xf32>
    %243 = arith.mulf %242, %241 : vector<2x1x256xf32>
    %c79 = arith.constant 79 : index
    %244 = memref.load %arg1[%c79] : memref<98xf32, #tpu.memory_space<smem>>
    %245 = vector.extract_strided_slice %239 {offsets = [0, 1, 0], sizes = [2, 1, 256], strides = [1, 1, 1]} : vector<2x2x256xf32> to vector<2x1x256xf32>
    %246 = vector.broadcast %244 : f32 to vector<2x1x256xf32>
    %247 = arith.mulf %246, %245 : vector<2x1x256xf32>
    %248 = arith.addf %243, %247 : vector<2x1x256xf32>
    %249 = arith.addf %165, %248 : vector<2x1x256xf32>
    %250 = vector.extract_strided_slice %194 {offsets = [0, 0, 80], sizes = [2, 2, 256], strides = [1, 1, 1]} : vector<2x2x352xf32> to vector<2x2x256xf32>
    %c37 = arith.constant 37 : index
    %251 = memref.load %arg1[%c37] : memref<98xf32, #tpu.memory_space<smem>>
    %252 = vector.extract_strided_slice %250 {offsets = [0, 0, 0], sizes = [2, 1, 256], strides = [1, 1, 1]} : vector<2x2x256xf32> to vector<2x1x256xf32>
    %253 = vector.broadcast %251 : f32 to vector<2x1x256xf32>
    %254 = arith.mulf %253, %252 : vector<2x1x256xf32>
    %c86 = arith.constant 86 : index
    %255 = memref.load %arg1[%c86] : memref<98xf32, #tpu.memory_space<smem>>
    %256 = vector.extract_strided_slice %250 {offsets = [0, 1, 0], sizes = [2, 1, 256], strides = [1, 1, 1]} : vector<2x2x256xf32> to vector<2x1x256xf32>
    %257 = vector.broadcast %255 : f32 to vector<2x1x256xf32>
    %258 = arith.mulf %257, %256 : vector<2x1x256xf32>
    %259 = arith.addf %254, %258 : vector<2x1x256xf32>
    %260 = arith.addf %176, %259 : vector<2x1x256xf32>
    %261 = vector.extract_strided_slice %194 {offsets = [0, 0, 96], sizes = [2, 2, 256], strides = [1, 1, 1]} : vector<2x2x352xf32> to vector<2x2x256xf32>
    %c44 = arith.constant 44 : index
    %262 = memref.load %arg1[%c44] : memref<98xf32, #tpu.memory_space<smem>>
    %263 = vector.extract_strided_slice %261 {offsets = [0, 0, 0], sizes = [2, 1, 256], strides = [1, 1, 1]} : vector<2x2x256xf32> to vector<2x1x256xf32>
    %264 = vector.broadcast %262 : f32 to vector<2x1x256xf32>
    %265 = arith.mulf %264, %263 : vector<2x1x256xf32>
    %c93 = arith.constant 93 : index
    %266 = memref.load %arg1[%c93] : memref<98xf32, #tpu.memory_space<smem>>
    %267 = vector.extract_strided_slice %261 {offsets = [0, 1, 0], sizes = [2, 1, 256], strides = [1, 1, 1]} : vector<2x2x256xf32> to vector<2x1x256xf32>
    %268 = vector.broadcast %266 : f32 to vector<2x1x256xf32>
    %269 = arith.mulf %268, %267 : vector<2x1x256xf32>
    %270 = arith.addf %265, %269 : vector<2x1x256xf32>
    %271 = arith.addf %187, %270 : vector<2x1x256xf32>
    %272 = vector.extract_strided_slice %9 {offsets = [0, 0, 3], sizes = [2, 2, 352], strides = [1, 1, 1]} : vector<2x2x358xf32> to vector<2x2x352xf32>
    %273 = vector.extract_strided_slice %272 {offsets = [0, 0, 0], sizes = [2, 2, 256], strides = [1, 1, 1]} : vector<2x2x352xf32> to vector<2x2x256xf32>
    %c3 = arith.constant 3 : index
    %274 = memref.load %arg1[%c3] : memref<98xf32, #tpu.memory_space<smem>>
    %275 = vector.extract_strided_slice %273 {offsets = [0, 0, 0], sizes = [2, 1, 256], strides = [1, 1, 1]} : vector<2x2x256xf32> to vector<2x1x256xf32>
    %276 = vector.broadcast %274 : f32 to vector<2x1x256xf32>
    %277 = arith.mulf %276, %275 : vector<2x1x256xf32>
    %c52 = arith.constant 52 : index
    %278 = memref.load %arg1[%c52] : memref<98xf32, #tpu.memory_space<smem>>
    %279 = vector.extract_strided_slice %273 {offsets = [0, 1, 0], sizes = [2, 1, 256], strides = [1, 1, 1]} : vector<2x2x256xf32> to vector<2x1x256xf32>
    %280 = vector.broadcast %278 : f32 to vector<2x1x256xf32>
    %281 = arith.mulf %280, %279 : vector<2x1x256xf32>
    %282 = arith.addf %277, %281 : vector<2x1x256xf32>
    %283 = arith.addf %205, %282 : vector<2x1x256xf32>
    %284 = vector.extract_strided_slice %272 {offsets = [0, 0, 16], sizes = [2, 2, 256], strides = [1, 1, 1]} : vector<2x2x352xf32> to vector<2x2x256xf32>
    %c10 = arith.constant 10 : index
    %285 = memref.load %arg1[%c10] : memref<98xf32, #tpu.memory_space<smem>>
    %286 = vector.extract_strided_slice %284 {offsets = [0, 0, 0], sizes = [2, 1, 256], strides = [1, 1, 1]} : vector<2x2x256xf32> to vector<2x1x256xf32>
    %287 = vector.broadcast %285 : f32 to vector<2x1x256xf32>
    %288 = arith.mulf %287, %286 : vector<2x1x256xf32>
    %c59 = arith.constant 59 : index
    %289 = memref.load %arg1[%c59] : memref<98xf32, #tpu.memory_space<smem>>
    %290 = vector.extract_strided_slice %284 {offsets = [0, 1, 0], sizes = [2, 1, 256], strides = [1, 1, 1]} : vector<2x2x256xf32> to vector<2x1x256xf32>
    %291 = vector.broadcast %289 : f32 to vector<2x1x256xf32>
    %292 = arith.mulf %291, %290 : vector<2x1x256xf32>
    %293 = arith.addf %288, %292 : vector<2x1x256xf32>
    %294 = arith.addf %216, %293 : vector<2x1x256xf32>
    %295 = vector.extract_strided_slice %272 {offsets = [0, 0, 32], sizes = [2, 2, 256], strides = [1, 1, 1]} : vector<2x2x352xf32> to vector<2x2x256xf32>
    %c17 = arith.constant 17 : index
    %296 = memref.load %arg1[%c17] : memref<98xf32, #tpu.memory_space<smem>>
    %297 = vector.extract_strided_slice %295 {offsets = [0, 0, 0], sizes = [2, 1, 256], strides = [1, 1, 1]} : vector<2x2x256xf32> to vector<2x1x256xf32>
    %298 = vector.broadcast %296 : f32 to vector<2x1x256xf32>
    %299 = arith.mulf %298, %297 : vector<2x1x256xf32>
    %c66 = arith.constant 66 : index
    %300 = memref.load %arg1[%c66] : memref<98xf32, #tpu.memory_space<smem>>
    %301 = vector.extract_strided_slice %295 {offsets = [0, 1, 0], sizes = [2, 1, 256], strides = [1, 1, 1]} : vector<2x2x256xf32> to vector<2x1x256xf32>
    %302 = vector.broadcast %300 : f32 to vector<2x1x256xf32>
    %303 = arith.mulf %302, %301 : vector<2x1x256xf32>
    %304 = arith.addf %299, %303 : vector<2x1x256xf32>
    %305 = arith.addf %227, %304 : vector<2x1x256xf32>
    %306 = vector.extract_strided_slice %272 {offsets = [0, 0, 48], sizes = [2, 2, 256], strides = [1, 1, 1]} : vector<2x2x352xf32> to vector<2x2x256xf32>
    %c24 = arith.constant 24 : index
    %307 = memref.load %arg1[%c24] : memref<98xf32, #tpu.memory_space<smem>>
    %308 = vector.extract_strided_slice %306 {offsets = [0, 0, 0], sizes = [2, 1, 256], strides = [1, 1, 1]} : vector<2x2x256xf32> to vector<2x1x256xf32>
    %309 = vector.broadcast %307 : f32 to vector<2x1x256xf32>
    %310 = arith.mulf %309, %308 : vector<2x1x256xf32>
    %c73 = arith.constant 73 : index
    %311 = memref.load %arg1[%c73] : memref<98xf32, #tpu.memory_space<smem>>
    %312 = vector.extract_strided_slice %306 {offsets = [0, 1, 0], sizes = [2, 1, 256], strides = [1, 1, 1]} : vector<2x2x256xf32> to vector<2x1x256xf32>
    %313 = vector.broadcast %311 : f32 to vector<2x1x256xf32>
    %314 = arith.mulf %313, %312 : vector<2x1x256xf32>
    %315 = arith.addf %310, %314 : vector<2x1x256xf32>
    %316 = arith.addf %238, %315 : vector<2x1x256xf32>
    %317 = vector.extract_strided_slice %272 {offsets = [0, 0, 64], sizes = [2, 2, 256], strides = [1, 1, 1]} : vector<2x2x352xf32> to vector<2x2x256xf32>
    %c31 = arith.constant 31 : index
    %318 = memref.load %arg1[%c31] : memref<98xf32, #tpu.memory_space<smem>>
    %319 = vector.extract_strided_slice %317 {offsets = [0, 0, 0], sizes = [2, 1, 256], strides = [1, 1, 1]} : vector<2x2x256xf32> to vector<2x1x256xf32>
    %320 = vector.broadcast %318 : f32 to vector<2x1x256xf32>
    %321 = arith.mulf %320, %319 : vector<2x1x256xf32>
    %c80 = arith.constant 80 : index
    %322 = memref.load %arg1[%c80] : memref<98xf32, #tpu.memory_space<smem>>
    %323 = vector.extract_strided_slice %317 {offsets = [0, 1, 0], sizes = [2, 1, 256], strides = [1, 1, 1]} : vector<2x2x256xf32> to vector<2x1x256xf32>
    %324 = vector.broadcast %322 : f32 to vector<2x1x256xf32>
    %325 = arith.mulf %324, %323 : vector<2x1x256xf32>
    %326 = arith.addf %321, %325 : vector<2x1x256xf32>
    %327 = arith.addf %249, %326 : vector<2x1x256xf32>
    %328 = vector.extract_strided_slice %272 {offsets = [0, 0, 80], sizes = [2, 2, 256], strides = [1, 1, 1]} : vector<2x2x352xf32> to vector<2x2x256xf32>
    %c38 = arith.constant 38 : index
    %329 = memref.load %arg1[%c38] : memref<98xf32, #tpu.memory_space<smem>>
    %330 = vector.extract_strided_slice %328 {offsets = [0, 0, 0], sizes = [2, 1, 256], strides = [1, 1, 1]} : vector<2x2x256xf32> to vector<2x1x256xf32>
    %331 = vector.broadcast %329 : f32 to vector<2x1x256xf32>
    %332 = arith.mulf %331, %330 : vector<2x1x256xf32>
    %c87 = arith.constant 87 : index
    %333 = memref.load %arg1[%c87] : memref<98xf32, #tpu.memory_space<smem>>
    %334 = vector.extract_strided_slice %328 {offsets = [0, 1, 0], sizes = [2, 1, 256], strides = [1, 1, 1]} : vector<2x2x256xf32> to vector<2x1x256xf32>
    %335 = vector.broadcast %333 : f32 to vector<2x1x256xf32>
    %336 = arith.mulf %335, %334 : vector<2x1x256xf32>
    %337 = arith.addf %332, %336 : vector<2x1x256xf32>
    %338 = arith.addf %260, %337 : vector<2x1x256xf32>
    %339 = vector.extract_strided_slice %272 {offsets = [0, 0, 96], sizes = [2, 2, 256], strides = [1, 1, 1]} : vector<2x2x352xf32> to vector<2x2x256xf32>
    %c45 = arith.constant 45 : index
    %340 = memref.load %arg1[%c45] : memref<98xf32, #tpu.memory_space<smem>>
    %341 = vector.extract_strided_slice %339 {offsets = [0, 0, 0], sizes = [2, 1, 256], strides = [1, 1, 1]} : vector<2x2x256xf32> to vector<2x1x256xf32>
    %342 = vector.broadcast %340 : f32 to vector<2x1x256xf32>
    %343 = arith.mulf %342, %341 : vector<2x1x256xf32>
    %c94 = arith.constant 94 : index
    %344 = memref.load %arg1[%c94] : memref<98xf32, #tpu.memory_space<smem>>
    %345 = vector.extract_strided_slice %339 {offsets = [0, 1, 0], sizes = [2, 1, 256], strides = [1, 1, 1]} : vector<2x2x256xf32> to vector<2x1x256xf32>
    %346 = vector.broadcast %344 : f32 to vector<2x1x256xf32>
    %347 = arith.mulf %346, %345 : vector<2x1x256xf32>
    %348 = arith.addf %343, %347 : vector<2x1x256xf32>
    %349 = arith.addf %271, %348 : vector<2x1x256xf32>
    %350 = vector.extract_strided_slice %9 {offsets = [0, 0, 4], sizes = [2, 2, 352], strides = [1, 1, 1]} : vector<2x2x358xf32> to vector<2x2x352xf32>
    %c14_i32 = arith.constant 14 : i32
    %351 = vector.broadcast %c14_i32 : i32 to vector<1x1x352xi32>
    %352 = arith.cmpi sle, %26, %351 : vector<1x1x352xi32>
    %cst_13 = arith.constant 0.000000e+00 : f32
    %353 = vector.shape_cast %352 : vector<1x1x352xi1> to vector<1x1x352xi1>
    %354 = vector.broadcast %353 : vector<1x1x352xi1> to vector<2x2x352xi1>
    %355 = vector.broadcast %cst_13 : f32 to vector<2x2x352xf32>
    %356 = arith.select %354, %350, %355 : vector<2x2x352xi1>, vector<2x2x352xf32>
    %357 = vector.extract_strided_slice %356 {offsets = [0, 0, 0], sizes = [2, 2, 256], strides = [1, 1, 1]} : vector<2x2x352xf32> to vector<2x2x256xf32>
    %c4 = arith.constant 4 : index
    %358 = memref.load %arg1[%c4] : memref<98xf32, #tpu.memory_space<smem>>
    %359 = vector.extract_strided_slice %357 {offsets = [0, 0, 0], sizes = [2, 1, 256], strides = [1, 1, 1]} : vector<2x2x256xf32> to vector<2x1x256xf32>
    %360 = vector.broadcast %358 : f32 to vector<2x1x256xf32>
    %361 = arith.mulf %360, %359 : vector<2x1x256xf32>
    %c53 = arith.constant 53 : index
    %362 = memref.load %arg1[%c53] : memref<98xf32, #tpu.memory_space<smem>>
    %363 = vector.extract_strided_slice %357 {offsets = [0, 1, 0], sizes = [2, 1, 256], strides = [1, 1, 1]} : vector<2x2x256xf32> to vector<2x1x256xf32>
    %364 = vector.broadcast %362 : f32 to vector<2x1x256xf32>
    %365 = arith.mulf %364, %363 : vector<2x1x256xf32>
    %366 = arith.addf %361, %365 : vector<2x1x256xf32>
    %367 = arith.addf %283, %366 : vector<2x1x256xf32>
    %368 = vector.extract_strided_slice %356 {offsets = [0, 0, 16], sizes = [2, 2, 256], strides = [1, 1, 1]} : vector<2x2x352xf32> to vector<2x2x256xf32>
    %c11 = arith.constant 11 : index
    %369 = memref.load %arg1[%c11] : memref<98xf32, #tpu.memory_space<smem>>
    %370 = vector.extract_strided_slice %368 {offsets = [0, 0, 0], sizes = [2, 1, 256], strides = [1, 1, 1]} : vector<2x2x256xf32> to vector<2x1x256xf32>
    %371 = vector.broadcast %369 : f32 to vector<2x1x256xf32>
    %372 = arith.mulf %371, %370 : vector<2x1x256xf32>
    %c60 = arith.constant 60 : index
    %373 = memref.load %arg1[%c60] : memref<98xf32, #tpu.memory_space<smem>>
    %374 = vector.extract_strided_slice %368 {offsets = [0, 1, 0], sizes = [2, 1, 256], strides = [1, 1, 1]} : vector<2x2x256xf32> to vector<2x1x256xf32>
    %375 = vector.broadcast %373 : f32 to vector<2x1x256xf32>
    %376 = arith.mulf %375, %374 : vector<2x1x256xf32>
    %377 = arith.addf %372, %376 : vector<2x1x256xf32>
    %378 = arith.addf %294, %377 : vector<2x1x256xf32>
    %379 = vector.extract_strided_slice %356 {offsets = [0, 0, 32], sizes = [2, 2, 256], strides = [1, 1, 1]} : vector<2x2x352xf32> to vector<2x2x256xf32>
    %c18 = arith.constant 18 : index
    %380 = memref.load %arg1[%c18] : memref<98xf32, #tpu.memory_space<smem>>
    %381 = vector.extract_strided_slice %379 {offsets = [0, 0, 0], sizes = [2, 1, 256], strides = [1, 1, 1]} : vector<2x2x256xf32> to vector<2x1x256xf32>
    %382 = vector.broadcast %380 : f32 to vector<2x1x256xf32>
    %383 = arith.mulf %382, %381 : vector<2x1x256xf32>
    %c67 = arith.constant 67 : index
    %384 = memref.load %arg1[%c67] : memref<98xf32, #tpu.memory_space<smem>>
    %385 = vector.extract_strided_slice %379 {offsets = [0, 1, 0], sizes = [2, 1, 256], strides = [1, 1, 1]} : vector<2x2x256xf32> to vector<2x1x256xf32>
    %386 = vector.broadcast %384 : f32 to vector<2x1x256xf32>
    %387 = arith.mulf %386, %385 : vector<2x1x256xf32>
    %388 = arith.addf %383, %387 : vector<2x1x256xf32>
    %389 = arith.addf %305, %388 : vector<2x1x256xf32>
    %390 = vector.extract_strided_slice %356 {offsets = [0, 0, 48], sizes = [2, 2, 256], strides = [1, 1, 1]} : vector<2x2x352xf32> to vector<2x2x256xf32>
    %c25 = arith.constant 25 : index
    %391 = memref.load %arg1[%c25] : memref<98xf32, #tpu.memory_space<smem>>
    %392 = vector.extract_strided_slice %390 {offsets = [0, 0, 0], sizes = [2, 1, 256], strides = [1, 1, 1]} : vector<2x2x256xf32> to vector<2x1x256xf32>
    %393 = vector.broadcast %391 : f32 to vector<2x1x256xf32>
    %394 = arith.mulf %393, %392 : vector<2x1x256xf32>
    %c74 = arith.constant 74 : index
    %395 = memref.load %arg1[%c74] : memref<98xf32, #tpu.memory_space<smem>>
    %396 = vector.extract_strided_slice %390 {offsets = [0, 1, 0], sizes = [2, 1, 256], strides = [1, 1, 1]} : vector<2x2x256xf32> to vector<2x1x256xf32>
    %397 = vector.broadcast %395 : f32 to vector<2x1x256xf32>
    %398 = arith.mulf %397, %396 : vector<2x1x256xf32>
    %399 = arith.addf %394, %398 : vector<2x1x256xf32>
    %400 = arith.addf %316, %399 : vector<2x1x256xf32>
    %401 = vector.extract_strided_slice %356 {offsets = [0, 0, 64], sizes = [2, 2, 256], strides = [1, 1, 1]} : vector<2x2x352xf32> to vector<2x2x256xf32>
    %c32 = arith.constant 32 : index
    %402 = memref.load %arg1[%c32] : memref<98xf32, #tpu.memory_space<smem>>
    %403 = vector.extract_strided_slice %401 {offsets = [0, 0, 0], sizes = [2, 1, 256], strides = [1, 1, 1]} : vector<2x2x256xf32> to vector<2x1x256xf32>
    %404 = vector.broadcast %402 : f32 to vector<2x1x256xf32>
    %405 = arith.mulf %404, %403 : vector<2x1x256xf32>
    %c81 = arith.constant 81 : index
    %406 = memref.load %arg1[%c81] : memref<98xf32, #tpu.memory_space<smem>>
    %407 = vector.extract_strided_slice %401 {offsets = [0, 1, 0], sizes = [2, 1, 256], strides = [1, 1, 1]} : vector<2x2x256xf32> to vector<2x1x256xf32>
    %408 = vector.broadcast %406 : f32 to vector<2x1x256xf32>
    %409 = arith.mulf %408, %407 : vector<2x1x256xf32>
    %410 = arith.addf %405, %409 : vector<2x1x256xf32>
    %411 = arith.addf %327, %410 : vector<2x1x256xf32>
    %412 = vector.extract_strided_slice %356 {offsets = [0, 0, 80], sizes = [2, 2, 256], strides = [1, 1, 1]} : vector<2x2x352xf32> to vector<2x2x256xf32>
    %c39 = arith.constant 39 : index
    %413 = memref.load %arg1[%c39] : memref<98xf32, #tpu.memory_space<smem>>
    %414 = vector.extract_strided_slice %412 {offsets = [0, 0, 0], sizes = [2, 1, 256], strides = [1, 1, 1]} : vector<2x2x256xf32> to vector<2x1x256xf32>
    %415 = vector.broadcast %413 : f32 to vector<2x1x256xf32>
    %416 = arith.mulf %415, %414 : vector<2x1x256xf32>
    %c88 = arith.constant 88 : index
    %417 = memref.load %arg1[%c88] : memref<98xf32, #tpu.memory_space<smem>>
    %418 = vector.extract_strided_slice %412 {offsets = [0, 1, 0], sizes = [2, 1, 256], strides = [1, 1, 1]} : vector<2x2x256xf32> to vector<2x1x256xf32>
    %419 = vector.broadcast %417 : f32 to vector<2x1x256xf32>
    %420 = arith.mulf %419, %418 : vector<2x1x256xf32>
    %421 = arith.addf %416, %420 : vector<2x1x256xf32>
    %422 = arith.addf %338, %421 : vector<2x1x256xf32>
    %423 = vector.extract_strided_slice %356 {offsets = [0, 0, 96], sizes = [2, 2, 256], strides = [1, 1, 1]} : vector<2x2x352xf32> to vector<2x2x256xf32>
    %c46 = arith.constant 46 : index
    %424 = memref.load %arg1[%c46] : memref<98xf32, #tpu.memory_space<smem>>
    %425 = vector.extract_strided_slice %423 {offsets = [0, 0, 0], sizes = [2, 1, 256], strides = [1, 1, 1]} : vector<2x2x256xf32> to vector<2x1x256xf32>
    %426 = vector.broadcast %424 : f32 to vector<2x1x256xf32>
    %427 = arith.mulf %426, %425 : vector<2x1x256xf32>
    %c95 = arith.constant 95 : index
    %428 = memref.load %arg1[%c95] : memref<98xf32, #tpu.memory_space<smem>>
    %429 = vector.extract_strided_slice %423 {offsets = [0, 1, 0], sizes = [2, 1, 256], strides = [1, 1, 1]} : vector<2x2x256xf32> to vector<2x1x256xf32>
    %430 = vector.broadcast %428 : f32 to vector<2x1x256xf32>
    %431 = arith.mulf %430, %429 : vector<2x1x256xf32>
    %432 = arith.addf %427, %431 : vector<2x1x256xf32>
    %433 = arith.addf %349, %432 : vector<2x1x256xf32>
    %434 = vector.extract_strided_slice %9 {offsets = [0, 0, 5], sizes = [2, 2, 352], strides = [1, 1, 1]} : vector<2x2x358xf32> to vector<2x2x352xf32>
    %c13_i32 = arith.constant 13 : i32
    %435 = vector.broadcast %c13_i32 : i32 to vector<1x1x352xi32>
    %436 = arith.cmpi sle, %26, %435 : vector<1x1x352xi32>
    %cst_14 = arith.constant 0.000000e+00 : f32
    %437 = vector.shape_cast %436 : vector<1x1x352xi1> to vector<1x1x352xi1>
    %438 = vector.broadcast %437 : vector<1x1x352xi1> to vector<2x2x352xi1>
    %439 = vector.broadcast %cst_14 : f32 to vector<2x2x352xf32>
    %440 = arith.select %438, %434, %439 : vector<2x2x352xi1>, vector<2x2x352xf32>
    %441 = vector.extract_strided_slice %440 {offsets = [0, 0, 0], sizes = [2, 2, 256], strides = [1, 1, 1]} : vector<2x2x352xf32> to vector<2x2x256xf32>
    %c5 = arith.constant 5 : index
    %442 = memref.load %arg1[%c5] : memref<98xf32, #tpu.memory_space<smem>>
    %443 = vector.extract_strided_slice %441 {offsets = [0, 0, 0], sizes = [2, 1, 256], strides = [1, 1, 1]} : vector<2x2x256xf32> to vector<2x1x256xf32>
    %444 = vector.broadcast %442 : f32 to vector<2x1x256xf32>
    %445 = arith.mulf %444, %443 : vector<2x1x256xf32>
    %c54 = arith.constant 54 : index
    %446 = memref.load %arg1[%c54] : memref<98xf32, #tpu.memory_space<smem>>
    %447 = vector.extract_strided_slice %441 {offsets = [0, 1, 0], sizes = [2, 1, 256], strides = [1, 1, 1]} : vector<2x2x256xf32> to vector<2x1x256xf32>
    %448 = vector.broadcast %446 : f32 to vector<2x1x256xf32>
    %449 = arith.mulf %448, %447 : vector<2x1x256xf32>
    %450 = arith.addf %445, %449 : vector<2x1x256xf32>
    %451 = arith.addf %367, %450 : vector<2x1x256xf32>
    %452 = vector.extract_strided_slice %440 {offsets = [0, 0, 16], sizes = [2, 2, 256], strides = [1, 1, 1]} : vector<2x2x352xf32> to vector<2x2x256xf32>
    %c12 = arith.constant 12 : index
    %453 = memref.load %arg1[%c12] : memref<98xf32, #tpu.memory_space<smem>>
    %454 = vector.extract_strided_slice %452 {offsets = [0, 0, 0], sizes = [2, 1, 256], strides = [1, 1, 1]} : vector<2x2x256xf32> to vector<2x1x256xf32>
    %455 = vector.broadcast %453 : f32 to vector<2x1x256xf32>
    %456 = arith.mulf %455, %454 : vector<2x1x256xf32>
    %c61 = arith.constant 61 : index
    %457 = memref.load %arg1[%c61] : memref<98xf32, #tpu.memory_space<smem>>
    %458 = vector.extract_strided_slice %452 {offsets = [0, 1, 0], sizes = [2, 1, 256], strides = [1, 1, 1]} : vector<2x2x256xf32> to vector<2x1x256xf32>
    %459 = vector.broadcast %457 : f32 to vector<2x1x256xf32>
    %460 = arith.mulf %459, %458 : vector<2x1x256xf32>
    %461 = arith.addf %456, %460 : vector<2x1x256xf32>
    %462 = arith.addf %378, %461 : vector<2x1x256xf32>
    %463 = vector.extract_strided_slice %440 {offsets = [0, 0, 32], sizes = [2, 2, 256], strides = [1, 1, 1]} : vector<2x2x352xf32> to vector<2x2x256xf32>
    %c19 = arith.constant 19 : index
    %464 = memref.load %arg1[%c19] : memref<98xf32, #tpu.memory_space<smem>>
    %465 = vector.extract_strided_slice %463 {offsets = [0, 0, 0], sizes = [2, 1, 256], strides = [1, 1, 1]} : vector<2x2x256xf32> to vector<2x1x256xf32>
    %466 = vector.broadcast %464 : f32 to vector<2x1x256xf32>
    %467 = arith.mulf %466, %465 : vector<2x1x256xf32>
    %c68 = arith.constant 68 : index
    %468 = memref.load %arg1[%c68] : memref<98xf32, #tpu.memory_space<smem>>
    %469 = vector.extract_strided_slice %463 {offsets = [0, 1, 0], sizes = [2, 1, 256], strides = [1, 1, 1]} : vector<2x2x256xf32> to vector<2x1x256xf32>
    %470 = vector.broadcast %468 : f32 to vector<2x1x256xf32>
    %471 = arith.mulf %470, %469 : vector<2x1x256xf32>
    %472 = arith.addf %467, %471 : vector<2x1x256xf32>
    %473 = arith.addf %389, %472 : vector<2x1x256xf32>
    %474 = vector.extract_strided_slice %440 {offsets = [0, 0, 48], sizes = [2, 2, 256], strides = [1, 1, 1]} : vector<2x2x352xf32> to vector<2x2x256xf32>
    %c26 = arith.constant 26 : index
    %475 = memref.load %arg1[%c26] : memref<98xf32, #tpu.memory_space<smem>>
    %476 = vector.extract_strided_slice %474 {offsets = [0, 0, 0], sizes = [2, 1, 256], strides = [1, 1, 1]} : vector<2x2x256xf32> to vector<2x1x256xf32>
    %477 = vector.broadcast %475 : f32 to vector<2x1x256xf32>
    %478 = arith.mulf %477, %476 : vector<2x1x256xf32>
    %c75 = arith.constant 75 : index
    %479 = memref.load %arg1[%c75] : memref<98xf32, #tpu.memory_space<smem>>
    %480 = vector.extract_strided_slice %474 {offsets = [0, 1, 0], sizes = [2, 1, 256], strides = [1, 1, 1]} : vector<2x2x256xf32> to vector<2x1x256xf32>
    %481 = vector.broadcast %479 : f32 to vector<2x1x256xf32>
    %482 = arith.mulf %481, %480 : vector<2x1x256xf32>
    %483 = arith.addf %478, %482 : vector<2x1x256xf32>
    %484 = arith.addf %400, %483 : vector<2x1x256xf32>
    %485 = vector.extract_strided_slice %440 {offsets = [0, 0, 64], sizes = [2, 2, 256], strides = [1, 1, 1]} : vector<2x2x352xf32> to vector<2x2x256xf32>
    %c33 = arith.constant 33 : index
    %486 = memref.load %arg1[%c33] : memref<98xf32, #tpu.memory_space<smem>>
    %487 = vector.extract_strided_slice %485 {offsets = [0, 0, 0], sizes = [2, 1, 256], strides = [1, 1, 1]} : vector<2x2x256xf32> to vector<2x1x256xf32>
    %488 = vector.broadcast %486 : f32 to vector<2x1x256xf32>
    %489 = arith.mulf %488, %487 : vector<2x1x256xf32>
    %c82 = arith.constant 82 : index
    %490 = memref.load %arg1[%c82] : memref<98xf32, #tpu.memory_space<smem>>
    %491 = vector.extract_strided_slice %485 {offsets = [0, 1, 0], sizes = [2, 1, 256], strides = [1, 1, 1]} : vector<2x2x256xf32> to vector<2x1x256xf32>
    %492 = vector.broadcast %490 : f32 to vector<2x1x256xf32>
    %493 = arith.mulf %492, %491 : vector<2x1x256xf32>
    %494 = arith.addf %489, %493 : vector<2x1x256xf32>
    %495 = arith.addf %411, %494 : vector<2x1x256xf32>
    %496 = vector.extract_strided_slice %440 {offsets = [0, 0, 80], sizes = [2, 2, 256], strides = [1, 1, 1]} : vector<2x2x352xf32> to vector<2x2x256xf32>
    %c40 = arith.constant 40 : index
    %497 = memref.load %arg1[%c40] : memref<98xf32, #tpu.memory_space<smem>>
    %498 = vector.extract_strided_slice %496 {offsets = [0, 0, 0], sizes = [2, 1, 256], strides = [1, 1, 1]} : vector<2x2x256xf32> to vector<2x1x256xf32>
    %499 = vector.broadcast %497 : f32 to vector<2x1x256xf32>
    %500 = arith.mulf %499, %498 : vector<2x1x256xf32>
    %c89 = arith.constant 89 : index
    %501 = memref.load %arg1[%c89] : memref<98xf32, #tpu.memory_space<smem>>
    %502 = vector.extract_strided_slice %496 {offsets = [0, 1, 0], sizes = [2, 1, 256], strides = [1, 1, 1]} : vector<2x2x256xf32> to vector<2x1x256xf32>
    %503 = vector.broadcast %501 : f32 to vector<2x1x256xf32>
    %504 = arith.mulf %503, %502 : vector<2x1x256xf32>
    %505 = arith.addf %500, %504 : vector<2x1x256xf32>
    %506 = arith.addf %422, %505 : vector<2x1x256xf32>
    %507 = vector.extract_strided_slice %440 {offsets = [0, 0, 96], sizes = [2, 2, 256], strides = [1, 1, 1]} : vector<2x2x352xf32> to vector<2x2x256xf32>
    %c47 = arith.constant 47 : index
    %508 = memref.load %arg1[%c47] : memref<98xf32, #tpu.memory_space<smem>>
    %509 = vector.extract_strided_slice %507 {offsets = [0, 0, 0], sizes = [2, 1, 256], strides = [1, 1, 1]} : vector<2x2x256xf32> to vector<2x1x256xf32>
    %510 = vector.broadcast %508 : f32 to vector<2x1x256xf32>
    %511 = arith.mulf %510, %509 : vector<2x1x256xf32>
    %c96 = arith.constant 96 : index
    %512 = memref.load %arg1[%c96] : memref<98xf32, #tpu.memory_space<smem>>
    %513 = vector.extract_strided_slice %507 {offsets = [0, 1, 0], sizes = [2, 1, 256], strides = [1, 1, 1]} : vector<2x2x256xf32> to vector<2x1x256xf32>
    %514 = vector.broadcast %512 : f32 to vector<2x1x256xf32>
    %515 = arith.mulf %514, %513 : vector<2x1x256xf32>
    %516 = arith.addf %511, %515 : vector<2x1x256xf32>
    %517 = arith.addf %433, %516 : vector<2x1x256xf32>
    %518 = vector.extract_strided_slice %9 {offsets = [0, 0, 6], sizes = [2, 2, 352], strides = [1, 1, 1]} : vector<2x2x358xf32> to vector<2x2x352xf32>
    %c12_i32 = arith.constant 12 : i32
    %519 = vector.broadcast %c12_i32 : i32 to vector<1x1x352xi32>
    %520 = arith.cmpi sle, %26, %519 : vector<1x1x352xi32>
    %cst_15 = arith.constant 0.000000e+00 : f32
    %521 = vector.shape_cast %520 : vector<1x1x352xi1> to vector<1x1x352xi1>
    %522 = vector.broadcast %521 : vector<1x1x352xi1> to vector<2x2x352xi1>
    %523 = vector.broadcast %cst_15 : f32 to vector<2x2x352xf32>
    %524 = arith.select %522, %518, %523 : vector<2x2x352xi1>, vector<2x2x352xf32>
    %525 = vector.extract_strided_slice %524 {offsets = [0, 0, 0], sizes = [2, 2, 256], strides = [1, 1, 1]} : vector<2x2x352xf32> to vector<2x2x256xf32>
    %c6 = arith.constant 6 : index
    %526 = memref.load %arg1[%c6] : memref<98xf32, #tpu.memory_space<smem>>
    %527 = vector.extract_strided_slice %525 {offsets = [0, 0, 0], sizes = [2, 1, 256], strides = [1, 1, 1]} : vector<2x2x256xf32> to vector<2x1x256xf32>
    %528 = vector.broadcast %526 : f32 to vector<2x1x256xf32>
    %529 = arith.mulf %528, %527 : vector<2x1x256xf32>
    %c55 = arith.constant 55 : index
    %530 = memref.load %arg1[%c55] : memref<98xf32, #tpu.memory_space<smem>>
    %531 = vector.extract_strided_slice %525 {offsets = [0, 1, 0], sizes = [2, 1, 256], strides = [1, 1, 1]} : vector<2x2x256xf32> to vector<2x1x256xf32>
    %532 = vector.broadcast %530 : f32 to vector<2x1x256xf32>
    %533 = arith.mulf %532, %531 : vector<2x1x256xf32>
    %534 = arith.addf %529, %533 : vector<2x1x256xf32>
    %535 = arith.addf %451, %534 : vector<2x1x256xf32>
    %536 = vector.extract_strided_slice %524 {offsets = [0, 0, 16], sizes = [2, 2, 256], strides = [1, 1, 1]} : vector<2x2x352xf32> to vector<2x2x256xf32>
    %c13 = arith.constant 13 : index
    %537 = memref.load %arg1[%c13] : memref<98xf32, #tpu.memory_space<smem>>
    %538 = vector.extract_strided_slice %536 {offsets = [0, 0, 0], sizes = [2, 1, 256], strides = [1, 1, 1]} : vector<2x2x256xf32> to vector<2x1x256xf32>
    %539 = vector.broadcast %537 : f32 to vector<2x1x256xf32>
    %540 = arith.mulf %539, %538 : vector<2x1x256xf32>
    %c62 = arith.constant 62 : index
    %541 = memref.load %arg1[%c62] : memref<98xf32, #tpu.memory_space<smem>>
    %542 = vector.extract_strided_slice %536 {offsets = [0, 1, 0], sizes = [2, 1, 256], strides = [1, 1, 1]} : vector<2x2x256xf32> to vector<2x1x256xf32>
    %543 = vector.broadcast %541 : f32 to vector<2x1x256xf32>
    %544 = arith.mulf %543, %542 : vector<2x1x256xf32>
    %545 = arith.addf %540, %544 : vector<2x1x256xf32>
    %546 = arith.addf %462, %545 : vector<2x1x256xf32>
    %547 = vector.extract_strided_slice %524 {offsets = [0, 0, 32], sizes = [2, 2, 256], strides = [1, 1, 1]} : vector<2x2x352xf32> to vector<2x2x256xf32>
    %c20 = arith.constant 20 : index
    %548 = memref.load %arg1[%c20] : memref<98xf32, #tpu.memory_space<smem>>
    %549 = vector.extract_strided_slice %547 {offsets = [0, 0, 0], sizes = [2, 1, 256], strides = [1, 1, 1]} : vector<2x2x256xf32> to vector<2x1x256xf32>
    %550 = vector.broadcast %548 : f32 to vector<2x1x256xf32>
    %551 = arith.mulf %550, %549 : vector<2x1x256xf32>
    %c69 = arith.constant 69 : index
    %552 = memref.load %arg1[%c69] : memref<98xf32, #tpu.memory_space<smem>>
    %553 = vector.extract_strided_slice %547 {offsets = [0, 1, 0], sizes = [2, 1, 256], strides = [1, 1, 1]} : vector<2x2x256xf32> to vector<2x1x256xf32>
    %554 = vector.broadcast %552 : f32 to vector<2x1x256xf32>
    %555 = arith.mulf %554, %553 : vector<2x1x256xf32>
    %556 = arith.addf %551, %555 : vector<2x1x256xf32>
    %557 = arith.addf %473, %556 : vector<2x1x256xf32>
    %558 = vector.extract_strided_slice %524 {offsets = [0, 0, 48], sizes = [2, 2, 256], strides = [1, 1, 1]} : vector<2x2x352xf32> to vector<2x2x256xf32>
    %c27 = arith.constant 27 : index
    %559 = memref.load %arg1[%c27] : memref<98xf32, #tpu.memory_space<smem>>
    %560 = vector.extract_strided_slice %558 {offsets = [0, 0, 0], sizes = [2, 1, 256], strides = [1, 1, 1]} : vector<2x2x256xf32> to vector<2x1x256xf32>
    %561 = vector.broadcast %559 : f32 to vector<2x1x256xf32>
    %562 = arith.mulf %561, %560 : vector<2x1x256xf32>
    %c76 = arith.constant 76 : index
    %563 = memref.load %arg1[%c76] : memref<98xf32, #tpu.memory_space<smem>>
    %564 = vector.extract_strided_slice %558 {offsets = [0, 1, 0], sizes = [2, 1, 256], strides = [1, 1, 1]} : vector<2x2x256xf32> to vector<2x1x256xf32>
    %565 = vector.broadcast %563 : f32 to vector<2x1x256xf32>
    %566 = arith.mulf %565, %564 : vector<2x1x256xf32>
    %567 = arith.addf %562, %566 : vector<2x1x256xf32>
    %568 = arith.addf %484, %567 : vector<2x1x256xf32>
    %569 = vector.extract_strided_slice %524 {offsets = [0, 0, 64], sizes = [2, 2, 256], strides = [1, 1, 1]} : vector<2x2x352xf32> to vector<2x2x256xf32>
    %c34 = arith.constant 34 : index
    %570 = memref.load %arg1[%c34] : memref<98xf32, #tpu.memory_space<smem>>
    %571 = vector.extract_strided_slice %569 {offsets = [0, 0, 0], sizes = [2, 1, 256], strides = [1, 1, 1]} : vector<2x2x256xf32> to vector<2x1x256xf32>
    %572 = vector.broadcast %570 : f32 to vector<2x1x256xf32>
    %573 = arith.mulf %572, %571 : vector<2x1x256xf32>
    %c83 = arith.constant 83 : index
    %574 = memref.load %arg1[%c83] : memref<98xf32, #tpu.memory_space<smem>>
    %575 = vector.extract_strided_slice %569 {offsets = [0, 1, 0], sizes = [2, 1, 256], strides = [1, 1, 1]} : vector<2x2x256xf32> to vector<2x1x256xf32>
    %576 = vector.broadcast %574 : f32 to vector<2x1x256xf32>
    %577 = arith.mulf %576, %575 : vector<2x1x256xf32>
    %578 = arith.addf %573, %577 : vector<2x1x256xf32>
    %579 = arith.addf %495, %578 : vector<2x1x256xf32>
    %580 = vector.extract_strided_slice %524 {offsets = [0, 0, 80], sizes = [2, 2, 256], strides = [1, 1, 1]} : vector<2x2x352xf32> to vector<2x2x256xf32>
    %c41 = arith.constant 41 : index
    %581 = memref.load %arg1[%c41] : memref<98xf32, #tpu.memory_space<smem>>
    %582 = vector.extract_strided_slice %580 {offsets = [0, 0, 0], sizes = [2, 1, 256], strides = [1, 1, 1]} : vector<2x2x256xf32> to vector<2x1x256xf32>
    %583 = vector.broadcast %581 : f32 to vector<2x1x256xf32>
    %584 = arith.mulf %583, %582 : vector<2x1x256xf32>
    %c90 = arith.constant 90 : index
    %585 = memref.load %arg1[%c90] : memref<98xf32, #tpu.memory_space<smem>>
    %586 = vector.extract_strided_slice %580 {offsets = [0, 1, 0], sizes = [2, 1, 256], strides = [1, 1, 1]} : vector<2x2x256xf32> to vector<2x1x256xf32>
    %587 = vector.broadcast %585 : f32 to vector<2x1x256xf32>
    %588 = arith.mulf %587, %586 : vector<2x1x256xf32>
    %589 = arith.addf %584, %588 : vector<2x1x256xf32>
    %590 = arith.addf %506, %589 : vector<2x1x256xf32>
    %591 = vector.extract_strided_slice %524 {offsets = [0, 0, 96], sizes = [2, 2, 256], strides = [1, 1, 1]} : vector<2x2x352xf32> to vector<2x2x256xf32>
    %c48 = arith.constant 48 : index
    %592 = memref.load %arg1[%c48] : memref<98xf32, #tpu.memory_space<smem>>
    %593 = vector.extract_strided_slice %591 {offsets = [0, 0, 0], sizes = [2, 1, 256], strides = [1, 1, 1]} : vector<2x2x256xf32> to vector<2x1x256xf32>
    %594 = vector.broadcast %592 : f32 to vector<2x1x256xf32>
    %595 = arith.mulf %594, %593 : vector<2x1x256xf32>
    %c97 = arith.constant 97 : index
    %596 = memref.load %arg1[%c97] : memref<98xf32, #tpu.memory_space<smem>>
    %597 = vector.extract_strided_slice %591 {offsets = [0, 1, 0], sizes = [2, 1, 256], strides = [1, 1, 1]} : vector<2x2x256xf32> to vector<2x1x256xf32>
    %598 = vector.broadcast %596 : f32 to vector<2x1x256xf32>
    %599 = arith.mulf %598, %597 : vector<2x1x256xf32>
    %600 = arith.addf %595, %599 : vector<2x1x256xf32>
    %601 = arith.addf %517, %600 : vector<2x1x256xf32>
    %602 = arith.addf %535, %546 : vector<2x1x256xf32>
    %603 = arith.addf %557, %568 : vector<2x1x256xf32>
    %604 = arith.addf %602, %603 : vector<2x1x256xf32>
    %605 = arith.addf %579, %590 : vector<2x1x256xf32>
    %606 = arith.addf %604, %605 : vector<2x1x256xf32>
    %607 = arith.addf %606, %601 : vector<2x1x256xf32>
    %cst_16 = arith.constant 0.000000e+00 : f32
    %608 = vector.broadcast %cst_16 : f32 to vector<2x1x256xf32>
    %609 = arith.cmpf oge, %607, %608 : vector<2x1x256xf32>
    %cst_17 = arith.constant 1.000000e-01 : f32
    %610 = vector.broadcast %cst_17 : f32 to vector<2x1x256xf32>
    %611 = arith.mulf %610, %607 : vector<2x1x256xf32>
    %612 = arith.select %609, %607, %611 : vector<2x1x256xi1>, vector<2x1x256xf32>
    %613 = arith.negf %612 : vector<2x1x256xf32>
    %614 = math.exp %613 : vector<2x1x256xf32>
    %cst_18 = arith.constant 1.000000e+00 : f32
    %615 = vector.broadcast %cst_18 : f32 to vector<2x1x256xf32>
    %616 = arith.addf %615, %614 : vector<2x1x256xf32>
    %617 = arith.divf %615, %616 : vector<2x1x256xf32>
    %618 = vector.broadcast %617 : vector<2x1x256xf32> to vector<2x4x256xf32>
    %619 = arith.mulf %0, %618 : vector<2x4x256xf32>
    %c0_19 = arith.constant 0 : index
    %c0_20 = arith.constant 0 : index
    %c0_21 = arith.constant 0 : index
    %620 = vector.load %arg3[%c0_19, %c0_20, %c0_21] : memref<2x4x256xf32, #tpu.memory_space<vmem>>, vector<2x4x256xf32>
    tpu.vector_store %arg3[%c0_19, %c0_20, %c0_21], %619 {strides = array<i32>} : memref<2x4x256xf32, #tpu.memory_space<vmem>>, vector<2x4x256xf32>,
    return
  }
  func.func @transform_0(%arg0: i32, %arg1: memref<98xf32, #tpu.memory_space<smem>>) -> (i32, i32, i32) {
    %c0_i32 = arith.constant 0 : i32
    %c0_i32_0 = arith.constant 0 : i32
    %c0_i32_1 = arith.constant 0 : i32
    return %arg0, %c0_i32, %c0_i32_0 : i32, i32, i32
  }
  func.func @transform_1(%arg0: i32, %arg1: memref<98xf32, #tpu.memory_space<smem>>) -> (i32, i32, i32) {
    %c0_i32 = arith.constant 0 : i32
    %c0_i32_0 = arith.constant 0 : i32
    %c0_i32_1 = arith.constant 0 : i32
    return %arg0, %c0_i32, %c0_i32_0 : i32, i32, i32
  }
}

</mosaic_0001>

<bundles_post_ra>
// kernel: tpu_custom_call.1
= control target key start
LH: loop header
LB: loop body
LE: loop exit
PB: predicated region body
PF: predicated region fallthrough
CT: control target
= control target key end

     0   :  { %s3239_s12 = smov [#allocation3]   ;;  %s5800_s0 = inlined_call_operand.hbm [shape: f32[98], index: 0, kind: input, shape index: {}]   ;;  %s5801_s1 = inlined_call_operand.hbm [shape: f32[2,4,256], index: 1, kind: input, shape index: {}]   ;;  %s5802_s2 = inlined_call_operand.hbm [shape: f32[2,4,256], index: 2, kind: output, shape index: {}]  }
   0x1   :  { %s8_s11 = sshll.u32 %s5800_s0, 4  ;;  %s9_s11 = int_to_ptr.hbm [resolvable:$true] %s8_s11 }
   0x2   :  { %11 = dma.hbm_to_smem %s9_s11, 16, %s3239_s12, [#allocation2] }
   0x3   :  { %3233 = dma.done.wait [#allocation2], 16 }
   0x4   :  { %3234 = vsyncadd [#allocation2], 4294967280 }
   0x5   :  { %14 = sfence }
   0x6   :  { %15 = vsyncpa [#allocation5], 0 }
   0x7   :  { %16 = vsyncpa [#allocation6], 0  ;;  %s21_s15 = sshll.u32 %s5801_s1, 4  ;;  %s3240_s16 = smov [#allocation4]   ;;  %s22_s15 = int_to_ptr.hbm [resolvable:$true] %s21_s15 }
   0x8   :  { %s23_s17 = sshll.u32 %s3240_s16, 4  ;;  %s3241_s18 = smov 128   ;;  %s24_s17 = int_to_ptr.vmem [resolvable:$true] %s23_s17 }
   0x9   :  { %s3242_s19 = smov 8  }
   0xa   :  { %29 = dma.hbm_to_vmem [thread:$0]  %s22_s15, 256, %s24_s17, [#allocation5], %s3241_s18, %s3241_s18, %s3242_s19  }
   0xb   :  { %3235 = dma.done.wait [#allocation5], 256  }
   0xc   :  { %3236 = vsyncadd [#allocation5], 4294967040  ;;  %v3279_v0 = vld [vmem:[#allocation4 + $0x8] sm:$0xff]  ;;  %v3281_v1 = vld [vmem:[#allocation4] sm:$0xff]  ;;  %vm49_vm0 = vcmask 1043456   ;;  %vm121_vm1 = vcmask 1040384  }
   0xd   :  { %5955 = vst [vmem:[#allocation11_spill] sm:$0xff] %v3279_v0  ;;  %s3243_s0 = smov 51   ;;  %vm138_vm2 = vcmask 416768   ;;  %s3244_s1 = smov 127   ;;  %vm499_vm5 = vcmask 1039360   ;;  %vm845_vm6 = vcmask 1031168  }
   0xe   :  { %5956 = vst [vmem:[#allocation12_spill] sm:$0xff] %v3281_v1  ;;  %s3245_s20 = smov 126   ;;  %s3246_s21 = smov 124   ;;  %vm1706_vm7 = vcmask 1014784   ;;  %vm2052_vm9 = vcmask 1006592   ;;  %vm1228_vm13 = vcmask 1022976  }
   0xf   :  { %42 = vst [vmem:[#allocation1 + $0x10] ss:$2 sm:$0xff] %v3279_v0  ;;  %s3082_s22 = sld [smem:[#allocation3 + $0x34]]  ;;  %s3247_s24 = smov 123  }
  0x10   :  { %38 = vst [vmem:[#allocation1] ss:$2 sm:$0xff] %v3281_v1  ;;  %s3081_s23 = sld [smem:[#allocation3 + $0x3]]  ;;  %s3248_s29 = smov 125  }
  0x11   :  { %s3043_s25 = sld [smem:[#allocation3 + $0xe]] }
  0x12   :  { %s3044_s26 = sld [smem:[#allocation3 + $0x3f]] }
  0x13   :  { %s3084_s27 = sld [smem:[#allocation3 + $0x3b]] }
  0x14   :  { %s3083_s28 = sld [smem:[#allocation3 + $0xa]] }
  0x15   :  { %s3086_s30 = sld [smem:[#allocation3 + $0x42]] }
  0x16   :  { %v43_v2 = vld.sshfl [vmem:[#allocation1 + $0x10] sm:$0xff pattern:$0x75316420]  ;;  %v44_v3 = vld.sshfl [vmem:[#allocation1 + $0x18] sm:$0xff pattern:$0x75316420] }
  0x17   :  { %v64_v4 = vsel %vm49_vm0, %v43_v2, -inf  ;;  %82 = vst [vmem:[#allocation1 + $0x10] ss:$2 sm:$0xff] %v3279_v0  ;;  %v39_v5 = vld.sshfl [vmem:[#allocation1] sm:$0xff pattern:$0x75316420] }
  0x18   :  { %v65_v6 = vrot.slane %v64_v4, 4  ;;  %v40_v7 = vld.sshfl [vmem:[#allocation1 + $0x8] sm:$0xff pattern:$0x75316420]  ;;  %v50_v8 = vsel %vm49_vm0, %v39_v5, -inf  ;;  %v71_v9 = vsel %vm49_vm0, %v44_v3, -inf }
  0x19   :  { %v51_v10 = vrot.slane %v50_v8, 4  ;;  %78 = vst [vmem:[#allocation1] ss:$2 sm:$0xff] %v3281_v1  ;;  %v57_v12 = vsel %vm49_vm0, %v40_v7, -inf  ;;  %v72_v14 = vrot.slane %v71_v9, 4  ;;  %s3047_s3 = sld [smem:[#allocation3 + $0x1c]] }
  0x1a   :  { %v66_v11 = vmax.f32 %v64_v4, %v65_v6  ;;  %v58_v16 = vrot.slane %v57_v12, 4  ;;  %s3048_s4 = sld [smem:[#allocation3 + $0x4d]] }
  0x1b   :  { %v52_v13 = vmax.f32 %v50_v8, %v51_v10  ;;  %v73_v21 = vmax.f32 %v71_v9, %v72_v14  ;;  %s3085_s5 = sld [smem:[#allocation3 + $0x11]] }
  0x1c   :  { %v67_v15 = vrot.slane %v66_v11, 2  ;;  %v59_v28 = vmax.f32 %v57_v12, %v58_v16  ;;  %s3088_s6 = sld [smem:[#allocation3 + $0x49]] }
  0x1d   :  { %v53_v20 = vrot.slane %v52_v13, 2  ;;  %v74_v34 = vrot.slane %v73_v21, 2  ;;  %s3087_s7 = sld [smem:[#allocation3 + $0x18]] }
  0x1e   :  { %v83_v17 = vld.sshfl [vmem:[#allocation1 + $0x10] sm:$0xff pattern:$0x75316420]  ;;  %v84_v18 = vld.sshfl [vmem:[#allocation1 + $0x18] sm:$0xff pattern:$0x75316420]  ;;  %v68_v26 = vmax.f32 %v66_v11, %v67_v15 }
  0x1f   :  { %v103_v19 = vsel %vm49_vm0, %v83_v17, 0.0  ;;  %v110_v22 = vsel %vm49_vm0, %v84_v18, 0.0  ;;  %v54_v33 = vmax.f32 %v52_v13, %v53_v20  ;;  %v60_v41 = vrot.slane %v59_v28, 2  ;;  %s3090_s8 = sld [smem:[#allocation3 + $0x50]] }
  0x20   :  { %v104_v23 = vrot.slane %v103_v19, 4  ;;  %v79_v24 = vld.sshfl [vmem:[#allocation1] sm:$0xff pattern:$0x75316420]  ;;  %v111_v25 = vrot.slane %v110_v22, 4  ;;  %v69_v40 = vrot.slane %v68_v26, 1  ;;  %v75_v47 = vmax.f32 %v73_v21, %v74_v34 }
  0x21   :  { %v89_v27 = vsel %vm49_vm0, %v79_v24, 0.0  ;;  %v80_v32 = vld.sshfl [vmem:[#allocation1 + $0x8] sm:$0xff pattern:$0x75316420]  ;;  %v55_v46 = vrot.slane %v54_v33, 1  ;;  %v61_v55 = vmax.f32 %v59_v28, %v60_v41  ;;  %v3337_v24 = vstv %s3082_s22  ;;  %s3089_s9 = sld [smem:[#allocation3 + $0x1f]] }
  0x22   :  { %v105_v29 = vadd.f32 %v104_v23, %v103_v19  ;;  %v90_v30 = vrot.slane %v89_v27, 4  ;;  %v112_v31 = vadd.f32 %v111_v25, %v110_v22  ;;  %v96_v35 = vsel %vm49_vm0, %v80_v32, 0.0  ;;  %s3092_s10 = sld [smem:[#allocation3 + $0x57]] }
  0x23   :  { %v97_v39 = vrot.slane %v96_v35, 4  ;;  %v70_v52 = vmax.f32 %v68_v26, %v69_v40  ;;  %v56_v57 = vmax.f32 %v54_v33, %v55_v46  ;;  %v76_v58 = vrot.slane %v75_v47, 1  ;;  %s3091_s11 = sld [smem:[#allocation3 + $0x26]] }
  0x24   :  { %v106_v36 = vrot.slane %v105_v29, 2  ;;  %v91_v37 = vadd.f32 %v90_v30, %v89_v27  ;;  %v113_v38 = vrot.slane %v112_v31, 2  ;;  %v62_v3 = vrot.slane %v61_v55, 1  ;;  %s3614_s12 = sld [smem:[#allocation3 + $0x5e]] }
  0x25   :  { %v98_v45 = vadd.f32 %v97_v39, %v96_v35  ;;  %v77_v6 = vmax.f32 %v75_v47, %v76_v58  ;;  %v151_v22 = vlaneseq  ;;  %v3345_v28 = vstv %s3081_s23  ;;  %s3623_s13 = sld [smem:[#allocation3 + $0x2d]] }
  0x26   :  { %v107_v42 = vadd.f32 %v106_v36, %v105_v29  ;;  %v92_v43 = vrot.slane %v91_v37, 2  ;;  %v114_v44 = vadd.f32 %v113_v38, %v112_v31  ;;  %v63_v8 = vmax.f32 %v61_v55, %v62_v3  ;;  %s3631_s14 = sld [smem:[#allocation3 + $0x38]] }
  0x27   :  { %v99_v51 = vrot.slane %v98_v45, 2  ;;  %v3333_v23 = vand.u32 127, %v151_v22  ;;  %v3367_v36 = vstv %s3043_s25  ;;  %v3405_v58 = vstv %s3083_s28  ;;  %s3651_s15 = sld [smem:[#allocation3 + $0x7]] }
  0x28   :  { %v108_v48 = vrot.slane %v107_v42, 1  ;;  %v93_v49 = vadd.f32 %v92_v43, %v91_v37  ;;  %v115_v50 = vrot.slane %v114_v44, 1  ;;  %5961 = vst [vmem:[#allocation17_spill] sm:$0xff] %v3367_v36  ;;  %v3369_v37 = vstv %s3044_s26  ;;  %s3687_s16 = sld [smem:[#allocation3 + $0x46]] }
  0x29   :  { %v100_v56 = vadd.f32 %v99_v51, %v98_v45  ;;  %v153_v25 = vadd.s32 128, %v3333_v23  ;;  %v3343_v27 = vand.u32 15, %v3333_v23  ;;  %5962 = vst [vmem:[#allocation18_spill] sm:$0xff] %v3369_v37  ;;  %v3387_v45 = vstv %s3084_s27  ;;  %s3710_s17 = sld [smem:[#allocation3 + $0x15]] }
  0x2a   :  { %v109_v53 = vadd.f32 %v108_v48, %v107_v42  ;;  %v94_v54 = vrot.slane %v93_v49, 1  ;;  %v116_v61 = vadd.f32 %v115_v50, %v114_v44  ;;  %v3436_v22 = vstv %s3047_s3  ;;  %s3772_s22 = sld [smem:[#allocation3 + $0x8]] }
  0x2b   :  { %v101_v62 = vrot.slane %v100_v56, 1  ;;  %5957 = vst [vmem:[#allocation13_spill] sm:$0xff] %v3343_v27  ;;  %v3347_v29 = vand.u32 15, %v153_v25  ;;  %vm191_vm3 = vcmp.ge.s32.totalorder %v3343_v27, 3  ;;  %v3438_v25 = vstv %s3048_s4  ;;  %s3788_s23 = sld [smem:[#allocation3 + $0x23]] }
  0x2c   :  { %v119_v59 = vmul.f32 0.25, %v109_v53  ;;  %v95_v60 = vadd.f32 %v94_v54, %v93_v49  ;;  %v120_v7 = vmul.f32 0.25, %v116_v61  ;;  %5966 = vst [vmem:[#allocation22_spill] sm:$0xff] %v3436_v22  ;;  %vm474_vm10 = vcmp.ge.s32.totalorder %v3343_v27, 2  ;;  %s3798_s25 = sld [smem:[#allocation3 + $0xf]] }
  0x2d   :  { %v102_v4 = vadd.f32 %v101_v62, %v100_v56  ;;  %5958 = vst [vmem:[#allocation14_spill] sm:$0xff] %v3347_v29  ;;  %vm192_vm4 = vcmp.ge.s32.totalorder %v3347_v29, 3  ;;  %s3803_s26 = sld [smem:[#allocation3 + $0x3a]]  ;;  %vm824_vm11 = vcmp.ge.s32.totalorder %v3343_v27, 1  ;;  %vm475_vm12 = vcmp.ge.s32.totalorder %v3347_v29, 2 }
  0x2e   :  { %v124_v63 = vsel %vm121_vm1, %v70_v52, %v119_v59  ;;  %v117_v2 = vmul.f32 0.25, %v95_v60  ;;  %v125_v10 = vsel %vm121_vm1, %v77_v6, %v120_v7  ;;  %5967 = vst [vmem:[#allocation23_spill] sm:$0xff] %v3438_v25  ;;  %s3882_s27 = sld [smem:[#allocation3 + $0x41]] }
  0x2f   :  { %134 = vrot.lane.b32.xlu1 %v124_v63, %s3243_s0  ;;  %v118_v9 = vmul.f32 0.25, %v102_v4  ;;  %s3884_s28 = sld [smem:[#allocation3 + $0x10]] }
  0x30   :  { %v122_v5 = vsel %vm121_vm1, %v56_v57, %v117_v2  ;;  %s3920_s3 = sld [smem:[#allocation3 + $0x12]] }
  0x31   :  { %130 = vrot.lane.b32.xlu0 %v122_v5, %s3243_s0  ;;  %v123_v11 = vsel %vm121_vm1, %v63_v8, %v118_v9  ;;  %vm825_vm1 = vcmp.ge.s32.totalorder %v3347_v29, 1  ;;  %s3922_s4 = sld [smem:[#allocation3 + $0xb]] }
  0x37   :  { %136 = vrot.lane.b32.xlu1 %v125_v10, %s3243_s0 }
  0x39   :  { %132 = vrot.lane.b32.xlu0 %v123_v11, %s3243_s0  ;;  %s3738_s0 = sld [smem:[#allocation3 + $0x39]] }
  0xa1   :  { %v135_v12 = vpop.permute.xlu1 %134 }
  0xa2   :  { %v3300_v13 = vsel %vm138_vm2, 0.0, %v135_v12 }
  0xa3   :  { %v131_v14 = vpop.permute.xlu0 %130  ;;  %493 = vrot.lane.b32.xlu1 %v3300_v13, %s3244_s1  ;;  %v1183_v34 = vmul.f32 %v3337_v24, %v3300_v13  ;;  %v3375_v39 = vsel %vm191_vm3, %v3300_v13, 0.0  ;;  %v1175_v51 = vmul.f32 %v3345_v28, %v3300_v13  ;;  %v1254_v8 = vmul.f32 %v3387_v45, %v3300_v13 }
  0xa4   :  { %v3304_v15 = vsel %vm138_vm2, 0.0, %v131_v14  ;;  %5963 = vst [vmem:[#allocation19_spill] sm:$0xff] %v3375_v39  ;;  %v287_v48 = vmul.f32 %v3369_v37, %v3375_v39  ;;  %v279_v54 = vmul.f32 %v3367_v36, %v3375_v39 }
  0xa5   :  { %487 = vrot.lane.b32.xlu2 %v3304_v15, %s3244_s1  ;;  %v1180_v26 = vmul.f32 %v3337_v24, %v3304_v15  ;;  %v1172_v30 = vmul.f32 %v3345_v28, %v3304_v15  ;;  %v3358_v32 = vsel %vm191_vm3, %v3304_v15, 0.0  ;;  %v1195_v43 = vrot.slane %v1183_v34, 1 }
  0xa6   :  { %5959 = vst [vmem:[#allocation15_spill] sm:$0xff] %v3358_v32  ;;  %v276_v40 = vmul.f32 %v3367_v36, %v3358_v32  ;;  %v284_v41 = vmul.f32 %v3369_v37, %v3358_v32  ;;  %v299_v55 = vrot.slane %v287_v48, 1  ;;  %v1251_v57 = vmul.f32 %v3387_v45, %v3304_v15 }
  0xa7   :  { %v1192_v31 = vrot.slane %v1180_v26, 1  ;;  %v1207_v56 = vadd.f32 %v1195_v43, %v1175_v51  ;;  %v1243_v63 = vmul.f32 %v3405_v58, %v3304_v15  ;;  %v3452_v43 = vstv %s3085_s5  ;;  %s3940_s5 = sld [smem:[#allocation3 + $0x3c]] }
  0xa8   :  { %v296_v44 = vrot.slane %v284_v41, 1  ;;  %v3407_v59 = vadd.f32 %v299_v55, %v279_v54  ;;  %v1263_v2 = vrot.slane %v1251_v57, 1  ;;  %vm1686_vm3 = vcmp.le.s32.totalorder %v3347_v29, 14 }
  0xa9   :  { %v137_v19 = vpop.permute.xlu1 %136  ;;  %v1204_v33 = vadd.f32 %v1192_v31, %v1172_v30 }
  0xaa   :  { %v3317_v20 = vsel %vm138_vm2, %v137_v19, 0.0  ;;  %v3321_v21 = vsel %vm138_vm2, %v135_v12, %v137_v19  ;;  %v3397_v52 = vadd.f32 %v296_v44, %v276_v40  ;;  %5965 = vst [vmem:[#allocation21_spill] sm:$0xff] %v3407_v59  ;;  %v1275_v6 = vadd.f32 %v1263_v2, %v1243_v63 }
  0xab   :  { %v133_v16 = vpop.permute.xlu0 %132  ;;  %833 = vrot.lane.b32.xlu1 %v3304_v15, %s3245_s20  ;;  %v1185_v61 = vmul.f32 %v3337_v24, %v3317_v20  ;;  %v1177_v3 = vmul.f32 %v3345_v28, %v3317_v20  ;;  %v1184_v12 = vmul.f32 %v3337_v24, %v3321_v21  ;;  %v3434_v19 = vstv %s3086_s30  ;;  %s3899_s30 = sld [smem:[#allocation3 + $0x43]] }
  0xac   :  { %v3309_v17 = vsel %vm138_vm2, %v131_v14, %v133_v16  ;;  %v3312_v18 = vsel %vm138_vm2, %v133_v16, 0.0  ;;  %v1266_v14 = vrot.slane %v1254_v8, 1  ;;  %v1246_v16 = vmul.f32 %v3405_v58, %v3300_v13 }
  0xad   :  { %491 = vrot.lane.b32.xlu0 %v3312_v18, %s3244_s1  ;;  %489 = vrot.lane.b32.xlu2 %v3309_v17, %s3244_s1  ;;  %v3365_v35 = vsel %vm192_vm4, %v3309_v17, 0.0  ;;  %v1182_v38 = vmul.f32 %v3337_v24, %v3312_v18  ;;  %v1174_v49 = vmul.f32 %v3345_v28, %v3312_v18  ;;  %v1181_v62 = vmul.f32 %v3337_v24, %v3309_v17 }
  0xae   :  { %5960 = vst [vmem:[#allocation16_spill] sm:$0xff] %v3365_v35  ;;  %v285_v42 = vmul.f32 %v3369_v37, %v3365_v35  ;;  %v277_v46 = vmul.f32 %v3367_v36, %v3365_v35  ;;  %v1197_v4 = vrot.slane %v1185_v61, 1  ;;  %v1173_v7 = vmul.f32 %v3345_v28, %v3309_v17 }
  0xaf   :  { %v1194_v50 = vrot.slane %v1182_v38, 1  ;;  %v1193_v5 = vrot.slane %v1181_v62, 1  ;;  %v1253_v11 = vmul.f32 %v3387_v45, %v3312_v18  ;;  %v1245_v26 = vmul.f32 %v3405_v58, %v3312_v18 }
  0xb0   :  { %v297_v47 = vrot.slane %v285_v42, 1  ;;  %v1209_v9 = vadd.f32 %v1197_v4, %v1177_v3  ;;  %v1196_v31 = vrot.slane %v1184_v12, 1  ;;  %v364_v24 = vmul.f32 %v3438_v25, %v3358_v32 }
  0xb1   :  { %v1206_v60 = vadd.f32 %v1194_v50, %v1174_v49  ;;  %v1205_v10 = vadd.f32 %v1193_v5, %v1173_v7  ;;  %v1265_v30 = vrot.slane %v1253_v11, 1  ;;  %v1278_v34 = vadd.f32 %v1266_v14, %v1246_v16 }
  0xb2   :  { %v3399_v53 = vadd.f32 %v297_v47, %v277_v46  ;;  %v1176_v38 = vmul.f32 %v3345_v28, %v3321_v21  ;;  %v1325_v40 = vmul.f32 %v3434_v19, %v3304_v15  ;;  %v376_v41 = vrot.slane %v364_v24, 1 }
  0xb3   :  { %839 = vrot.lane.b32.xlu1 %v3300_v13, %s3245_s20  ;;  %v1256_v42 = vmul.f32 %v3387_v45, %v3317_v20  ;;  %v1277_v44 = vadd.f32 %v1265_v30, %v1245_v26  ;;  %v1252_v47 = vmul.f32 %v3387_v45, %v3309_v17  ;;  %v1317_v28 = vmul.f32 %v3452_v43, %v3304_v15 }
  0xb4   :  { %5964 = vst [vmem:[#allocation20_spill] sm:$0xff] %v3399_v53  ;;  %v1208_v46 = vadd.f32 %v1196_v31, %v1176_v38  ;;  %v1337_v49 = vrot.slane %v1325_v40, 1  ;;  %v1248_v50 = vmul.f32 %v3405_v58, %v3317_v20  ;;  %v1328_v57 = vmul.f32 %v3434_v19, %v3300_v13 }
  0xb5   :  { %497 = vrot.lane.b32.xlu0 %v3317_v20, %s3244_s1  ;;  %495 = vrot.lane.b32.xlu2 %v3321_v21, %s3244_s1  ;;  %v1268_v51 = vrot.slane %v1256_v42, 1  ;;  %v1264_v54 = vrot.slane %v1252_v47, 1  ;;  %v1327_v62 = vmul.f32 %v3434_v19, %v3312_v18  ;;  %v1255_v63 = vmul.f32 %v3387_v45, %v3321_v21  ;;  %s3249_s1 = smov 122  }
  0xb6   :  { %v1349_v55 = vadd.f32 %v1337_v49, %v1317_v28  ;;  %v1340_v2 = vrot.slane %v1328_v57, 1  ;;  %v3476_v3 = vstv %s3088_s6  ;;  %v1319_v5 = vmul.f32 %v3452_v43, %v3312_v18  ;;  %s4107_s6 = sld [smem:[#allocation3 + $0x3d]] }
  0xb7   :  { %v1320_v7 = vmul.f32 %v3452_v43, %v3300_v13  ;;  %v1267_v8 = vrot.slane %v1255_v63, 1  ;;  %v1247_v45 = vmul.f32 %v3405_v58, %v3321_v21  ;;  %v3486_v11 = vstv %s3087_s7  ;;  %s4136_s7 = sld [smem:[#allocation3 + $0xc]] }
  0xb8   :  { %v1330_v16 = vmul.f32 %v3434_v19, %v3317_v20  ;;  %v1326_v26 = vmul.f32 %v3434_v19, %v3309_v17  ;;  %v1322_v24 = vmul.f32 %v3452_v43, %v3317_v20  ;;  %v1402_v42 = vmul.f32 %v3476_v3, %v3300_v13 }
  0xb9   :  { %v1279_v14 = vadd.f32 %v1267_v8, %v1247_v45  ;;  %v1401_v47 = vmul.f32 %v3476_v3, %v3312_v18  ;;  %v1329_v28 = vmul.f32 %v3434_v19, %v3321_v21  ;;  %v1394_v57 = vmul.f32 %v3486_v11, %v3300_v13 }
  0xba   :  { %v1414_v49 = vrot.slane %v1402_v42, 1  ;;  %v1321_v63 = vmul.f32 %v3452_v43, %v3321_v21  ;;  %v357_v42 = vmul.f32 %v3436_v22, %v3365_v35 }
  0xbb   :  { %1696 = vrot.lane.b32.xlu1 %v3309_v17, %s3246_s21  ;;  %v1341_v19 = vrot.slane %v1329_v28, 1 }
  0xbd   :  { %837 = vrot.lane.b32.xlu0 %v3312_v18, %s3245_s20  ;;  %835 = vrot.lane.b32.xlu2 %v3309_v17, %s3245_s20  ;;  %v1353_v8 = vadd.f32 %v1341_v19, %v1321_v63 }
  0xc3   :  { %1704 = vrot.lane.b32.xlu1 %v3317_v20, %s3246_s21 }
  0xc5   :  { %843 = vrot.lane.b32.xlu0 %v3317_v20, %s3245_s20  ;;  %841 = vrot.lane.b32.xlu2 %v3321_v21, %s3245_s20  ;;  %s3753_s20 = sld [smem:[#allocation3 + $0x54]] }
  0xcb   :  { %2042 = vrot.lane.b32.xlu1 %v3309_v17, %s3247_s24 }
  0xcd   :  { %1702 = vrot.lane.b32.xlu0 %v3321_v21, %s3246_s21  ;;  %1698 = vrot.lane.b32.xlu2 %v3312_v18, %s3246_s21 }
  0xd3   :  { %2050 = vrot.lane.b32.xlu1 %v3317_v20, %s3247_s24 }
  0xd5   :  { %1700 = vrot.lane.b32.xlu0 %v3300_v13, %s3246_s21  ;;  %1694 = vrot.lane.b32.xlu2 %v3304_v15, %s3246_s21  ;;  %s3759_s21 = sld [smem:[#allocation3 + $0x40]] }
  0xdb   :  { %1216 = vrot.lane.b32.xlu1 %v1204_v33, %s3248_s29  ;;  %v356_v33 = vmul.f32 %v3436_v22, %v3358_v32 }
  0xdd   :  { %2048 = vrot.lane.b32.xlu0 %v3321_v21, %s3247_s24  ;;  %2044 = vrot.lane.b32.xlu2 %v3312_v18, %s3247_s24  ;;  %v3457_v48 = vadd.f32 %v376_v41, %v356_v33  ;;  %v1342_v33 = vrot.slane %v1330_v16, 1  ;;  %v1318_v41 = vmul.f32 %v3452_v43, %v3309_v17  ;;  %v1396_v16 = vmul.f32 %v3486_v11, %v3317_v20 }
  0xdf   :  { %5968 = vst [vmem:[#allocation24_spill] sm:$0xff] %v3457_v48 }
  0xe3   :  { %1222 = vrot.lane.b32.xlu1 %v1207_v56, %s3248_s29  ;;  %v1244_v56 = vmul.f32 %v3405_v58, %v3309_v17  ;;  %v1391_v58 = vmul.f32 %v3486_v11, %v3304_v15 }
  0xe5   :  { %1220 = vrot.lane.b32.xlu0 %v1206_v60, %s3248_s29  ;;  %2040 = vrot.lane.b32.xlu2 %v3304_v15, %s3247_s24  ;;  %v1280_v60 = vadd.f32 %v1268_v51, %v1248_v50  ;;  %v1276_v61 = vadd.f32 %v1264_v54, %v1244_v56  ;;  %v3516_v50 = vstv %s3090_s8  ;;  %v367_v51 = vmul.f32 %v3438_v25, %v3375_v39  ;;  %s4270_s8 = sld [smem:[#allocation3 + $0x48]] }
  0xe6   :  { %v1413_v56 = vrot.slane %v1401_v47, 1  ;;  %v1475_v47 = vmul.f32 %v3516_v50, %v3312_v18 }
  0xeb   :  { %1287 = vrot.lane.b32.xlu1 %v1275_v6, %s3248_s29  ;;  %v1339_v6 = vrot.slane %v1327_v62, 1  ;;  %v1426_v62 = vadd.f32 %v1414_v49, %v1394_v57 }
  0xed   :  { %1226 = vrot.lane.b32.xlu0 %v1209_v9, %s3248_s29  ;;  %1218 = vrot.lane.b32.xlu2 %v1205_v10, %s3248_s29  ;;  %v1352_v9 = vadd.f32 %v1340_v2, %v1320_v7  ;;  %v1399_v10 = vmul.f32 %v3476_v3, %v3304_v15  ;;  %v1351_v12 = vadd.f32 %v1339_v6, %v1319_v5  ;;  %v3534_v5 = vstv %s3089_s9  ;;  %s4283_s9 = sld [smem:[#allocation3 + $0x16]] }
  0xee   :  { %v1473_v2 = vmul.f32 %v3516_v50, %v3304_v15  ;;  %v1465_v45 = vmul.f32 %v3534_v5, %v3304_v15 }
  0xef   :  { %v1411_v30 = vrot.slane %v1399_v10, 1 }
  0xf0   :  { %v1485_v10 = vrot.slane %v1473_v2, 1 }
  0xf1   :  { %v1423_v40 = vadd.f32 %v1411_v30, %v1391_v58 }
  0xf3   :  { %1293 = vrot.lane.b32.xlu1 %v1278_v34, %s3248_s29  ;;  %v1338_v34 = vrot.slane %v1326_v26, 1 }
  0xf5   :  { %1291 = vrot.lane.b32.xlu0 %v1277_v44, %s3248_s29  ;;  %1224 = vrot.lane.b32.xlu2 %v1208_v46, %s3248_s29  ;;  %v1354_v44 = vadd.f32 %v1342_v33, %v1322_v24  ;;  %v1350_v46 = vadd.f32 %v1338_v34, %v1318_v41  ;;  %v365_v24 = vmul.f32 %v3438_v25, %v3365_v35 }
  0xf6   :  { %v1392_v33 = vmul.f32 %v3486_v11, %v3309_v17  ;;  %v1476_v41 = vmul.f32 %v3516_v50, %v3300_v13 }
  0xfb   :  { %1361 = vrot.lane.b32.xlu1 %v1349_v55, %s3248_s29  ;;  %v1393_v55 = vmul.f32 %v3486_v11, %v3312_v18 }
  0xfd   :  { %1297 = vrot.lane.b32.xlu0 %v1280_v60, %s3248_s29  ;;  %1289 = vrot.lane.b32.xlu2 %v1276_v61, %s3248_s29  ;;  %v359_v60 = vmul.f32 %v3436_v22, %v3375_v39  ;;  %v379_v61 = vrot.slane %v367_v51, 1  ;;  %v1425_v7 = vadd.f32 %v1413_v56, %v1393_v55  ;;  %v1403_v55 = vmul.f32 %v3476_v3, %v3321_v21 }
  0xff   :  { %v488_v4 = vpop.permute.xlu2 %487  ;;  %v3536_v6 = vadd.f32 %v379_v61, %v359_v60  ;;  %v1488_v60 = vrot.slane %v1476_v41, 1  ;;  %v154_v41 = vadd.s32 256, %v3333_v23 }
 0x101   :  { %5969 = vst [vmem:[#allocation25_spill] sm:$0xff] %v3536_v6 }
 0x103   :  { %1367 = vrot.lane.b32.xlu1 %v1352_v9, %s3248_s29  ;;  %v1400_v9 = vmul.f32 %v3476_v3, %v3309_v17 }
 0x105   :  { %1365 = vrot.lane.b32.xlu0 %v1351_v12, %s3248_s29  ;;  %1295 = vrot.lane.b32.xlu2 %v1279_v14, %s3248_s29  ;;  %v3548_v12 = vsel %vm192_vm4, %v3321_v21, 0.0  ;;  %v1412_v30 = vrot.slane %v1400_v9, 1  ;;  %vm1685_vm4 = vcmp.le.s32.totalorder %v3343_v27, 14 }
 0x106   :  { %5970 = vst [vmem:[#allocation26_spill] sm:$0xff] %v3548_v12  ;;  %v368_v34 = vmul.f32 %v3438_v25, %v3548_v12  ;;  %v360_v28 = vmul.f32 %v3436_v22, %v3548_v12 }
 0x107   :  { %v3497_v31 = vpop.permute.xlu2 %489  ;;  %v1424_v51 = vadd.f32 %v1412_v30, %v1392_v33  ;;  %v1474_v33 = vmul.f32 %v3516_v50, %v3309_v17 }
 0x108   :  { %v3503_v38 = vsel %vm499_vm5, %v488_v4, %v3497_v31  ;;  %v1404_v4 = vmul.f32 %v3476_v3, %v3317_v20  ;;  %v380_v49 = vrot.slane %v368_v34, 1  ;;  %v1467_v3 = vmul.f32 %v3534_v5, %v3312_v18 }
 0x10a   :  { %v1416_v26 = vrot.slane %v1404_v4, 1  ;;  %v3577_v57 = vadd.f32 %v380_v49, %v360_v28  ;;  %v1487_v4 = vrot.slane %v1475_v47, 1  ;;  %v1486_v49 = vrot.slane %v1474_v33, 1 }
 0x10b   :  { %1435 = vrot.lane.b32.xlu1 %v1423_v40, %s3248_s29  ;;  %v1497_v40 = vadd.f32 %v1485_v10, %v1465_v45  ;;  %v1395_v45 = vmul.f32 %v3486_v11, %v3321_v21 }
 0x10c   :  { %5972 = vst [vmem:[#allocation28_spill] sm:$0xff] %v3577_v57  ;;  %v1499_v30 = vadd.f32 %v1487_v4, %v1467_v3 }
 0x10d   :  { %1371 = vrot.lane.b32.xlu0 %v1354_v44, %s3248_s29  ;;  %1363 = vrot.lane.b32.xlu2 %v1350_v46, %s3248_s29  ;;  %v377_v44 = vrot.slane %v365_v24, 1  ;;  %v1428_v46 = vadd.f32 %v1416_v26, %v1396_v16  ;;  %v1478_v16 = vmul.f32 %v3516_v50, %v3317_v20  ;;  %v1538_v26 = vstv %s3091_s11  ;;  %s4298_s11 = sld [smem:[#allocation3 + $0x19]] }
 0x10e   :  { %v1539_v11 = vmul.f32 %v1538_v26, %v3304_v15  ;;  %v1541_v3 = vmul.f32 %v1538_v26, %v3312_v18 }
 0x10f   :  { %v3520_v54 = vpop.permute.xlu2 %495  ;;  %v3575_v56 = vadd.f32 %v377_v44, %v357_v42  ;;  %v1470_v44 = vmul.f32 %v3534_v5, %v3317_v20 }
 0x111   :  { %5971 = vst [vmem:[#allocation27_spill] sm:$0xff] %v3575_v56 }
 0x113   :  { %1441 = vrot.lane.b32.xlu1 %v1426_v62, %s3248_s29  ;;  %v3585_v62 = vstv %s3092_s10  ;;  %s4290_s10 = sld [smem:[#allocation3 + $0x17]] }
 0x114   :  { %v1547_v10 = vmul.f32 %v3585_v62, %v3304_v15  ;;  %v1548_v33 = vmul.f32 %v3585_v62, %v3309_v17 }
 0x115   :  { %1439 = vrot.lane.b32.xlu0 %v1425_v7, %s3248_s29  ;;  %1369 = vrot.lane.b32.xlu2 %v1353_v8, %s3248_s29  ;;  %v494_v43 = vpop.permute.xlu1 %493  ;;  %v1468_v7 = vmul.f32 %v3534_v5, %v3300_v13  ;;  %v1415_v8 = vrot.slane %v1403_v55, 1  ;;  %v1466_v55 = vmul.f32 %v3534_v5, %v3309_v17 }
 0x116   :  { %v3552_v14 = vsel %vm499_vm5, %v494_v43, %v3520_v54  ;;  %v1559_v34 = vrot.slane %v1547_v10, 1  ;;  %v1560_v0 = vrot.slane %v1548_v33, 1 }
 0x117   :  { %v3556_v58 = vpop.permute.xlu2 %835  ;;  %v1500_v43 = vadd.f32 %v1488_v60, %v1468_v7  ;;  %v1427_v24 = vadd.f32 %v1415_v8, %v1395_v45  ;;  %v1552_v7 = vmul.f32 %v3585_v62, %v3317_v20  ;;  %v3645_v8 = vand.u32 15, %v154_v41 }
 0x118   :  { %v1571_v60 = vadd.f32 %v1559_v34, %v1539_v11  ;;  %v1542_v45 = vmul.f32 %v1538_v26, %v3300_v13 }
 0x119   :  { %5973 = vst [vmem:[#allocation29_spill] sm:$0xff] %v3645_v8  ;;  %v1564_v34 = vrot.slane %v1552_v7, 1  ;;  %vm193_vm8 = vcmp.ge.s32.totalorder %v3645_v8, 3  ;;  %vm476_vm14 = vcmp.ge.s32.totalorder %v3645_v8, 2  ;;  %vm1687_vm15 = vcmp.le.s32.totalorder %v3645_v8, 14 }
 0x11a   :  { %vm826_vm2 = vcmp.ge.s32.totalorder %v3645_v8, 1 }
 0x11b   :  { %1509 = vrot.lane.b32.xlu1 %v1497_v40, %s3248_s29  ;;  %v1549_v40 = vmul.f32 %v3585_v62, %v3312_v18 }
 0x11d   :  { %1445 = vrot.lane.b32.xlu0 %v1428_v46, %s3248_s29  ;;  %1437 = vrot.lane.b32.xlu2 %v1424_v51, %s3248_s29  ;;  %v834_v19 = vpop.permute.xlu1 %833  ;;  %v1490_v46 = vrot.slane %v1478_v16, 1  ;;  %v1550_v51 = vmul.f32 %v3585_v62, %v3300_v13  ;;  %v1561_v4 = vrot.slane %v1549_v40, 1  ;;  %v1620_v40 = vstv %s3614_s12  ;;  %s4305_s12 = sld [smem:[#allocation3 + $0x4a]] }
 0x11e   :  { %v3583_v61 = vsel %vm845_vm6, %v834_v19, %v3556_v58  ;;  %v1477_v19 = vmul.f32 %v3516_v50, %v3321_v21  ;;  %v1469_v50 = vmul.f32 %v3534_v5, %v3321_v21  ;;  %v1543_v5 = vmul.f32 %v1538_v26, %v3321_v21 }
 0x11f   :  { %v3587_v63 = vpop.permute.xlu0 %491  ;;  %v3589_v2 = vpop.permute.xlu2 %841  ;;  %v1562_v10 = vrot.slane %v1550_v51, 1  ;;  %v1573_v11 = vadd.f32 %v1561_v4, %v1541_v3  ;;  %v1625_v3 = vmul.f32 %v1620_v40, %v3321_v21 }
 0x120   :  { %v3598_v9 = vsel %vm499_vm5, %v3497_v31, %v3587_v63  ;;  %v1489_v16 = vrot.slane %v1477_v19, 1 }
 0x121   :  { %v1574_v19 = vadd.f32 %v1562_v10, %v1542_v45 }
 0x122   :  { %v1501_v7 = vadd.f32 %v1489_v16, %v1469_v50  ;;  %v1637_v50 = vrot.slane %v1625_v3, 1  ;;  %v235_v16 = vstv %s3651_s15  ;;  %s4389_s15 = sld [smem:[#allocation3 + $0x4e]] }
 0x123   :  { %1515 = vrot.lane.b32.xlu1 %v1500_v43, %s3248_s29  ;;  %v1502_v43 = vadd.f32 %v1490_v46, %v1470_v44  ;;  %v1551_v44 = vmul.f32 %v3585_v62, %v3321_v21  ;;  %v1612_v46 = vstv %s3623_s13  ;;  %s4330_s13 = sld [smem:[#allocation3 + $0x4b]] }
 0x124   :  { %v1614_v45 = vmul.f32 %v1612_v46, %v3309_v17  ;;  %v1618_v57 = vmul.f32 %v1612_v46, %v3317_v20  ;;  %v1615_v33 = vmul.f32 %v1612_v46, %v3312_v18  ;;  %v1616_v59 = vmul.f32 %v1612_v46, %v3300_v13 }
 0x125   :  { %1513 = vrot.lane.b32.xlu0 %v1499_v30, %s3248_s29  ;;  %1443 = vrot.lane.b32.xlu2 %v1427_v24, %s3248_s29  ;;  %v840_v31 = vpop.permute.xlu1 %839  ;;  %v1544_v30 = vmul.f32 %v1538_v26, %v3317_v20  ;;  %v1540_v24 = vmul.f32 %v1538_v26, %v3309_v17  ;;  %v243_v26 = vstv %s3631_s14  ;;  %v1563_v10 = vrot.slane %v1551_v44, 1  ;;  %s4357_s14 = sld [smem:[#allocation3 + $0x1a]] }
 0x126   :  { %v3619_v42 = vsel %vm845_vm6, %v840_v31, %v3589_v2  ;;  %v3697_v44 = vsel %vm193_vm8, %v3312_v18, 0.0  ;;  %v245_v3 = vmul.f32 %v243_v26, %v3365_v35 }
 0x127   :  { %v3625_v47 = vpop.permute.xlu0 %497  ;;  %v3627_v28 = vpop.permute.xlu2 %1698  ;;  %5974 = vst [vmem:[#allocation30_spill] sm:$0xff] %v3697_v44  ;;  %v3705_v6 = vadd.f32 %v1563_v10, %v1543_v5  ;;  %v246_v5 = vmul.f32 %v243_v26, %v3697_v44  ;;  %v1613_v10 = vmul.f32 %v1612_v46, %v3304_v15 }
 0x128   :  { %v3636_v23 = vsel %vm499_vm5, %v3520_v54, %v3625_v47  ;;  %v1498_v54 = vadd.f32 %v1486_v49, %v1466_v55  ;;  %v1622_v49 = vmul.f32 %v1620_v40, %v3309_v17  ;;  %vm2033_vm5 = vcmp.le.s32.totalorder %v3645_v8, 13 }
 0x12a   :  { %v1634_v1 = vrot.slane %v1622_v49, 1 }
 0x12b   :  { %1583 = vrot.lane.b32.xlu1 %v1571_v60, %s3248_s29  ;;  %v1626_v60 = vmul.f32 %v1620_v40, %v3317_v20 }
 0x12d   :  { %1519 = vrot.lane.b32.xlu0 %v1502_v43, %s3248_s29  ;;  %1511 = vrot.lane.b32.xlu2 %v1498_v54, %s3248_s29  ;;  %v1697_v31 = vpop.permute.xlu1 %1696  ;;  %v1623_v43 = vmul.f32 %v1620_v40, %v3312_v18  ;;  %v1576_v54 = vadd.f32 %v1564_v34, %v1544_v30  ;;  %v1624_v30 = vmul.f32 %v1620_v40, %v3300_v13 }
 0x12e   :  { %v3663_v41 = vsel %vm1706_vm7, %v1697_v31, %v3627_v28 }
 0x12f   :  { %v3669_v51 = vpop.permute.xlu0 %837  ;;  %v1695_v55 = vpop.permute.xlu2 %1694  ;;  %v1635_v34 = vrot.slane %v1623_v43, 1  ;;  %v3707_v43 = vadd.f32 %v1634_v1, %v1614_v45 }
 0x130   :  { %v3677_v4 = vsel %vm845_vm6, %v3556_v58, %v3669_v51  ;;  %v3680_v62 = vsel %vm1706_vm7, %v1695_v55, %v1697_v31  ;;  %v244_v58 = vmul.f32 %v243_v26, %v3358_v32  ;;  %v1638_v31 = vrot.slane %v1626_v60, 1 }
 0x131   :  { %v1621_v55 = vmul.f32 %v1620_v40, %v3304_v15  ;;  %v1617_v60 = vmul.f32 %v1612_v46, %v3321_v21  ;;  %v236_v40 = vmul.f32 %v235_v16, %v3358_v32  ;;  %v3726_v45 = vadd.f32 %v1635_v34, %v1615_v33 }
 0x132   :  { %v256_v56 = vrot.slane %v244_v58, 1  ;;  %v238_v33 = vmul.f32 %v235_v16, %v3697_v44  ;;  %v323_v34 = vstv %s3687_s16  ;;  %s4400_s16 = sld [smem:[#allocation3 + $0x1d]] }
 0x133   :  { %1589 = vrot.lane.b32.xlu1 %v1574_v19, %s3248_s29  ;;  %v1572_v19 = vadd.f32 %v1560_v0, %v1540_v24  ;;  %v3718_v0 = vadd.f32 %v1637_v50, %v1617_v60  ;;  %v1636_v24 = vrot.slane %v1624_v30, 1  ;;  %5976 = vst [vmem:[#allocation32_spill] sm:$0xff] %v3726_v45  ;;  %v1633_v58 = vrot.slane %v1621_v55, 1 }
 0x134   :  { %v3734_v50 = vsel %vm193_vm8, %v3317_v20, 0.0  ;;  %v3736_v30 = vadd.f32 %v256_v56, %v236_v40  ;;  %v258_v55 = vrot.slane %v246_v5, 1  ;;  %v239_v60 = vmul.f32 %v235_v16, %v3375_v39 }
 0x135   :  { %1587 = vrot.lane.b32.xlu0 %v1573_v11, %s3248_s29  ;;  %1517 = vrot.lane.b32.xlu2 %v1501_v7, %s3248_s29  ;;  %v3701_v49 = vpop.permute.xlu1 %1704  ;;  %v3716_v7 = vadd.f32 %v1638_v31, %v1618_v57  ;;  %5975 = vst [vmem:[#allocation31_spill] sm:$0xff] %v3718_v0  ;;  %v257_v57 = vrot.slane %v245_v3, 1  ;;  %v247_v31 = vmul.f32 %v243_v26, %v3375_v39 }
 0x136   :  { %5977 = vst [vmem:[#allocation33_spill] sm:$0xff] %v3734_v50  ;;  %v3745_v46 = vadd.f32 %v1636_v24, %v1616_v59  ;;  %v3748_v56 = vadd.f32 %v1633_v58, %v1613_v10  ;;  %v240_v3 = vmul.f32 %v235_v16, %v3548_v12  ;;  %v248_v40 = vmul.f32 %v243_v26, %v3548_v12 }
 0x137   :  { %v3712_v48 = vpop.permute.xlu0 %843  ;;  %v3714_v11 = vpop.permute.xlu2 %2044  ;;  %v249_v53 = vmul.f32 %v243_v26, %v3734_v50  ;;  %v259_v24 = vrot.slane %v247_v31, 1  ;;  %v286_v5 = vmul.f32 %v3369_v37, %v3697_v44  ;;  %v324_v10 = vmul.f32 %v323_v34, %v3358_v32 }
 0x138   :  { %v3724_v1 = vsel %vm845_vm6, %v3589_v2, %v3712_v48  ;;  %v237_v2 = vmul.f32 %v235_v16, %v3365_v35  ;;  %5978 = vst [vmem:[#allocation34_spill] sm:$0xff] %v3745_v46  ;;  %v241_v58 = vmul.f32 %v235_v16, %v3734_v50  ;;  %v325_v37 = vmul.f32 %v323_v34, %v3365_v35 }
 0x139   :  { %5979 = vst [vmem:[#allocation35_spill] sm:$0xff] %v3748_v56  ;;  %v260_v56 = vrot.slane %v248_v40, 1  ;;  %v261_v46 = vrot.slane %v249_v53, 1  ;;  %v278_v45 = vmul.f32 %v3367_v36, %v3697_v44  ;;  %v298_v0 = vrot.slane %v286_v5, 1 }
 0x13a   :  { %v3757_v59 = vadd.f32 %v257_v57, %v237_v2  ;;  %v3774_v2 = vadd.f32 %v258_v55, %v238_v33  ;;  %v336_v55 = vrot.slane %v324_v10, 1  ;;  %v328_v53 = vmul.f32 %v323_v34, %v3548_v12 }
 0x13b   :  { %2388 = vrot.lane.b32.xlu1 %v3309_v17, %s3249_s1  ;;  %v3810_v36 = vadd.f32 %v261_v46, %v241_v58  ;;  %v329_v46 = vmul.f32 %v323_v34, %v3734_v50  ;;  %vm2032_vm6 = vcmp.le.s32.totalorder %v3347_v29, 13 }
 0x13c   :  { %5980 = vst [vmem:[#allocation36_spill] sm:$0xff] %v3757_v59  ;;  %v326_v59 = vmul.f32 %v323_v34, %v3697_v44  ;;  %v340_v58 = vrot.slane %v328_v53, 1  ;;  %v3857_v53 = vstv %s3788_s23  ;;  %s4586_s23 = sld [smem:[#allocation3 + $0x24]] }
 0x13d   :  { %1593 = vrot.lane.b32.xlu0 %v1576_v54, %s3248_s29  ;;  %1585 = vrot.lane.b32.xlu2 %v1572_v19, %s3248_s29  ;;  %v2043_v17 = vpop.permute.xlu1 %2042  ;;  %v315_v54 = vstv %s3710_s17  ;;  %v327_v19 = vmul.f32 %v323_v34, %v3375_v39  ;;  %5982 = vst [vmem:[#allocation38_spill] sm:$0xff] %v3774_v2  ;;  %v3793_v2 = vsel %vm474_vm10, %v3503_v38, 0.0  ;;  %v337_v38 = vrot.slane %v325_v37, 1  ;;  %s4406_s17 = sld [smem:[#allocation3 + $0x4f]] }
 0x13e   :  { %v3766_v26 = vsel %vm2052_vm9, %v2043_v17, %v3714_v11  ;;  %v316_v33 = vmul.f32 %v315_v54, %v3358_v32  ;;  %5985 = vst [vmem:[#allocation41_spill] sm:$0xff] %v3793_v2  ;;  %v318_v5 = vmul.f32 %v315_v54, %v3697_v44  ;;  %v338_v10 = vrot.slane %v326_v59, 1 }
 0x13f   :  { %5981 = vst [vmem:[#allocation37_spill] sm:$0xff] %v3766_v26  ;;  %v1703_v57 = vpop.permute.xlu0 %1702  ;;  %v2041_v31 = vpop.permute.xlu2 %2040  ;;  %v339_v40 = vrot.slane %v327_v19, 1  ;;  %v317_v19 = vmul.f32 %v315_v54, %v3365_v35  ;;  %v3838_v35 = vstv %s3772_s22  ;;  %v320_v34 = vmul.f32 %v315_v54, %v3548_v12  ;;  %s4571_s22 = sld [smem:[#allocation3 + $0x56]] }
 0x140   :  { %v3780_v26 = vsel %vm1706_vm7, %v1703_v57, %v3701_v49  ;;  %v3783_v16 = vsel %vm2052_vm9, %v2041_v31, %v2043_v17  ;;  %v3805_v17 = vadd.f32 %v259_v24, %v239_v60  ;;  %v3808_v31 = vadd.f32 %v260_v56, %v240_v3  ;;  %5987 = vst [vmem:[#allocation43_spill] sm:$0xff] %v3810_v36 }
 0x141   :  { %5983 = vst [vmem:[#allocation39_spill] sm:$0xff] %v3780_v26  ;;  %v3796_v26 = vstv %s3738_s0  ;;  %v3823_v60 = vstv %s3759_s21  ;;  %v3827_v56 = vstv %s3753_s20  ;;  %v3829_v3 = vadd.f32 %v298_v0, %v278_v45  ;;  %s4412_s0 = sld [smem:[#allocation3 + $0x1e]] }
 0x142   :  { %5984 = vst [vmem:[#allocation40_spill] sm:$0xff] %v3783_v16  ;;  %v319_v16 = vmul.f32 %v315_v54, %v3375_v39  ;;  %v558_v37 = vmul.f32 %v3796_v26, %v3793_v2  ;;  %v3831_v59 = vadd.f32 %v336_v55, %v316_v33  ;;  %v3842_v36 = vadd.f32 %v338_v10, %v318_v5  ;;  %s4435_s20 = sld [smem:[#allocation3 + $0x20]] }
 0x143   :  { %2396 = vrot.lane.b32.xlu1 %v3317_v20, %s3249_s1  ;;  %5986 = vst [vmem:[#allocation42_spill] sm:$0xff] %v3808_v31  ;;  %v3840_v31 = vadd.f32 %v337_v38, %v317_v19  ;;  %v604_v45 = vmul.f32 %v3823_v60, %v3793_v2  ;;  %v321_v55 = vmul.f32 %v315_v54, %v3734_v50  ;;  %v3872_v10 = vsel %vm824_vm11, %v3583_v61, 0.0  ;;  %s4561_s21 = sld [smem:[#allocation3 + $0x55]] }
 0x144   :  { %5988 = vst [vmem:[#allocation44_spill] sm:$0xff] %v3823_v60  ;;  %v3833_v24 = vadd.f32 %v339_v40, %v319_v16  ;;  %v404_v16 = vmul.f32 %v3827_v56, %v3358_v32  ;;  %v570_v33 = vrot.slane %v558_v37, 1  ;;  %v341_v40 = vrot.slane %v329_v46, 1 }
 0x145   :  { %2046 = vrot.lane.b32.xlu0 %v3300_v13, %s3247_s24  ;;  %1591 = vrot.lane.b32.xlu2 %v3705_v6, %s3248_s29  ;;  %v3818_v20 = vpop.permute.xlu1 %2050  ;;  %5989 = vst [vmem:[#allocation45_spill] sm:$0xff] %v3827_v56  ;;  %s3853_s24 = sld [smem:[#allocation3 + $0x9]]  ;;  %v550_v5 = vmul.f32 %v3838_v35, %v3793_v2  ;;  %v3867_v38 = vadd.f32 %v340_v58, %v320_v34  ;;  %v3877_v54 = vstv %s3803_s26  ;;  %v616_v19 = vrot.slane %v604_v45, 1 }
 0x146   :  { %5990 = vst [vmem:[#allocation46_spill] sm:$0xff] %v3829_v3  ;;  %v3888_v37 = vmul.f32 %v3438_v25, %v3697_v44  ;;  %v396_v61 = vmul.f32 %v3857_v53, %v3358_v32  ;;  %v416_v46 = vrot.slane %v404_v16, 1  ;;  %v3901_v34 = vadd.f32 %v341_v40, %v321_v55  ;;  %s4610_s26 = sld [smem:[#allocation3 + $0x58]] }
 0x147   :  { %5991 = vst [vmem:[#allocation47_spill] sm:$0xff] %v3831_v59  ;;  %v1701_v6 = vpop.permute.xlu0 %1700  ;;  %v3835_v39 = vpop.permute.xlu2 %1218  ;;  %v582_v58 = vadd.f32 %v570_v33, %v550_v5  ;;  %v3926_v40 = vmul.f32 %v3436_v22, %v3697_v44  ;;  %v3996_v22 = vstv %s3899_s30  ;;  %s4751_s30 = sld [smem:[#allocation3 + $0x1b]] }
 0x148   :  { %5992 = vst [vmem:[#allocation48_spill] sm:$0xff] %v3833_v24  ;;  %v3847_v0 = vsel %vm1706_vm7, %v1701_v6, %v1703_v57  ;;  %v3862_v57 = vsel %vm474_vm10, %v3552_v14, 0.0  ;;  %v3880_v14 = vstv %s3798_s25  ;;  %vm2031_vm7 = vcmp.le.s32.totalorder %v3343_v27, 13  ;;  %s4598_s25 = sld [smem:[#allocation3 + $0x25]] }
 0x149   :  { %5993 = vst [vmem:[#allocation49_spill] sm:$0xff] %v3840_v31  ;;  %v561_v6 = vmul.f32 %v3796_v26, %v3862_v57  ;;  %v4503_v8 = vstv %s4435_s20  ;;  %vm2398_vm10 = vcmask 998400   ;;  %s3251_s20 = smov 32  }
 0x14a   :  { %5994 = vst [vmem:[#allocation50_spill] sm:$0xff] %v3842_v36 }
 0x14b   :  { %5995 = vst [vmem:[#allocation51_spill] sm:$0xff] %v3857_v53  ;;  %1659 = vrot.lane.b32.xlu1 %v3707_v43, %s3248_s29  ;;  %v3938_v25 = vstv %s3853_s24  ;;  %s4616_s24 = sld [smem:[#allocation3 + $0x27]] }
 0x14c   :  { %5996 = vst [vmem:[#allocation52_spill] sm:$0xff] %v3862_v57 }
 0x14d   :  { %5997 = vst [vmem:[#allocation53_spill] sm:$0xff] %v3867_v38  ;;  %2394 = vrot.lane.b32.xlu0 %v3321_v21, %s3249_s1  ;;  %2390 = vrot.lane.b32.xlu2 %v3312_v18, %s3249_s1  ;;  %v1217_v43 = vpop.permute.xlu1 %1216  ;;  %v904_v21 = vmul.f32 %v3877_v54, %v3872_v10  ;;  %v596_v18 = vmul.f32 %v3880_v14, %v3793_v2 }
 0x14e   :  { %5998 = vst [vmem:[#allocation54_spill] sm:$0xff] %v3872_v10  ;;  %v3906_v45 = vsel %vm1228_vm13, %v1217_v43, %v3835_v39  ;;  %v3929_v43 = vadd.f32 %v416_v46, %v396_v61  ;;  %v3946_v61 = vsel %vm475_vm12, %v3598_v9, 0.0  ;;  %v3956_v46 = vsel %vm476_vm14, %v3625_v47, 0.0 }
 0x14f   :  { %5999 = vst [vmem:[#allocation55_spill] sm:$0xff] %v3880_v14  ;;  %v3916_v16 = vpop.permute.xlu0 %2048  ;;  %v3918_v33 = vpop.permute.xlu2 %1224  ;;  %v628_v55 = vadd.f32 %v616_v19, %v596_v18  ;;  %v588_v19 = vadd.f32 %v582_v58, %v3736_v30  ;;  %v573_v18 = vrot.slane %v561_v6, 1  ;;  %v916_v5 = vrot.slane %v904_v21, 1 }
 0x150   :  { %6000 = vst [vmem:[#allocation56_spill] sm:$0xff] %v3888_v37  ;;  %v3961_v30 = vsel %vm1687_vm15, %v3627_v28, 0.0  ;;  %v3966_v9 = vsel %vm1685_vm4, %v3680_v62, 0.0  ;;  %v3973_v47 = vstv %s3882_s27  ;;  %v3978_v58 = vsel %vm475_vm12, %v3636_v23, 0.0  ;;  %s4647_s27 = sld [smem:[#allocation3 + $0x28]] }
 0x151   :  { %6001 = vst [vmem:[#allocation57_spill] sm:$0xff] %v3901_v34  ;;  %v896_v28 = vmul.f32 %v3938_v25, %v3872_v10  ;;  %v3983_v6 = vstv %s3884_s28  ;;  %v634_v62 = vadd.f32 %v628_v55, %v3397_v52  ;;  %v950_v52 = vmul.f32 %v3973_v47, %v3872_v10  ;;  %s4657_s28 = sld [smem:[#allocation3 + $0x59]] }
 0x152   :  { %6002 = vst [vmem:[#allocation58_spill] sm:$0xff] %v3906_v45  ;;  %v3934_v45 = vsel %vm476_vm14, %v3587_v63, 0.0  ;;  %v3951_v63 = vsel %vm824_vm11, %v3619_v42, 0.0  ;;  %v553_v42 = vmul.f32 %v3838_v35, %v3862_v57  ;;  %v559_v12 = vmul.f32 %v3796_v26, %v3946_v61 }
 0x153   :  { %6003 = vst [vmem:[#allocation59_spill] sm:$0xff] %v3916_v16  ;;  %1667 = vrot.lane.b32.xlu1 %v3716_v7, %s3248_s29  ;;  %v3989_v7 = vsel %vm1686_vm3, %v3663_v41, 0.0  ;;  %v4003_v41 = vsel %vm826_vm2, %v3669_v51, 0.0  ;;  %v928_v55 = vadd.f32 %v916_v5, %v896_v28  ;;  %v942_v51 = vmul.f32 %v3983_v6, %v3872_v10 }
 0x154   :  { %6004 = vst [vmem:[#allocation60_spill] sm:$0xff] %v3926_v40  ;;  %v585_v21 = vadd.f32 %v573_v18, %v553_v42  ;;  %v4014_v18 = vsel %vm825_vm1, %v3677_v4, 0.0  ;;  %v4019_v40 = vstv %s3920_s3  ;;  %v962_v32 = vrot.slane %v950_v52, 1  ;;  %s4761_s3 = sld [smem:[#allocation3 + $0x4c]] }
 0x155   :  { %6005 = vst [vmem:[#allocation61_spill] sm:$0xff] %v3929_v43  ;;  %2392 = vrot.lane.b32.xlu0 %v3300_v13, %s3249_s1  ;;  %2386 = vrot.lane.b32.xlu2 %v3304_v15, %s3249_s1  ;;  %v1223_v23 = vpop.permute.xlu1 %1222  ;;  %v1811_v15 = vmul.f32 %v3996_v22, %v3966_v9  ;;  %v4028_v28 = vstv %s3922_s4  ;;  %v560_v50 = vmul.f32 %v3796_v26, %v3934_v45  ;;  %v4055_v43 = vsel %vm1687_vm15, %v3701_v49, 0.0  ;;  %s4424_s1 = sld [smem:[#allocation3 + $0x51]] }
 0x156   :  { %6006 = vst [vmem:[#allocation62_spill] sm:$0xff] %v3934_v45  ;;  %v4007_v13 = vsel %vm1228_vm13, %v1223_v23, %v3918_v33  ;;  %v1803_v23 = vmul.f32 %v4019_v40, %v3966_v9  ;;  %v974_v53 = vadd.f32 %v962_v32, %v942_v51  ;;  %v4039_v52 = vadd.f32 %v928_v55, %v588_v19  ;;  %s4770_s4 = sld [smem:[#allocation3 + $0x2a]] }
 0x157   :  { %6007 = vst [vmem:[#allocation63_spill] sm:$0xff] %v3946_v61  ;;  %v1221_v42 = vpop.permute.xlu0 %1220  ;;  %v4016_v37 = vpop.permute.xlu2 %1289  ;;  %v1823_v4 = vrot.slane %v1811_v15, 1  ;;  %v4050_v15 = vsel %vm826_vm2, %v3712_v48, 0.0  ;;  %v551_v32 = vmul.f32 %v3838_v35, %v3946_v61  ;;  %v4064_v55 = vsel %vm2033_vm5, %v3714_v11, 0.0  ;;  %v6028_v11 = vld [vmem:[#allocation32_spill] sm:$0xff] }
 0x158   :  { %6008 = vst [vmem:[#allocation64_spill] sm:$0xff] %v3951_v63  ;;  %v4025_v5 = vsel %vm1228_vm13, %v3835_v39, %v1221_v42  ;;  %v552_v39 = vmul.f32 %v3838_v35, %v3934_v45  ;;  %v4059_v19 = vadd.f32 %v974_v53, %v634_v62  ;;  %v597_v51 = vmul.f32 %v3880_v14, %v3946_v61  ;;  %v6027_v53 = vld [vmem:[#allocation31_spill] sm:$0xff] }
 0x159   :  { %6009 = vst [vmem:[#allocation65_spill] sm:$0xff] %v3956_v46  ;;  %v4043_v42 = vadd.f32 %v1823_v4, %v1803_v23  ;;  %v951_v23 = vmul.f32 %v3973_v47, %v4014_v18  ;;  %v4073_v49 = vsel %vm825_vm1, %v3724_v1, 0.0  ;;  %v572_v4 = vrot.slane %v560_v50, 1 }
 0x15a   :  { %6010 = vst [vmem:[#allocation66_spill] sm:$0xff] %v3961_v30  ;;  %v571_v56 = vrot.slane %v559_v12, 1  ;;  %v943_v38 = vmul.f32 %v3983_v6, %v4014_v18  ;;  %v899_v10 = vmul.f32 %v3938_v25, %v3951_v63  ;;  %v905_v3 = vmul.f32 %v3877_v54, %v4014_v18 }
 0x15b   :  { %6011 = vst [vmem:[#allocation67_spill] sm:$0xff] %v3966_v9  ;;  %v963_v24 = vrot.slane %v951_v23, 1  ;;  %v584_v36 = vadd.f32 %v572_v4, %v552_v39  ;;  %v599_v39 = vmul.f32 %v3880_v14, %v3862_v57  ;;  %v6034_v4 = vld [vmem:[#allocation34_spill] sm:$0xff]  ;;  %vm2902_vm14 = vcmask 261120  }
 0x15c   :  { %6012 = vst [vmem:[#allocation68_spill] sm:$0xff] %v3973_v47  ;;  %v583_v59 = vadd.f32 %v571_v56, %v551_v32  ;;  %vm2871_vm15 = vcmask 523264  }
 0x15d   :  { %6013 = vst [vmem:[#allocation69_spill] sm:$0xff] %v3978_v58  ;;  %1665 = vrot.lane.b32.xlu0 %v6027_v53, %s3248_s29  ;;  %1661 = vrot.lane.b32.xlu2 %v6028_v11, %s3248_s29  ;;  %v1288_v62 = vpop.permute.xlu1 %1287  ;;  %v4091_v53 = vsel %vm1685_vm4, %v3847_v0, 0.0  ;;  %v1759_v0 = vmul.f32 %v4028_v28, %v3961_v30  ;;  %v975_v31 = vadd.f32 %v963_v24, %v943_v38 }
 0x15e   :  { %6014 = vst [vmem:[#allocation70_spill] sm:$0xff] %v3983_v6  ;;  %v4084_v44 = vsel %vm1228_vm13, %v1288_v62, %v4016_v37  ;;  %v1804_v62 = vmul.f32 %v4019_v40, %v3989_v7  ;;  %v607_v24 = vmul.f32 %v3823_v60, %v3862_v57 }
 0x15f   :  { %6015 = vst [vmem:[#allocation71_spill] sm:$0xff] %v3989_v7  ;;  %v1227_v11 = vpop.permute.xlu0 %1226  ;;  %v4093_v50 = vpop.permute.xlu2 %1295 }
 0x160   :  { %6016 = vst [vmem:[#allocation72_spill] sm:$0xff] %v3996_v22  ;;  %v619_v32 = vrot.slane %v607_v24, 1  ;;  %v1757_v24 = vmul.f32 %v4028_v28, %v3966_v9  ;;  %v6095_v27 = vld [vmem:[#allocation65_spill] sm:$0xff] }
 0x161   :  { %6017 = vst [vmem:[#allocation73_spill] sm:$0xff] %v4003_v41 }
 0x162   :  { %6018 = vst [vmem:[#allocation74_spill] sm:$0xff] %v4007_v13  ;;  %v4033_v13 = vstv %s3940_s5  ;;  %s4776_s5 = sld [smem:[#allocation3 + $0x5b]] }
 0x163   :  { %6019 = vst [vmem:[#allocation75_spill] sm:$0xff] %v4014_v18  ;;  %v1767_v12 = vmul.f32 %v4033_v13, %v3961_v30  ;;  %v1765_v38 = vmul.f32 %v4033_v13, %v3966_v9 }
 0x164   :  { %6020 = vst [vmem:[#allocation76_spill] sm:$0xff] %v4019_v40 }
 0x165   :  { %6021 = vst [vmem:[#allocation77_spill] sm:$0xff] %v4025_v5  ;;  %v605_v5 = vmul.f32 %v3823_v60, %v3946_v61  ;;  %v4110_v61 = vadd.f32 %v585_v21, %v3805_v17  ;;  %v906_v17 = vmul.f32 %v3877_v54, %v4003_v41  ;;  %v1779_v56 = vrot.slane %v1767_v12, 1  ;;  %1663 = vrot.lane.b32.xlu0 %v6034_v4, %s3248_s29  ;;  %v1294_v12 = vpop.permute.xlu1 %1293 }
 0x166   :  { %6022 = vst [vmem:[#allocation78_spill] sm:$0xff] %v4039_v52  ;;  %v4148_v4 = vsel %vm1228_vm13, %v1294_v12, %v4093_v50  ;;  %v1777_v57 = vrot.slane %v1765_v38, 1  ;;  %v6039_v12 = vld [vmem:[#allocation36_spill] sm:$0xff] }
 0x167   :  { %6023 = vst [vmem:[#allocation79_spill] sm:$0xff] %v4050_v15  ;;  %v617_v48 = vrot.slane %v605_v5, 1  ;;  %v1812_v5 = vmul.f32 %v3996_v22, %v3989_v7  ;;  %v4152_v2 = vpop.permute.xlu0 %1291 }
 0x168   :  { %6024 = vst [vmem:[#allocation80_spill] sm:$0xff] %v4055_v43  ;;  %v4167_v38 = vsel %vm1228_vm13, %v4016_v37, %v4152_v2  ;;  %v6045_v37 = vld [vmem:[#allocation38_spill] sm:$0xff] }
 0x169   :  { %6025 = vst [vmem:[#allocation81_spill] sm:$0xff] %v4064_v55  ;;  %v629_v1 = vadd.f32 %v617_v48, %v597_v51  ;;  %v1824_v34 = vrot.slane %v1812_v5, 1  ;;  %v4102_v51 = vsel %vm1228_vm13, %v3918_v33, %v1227_v11  ;;  %v6032_v48 = vld [vmem:[#allocation20_spill] sm:$0xff]  ;;  %v1814_v11 = vmul.f32 %v3996_v22, %v4091_v53 }
 0x16a   :  { %6026 = vst [vmem:[#allocation82_spill] sm:$0xff] %v4073_v49 }
 0x16b   :  { %6029 = vst [vmem:[#allocation31_spill] sm:$0xff] %v4084_v44  ;;  %v635_v23 = vadd.f32 %v629_v1, %v6032_v48  ;;  %v4112_v5 = vadd.f32 %v1824_v34, %v1804_v62  ;;  %v953_v34 = vmul.f32 %v3973_v47, %v3951_v63  ;;  %v1826_v21 = vrot.slane %v1814_v11, 1  ;;  %v6035_v1 = vld [vmem:[#allocation35_spill] sm:$0xff]  ;;  %v6037_v44 = vld [vmem:[#allocation37_spill] sm:$0xff] }
 0x16c   :  { %6030 = vst [vmem:[#allocation32_spill] sm:$0xff] %v4091_v53  ;;  %1657 = vrot.lane.b32.xlu2 %v6035_v1, %s3248_s29  ;;  %v907_v62 = vmul.f32 %v3877_v54, %v3951_v63  ;;  %v555_v48 = vmul.f32 %v3838_v35, %v3956_v46  ;;  %v4161_v9 = vsel %vm2032_vm6, %v6037_v44, 0.0  ;;  %v563_v44 = vmul.f32 %v3796_v26, %v3956_v46  ;;  %s4251_s29 = sld [smem:[#allocation3 + $0x47]] }
 0x16d   :  { %6031 = vst [vmem:[#allocation83_spill] sm:$0xff] %v4102_v51  ;;  %v4116_v33 = vadd.f32 %v975_v31, %v635_v23  ;;  %v1806_v31 = vmul.f32 %v4019_v40, %v4091_v53  ;;  %v945_v23 = vmul.f32 %v3983_v6, %v3951_v63  ;;  %v965_v11 = vrot.slane %v953_v34, 1  ;;  %v4156_v63 = vpop.permute.xlu2 %1363 }
 0x16e   :  { %6033 = vst [vmem:[#allocation20_spill] sm:$0xff] %v4112_v5  ;;  %v631_v51 = vadd.f32 %v619_v32, %v599_v39  ;;  %v918_v40 = vrot.slane %v906_v17, 1  ;;  %v6041_v17 = vld [vmem:[#allocation21_spill] sm:$0xff]  ;;  %v4173_v39 = vstv %s4107_s6  ;;  %v1766_v32 = vmul.f32 %v4033_v13, %v3989_v7  ;;  %s4780_s6 = sld [smem:[#allocation3 + $0x5c]] }
 0x16f   :  { %6036 = vst [vmem:[#allocation34_spill] sm:$0xff] %v4148_v4  ;;  %v4150_v1 = vadd.f32 %v1826_v21, %v1806_v31  ;;  %v977_v34 = vadd.f32 %v965_v11, %v945_v23  ;;  %v589_v4 = vadd.f32 %v583_v59, %v6039_v12  ;;  %v898_v21 = vmul.f32 %v3938_v25, %v4003_v41  ;;  %v6043_v59 = vld [vmem:[#allocation39_spill] sm:$0xff] }
 0x170   :  { %6038 = vst [vmem:[#allocation35_spill] sm:$0xff] %v4161_v9  ;;  %v637_v31 = vadd.f32 %v631_v51, %v6041_v17  ;;  %v4182_v23 = vsel %vm1686_vm3, %v6043_v59, 0.0  ;;  %v590_v11 = vadd.f32 %v584_v36, %v6045_v37  ;;  %v919_v51 = vrot.slane %v907_v62, 1  ;;  %v6046_v17 = vld [vmem:[#allocation40_spill] sm:$0xff]  ;;  %v4216_v37 = vpop.permute.xlu0 %1297 }
 0x171   :  { %6040 = vst [vmem:[#allocation37_spill] sm:$0xff] %v4167_v38  ;;  %v4188_v9 = vsel %vm2031_vm7, %v6046_v17, 0.0  ;;  %v4190_v38 = vadd.f32 %v1777_v57, %v1757_v24  ;;  %v930_v52 = vadd.f32 %v918_v40, %v898_v21  ;;  %v917_v5 = vrot.slane %v905_v3, 1  ;;  %v1362_v40 = vpop.permute.xlu1 %1361 }
 0x172   :  { %6042 = vst [vmem:[#allocation36_spill] sm:$0xff] %v4173_v39  ;;  %v983_v12 = vadd.f32 %v977_v34, %v637_v31  ;;  %v897_v46 = vmul.f32 %v3938_v25, %v4014_v18  ;;  %v1758_v59 = vmul.f32 %v4028_v28, %v3989_v7  ;;  %v4196_v6 = vadd.f32 %v1779_v56, %v1759_v0 }
 0x173   :  { %6044 = vst [vmem:[#allocation21_spill] sm:$0xff] %v4182_v23  ;;  %v2113_v36 = vmul.f32 %v4173_v39, %v4064_v55  ;;  %v4201_v62 = vstv %s4136_s7  ;;  %v1778_v34 = vrot.slane %v1766_v32, 1  ;;  %v575_v31 = vrot.slane %v563_v44, 1  ;;  %s4793_s7 = sld [smem:[#allocation3 + $0x5d]] }
 0x174   :  { %6047 = vst [vmem:[#allocation39_spill] sm:$0xff] %v4188_v9  ;;  %v909_v57 = vmul.f32 %v3877_v54, %v4050_v15  ;;  %v1768_v3 = vmul.f32 %v4033_v13, %v4091_v53  ;;  %v931_v24 = vadd.f32 %v919_v51, %v899_v10  ;;  %v562_v21 = vmul.f32 %v3796_v26, %v3978_v58 }
 0x175   :  { %6048 = vst [vmem:[#allocation38_spill] sm:$0xff] %v4201_v62  ;;  %v1373_v0 = vsel %vm1228_vm13, %v1362_v40, %v4156_v63  ;;  %v4214_v56 = vsel %vm2033_vm5, %v3818_v20, 0.0  ;;  %v929_v32 = vadd.f32 %v917_v5, %v897_v46  ;;  %v936_v44 = vadd.f32 %v930_v52, %v590_v11 }
 0x176   :  { %6049 = vst [vmem:[#allocation40_spill] sm:$0xff] %v4214_v56  ;;  %v1383_v17 = vadd.f32 %v1373_v0, %v4059_v19  ;;  %v2125_v9 = vrot.slane %v2113_v36, 1  ;;  %v554_v10 = vmul.f32 %v3838_v35, %v3978_v58  ;;  %v908_v26 = vmul.f32 %v3877_v54, %v4073_v49  ;;  %v4233_v19 = vpop.permute.xlu2 %1369 }
 0x177   :  { %v4226_v51 = vsel %vm1228_vm13, %v4093_v50, %v4216_v37  ;;  %v4228_v40 = vadd.f32 %v1778_v34, %v1758_v59  ;;  %v587_v46 = vadd.f32 %v575_v31, %v555_v48  ;;  %v921_v52 = vrot.slane %v909_v57, 1  ;;  %6096 = vst [vmem:[#allocation99_spill] sm:$0xff] %v4503_v8 }
 0x178   :  { %v4231_v5 = vadd.f32 %v4043_v42, %v1383_v17  ;;  %v2105_v35 = vmul.f32 %v4201_v62, %v4064_v55  ;;  %v1780_v11 = vrot.slane %v1768_v3, 1  ;;  %v937_v54 = vadd.f32 %v931_v24, %v4110_v61 }
 0x179   :  { %v574_v36 = vrot.slane %v562_v21, 1  ;;  %v935_v0 = vadd.f32 %v929_v32, %v589_v4  ;;  %v1760_v50 = vmul.f32 %v4028_v28, %v4091_v53  ;;  %v901_v48 = vmul.f32 %v3938_v25, %v4050_v15  ;;  %v6051_v4 = vld [vmem:[#allocation43_spill] sm:$0xff]  ;;  %v1368_v32 = vpop.permute.xlu1 %1367 }
 0x17a   :  { %6050 = vst [vmem:[#allocation84_spill] sm:$0xff] %v4231_v5  ;;  %v606_v42 = vmul.f32 %v3823_v60, %v3934_v45  ;;  %v2056_v59 = vsel %vm2052_vm9, %v3916_v16, %v3818_v20  ;;  %v4247_v34 = vadd.f32 %v2125_v9, %v2105_v35  ;;  %v900_v61 = vmul.f32 %v3938_v25, %v4073_v49  ;;  %v4268_v35 = vpop.permute.xlu0 %1365 }
 0x17b   :  { %v920_v31 = vrot.slane %v908_v26, 1  ;;  %v593_v57 = vadd.f32 %v587_v46, %v6051_v4  ;;  %v933_v3 = vadd.f32 %v921_v52, %v901_v48  ;;  %v1770_v24 = vmul.f32 %v4033_v13, %v4055_v43  ;;  %6053 = vst [vmem:[#allocation85_spill] sm:$0xff] %v4268_v35 }
 0x17c   :  { %v952_v21 = vmul.f32 %v3973_v47, %v4003_v41  ;;  %v1792_v17 = vadd.f32 %v1780_v11, %v1760_v50  ;;  %v586_v20 = vadd.f32 %v574_v36, %v554_v10  ;;  %v1762_v9 = vmul.f32 %v4028_v28, %v4055_v43 }
 0x17d   :  { %v1375_v25 = vsel %vm1228_vm13, %v1368_v32, %v4233_v19  ;;  %v4264_v26 = vsel %vm2032_vm6, %v2056_v59, 0.0  ;;  %v598_v46 = vmul.f32 %v3880_v14, %v3934_v45  ;;  %v618_v52 = vrot.slane %v606_v42, 1  ;;  %v6063_v14 = vld [vmem:[#allocation46_spill] sm:$0xff] }
 0x17e   :  { %6052 = vst [vmem:[#allocation43_spill] sm:$0xff] %v4264_v26  ;;  %v1386_v48 = vadd.f32 %v1375_v25, %v983_v12  ;;  %v932_v10 = vadd.f32 %v920_v31, %v900_v61  ;;  %v1769_v11 = vmul.f32 %v4033_v13, %v4182_v23  ;;  %v2116_v36 = vmul.f32 %v4173_v39, %v4214_v56  ;;  %v6055_v61 = vld [vmem:[#allocation42_spill] sm:$0xff] }
 0x17f   :  { %v1374_v50 = vsel %vm1228_vm13, %v4156_v63, %v4268_v35  ;;  %v1782_v59 = vrot.slane %v1770_v24, 1  ;;  %v964_v4 = vrot.slane %v952_v21, 1  ;;  %v939_v12 = vadd.f32 %v933_v3, %v593_v57  ;;  %v6057_v21 = vld [vmem:[#allocation20_spill] sm:$0xff]  ;;  %v1438_v57 = vpop.permute.xlu2 %1437  ;;  %v6079_v35 = vld [vmem:[#allocation47_spill] sm:$0xff] }
 0x180   :  { %v1384_v42 = vadd.f32 %v1374_v50, %v4116_v33  ;;  %v4281_v32 = vadd.f32 %v4150_v1, %v1386_v48  ;;  %v592_v13 = vadd.f32 %v586_v20, %v6055_v61  ;;  %v1761_v31 = vmul.f32 %v4028_v28, %v4182_v23  ;;  %v6056_v1 = vld [vmem:[#allocation70_spill] sm:$0xff] }
 0x181   :  { %v1813_v25 = vmul.f32 %v3996_v22, %v3961_v30  ;;  %v1311_v63 = vadd.f32 %v4152_v2, %v936_v44  ;;  %v630_v33 = vadd.f32 %v618_v52, %v598_v46  ;;  %v944_v24 = vmul.f32 %v6056_v1, %v4003_v41  ;;  %v6059_v2 = vld [vmem:[#allocation78_spill] sm:$0xff]  ;;  %v6060_v44 = vld [vmem:[#allocation31_spill] sm:$0xff] }
 0x182   :  { %6054 = vst [vmem:[#allocation86_spill] sm:$0xff] %v4281_v32  ;;  %v4296_v48 = vadd.f32 %v6057_v21, %v1384_v42  ;;  %v1781_v3 = vrot.slane %v1769_v11, 1  ;;  %v2108_v28 = vmul.f32 %v4201_v62, %v4214_v56  ;;  %v2128_v20 = vrot.slane %v2116_v36, 1  ;;  %v1436_v21 = vpop.permute.xlu1 %1435  ;;  %v6062_v32 = vld [vmem:[#allocation34_spill] sm:$0xff]  ;;  %v4316_v60 = vpop.permute.xlu0 %1371 }
 0x183   :  { %v4303_v50 = vstv %s4251_s29  ;;  %v1309_v46 = vadd.f32 %v6060_v44, %v6059_v2  ;;  %v938_v52 = vadd.f32 %v932_v10, %v592_v13  ;;  %v1794_v61 = vadd.f32 %v1782_v59, %v1762_v9  ;;  %6064 = vst [vmem:[#allocation20_spill] sm:$0xff] %v4316_v60  ;;  %v6065_v9 = vld [vmem:[#allocation41_spill] sm:$0xff]  ;;  %s4799_s29 = sld [smem:[#allocation3 + $0x5f]] }
 0x184   :  { %6058 = vst [vmem:[#allocation42_spill] sm:$0xff] %v4296_v48  ;;  %v976_v42 = vadd.f32 %v964_v4, %v944_v24  ;;  %v6061_v48 = vld [vmem:[#allocation37_spill] sm:$0xff]  ;;  %v1312_v11 = vadd.f32 %v6062_v32, %v937_v54  ;;  %v1825_v22 = vrot.slane %v1813_v25, 1  ;;  %v4312_v1 = vsel %vm1228_vm13, %v1436_v21, %v1438_v57  ;;  %v6066_v4 = vld [vmem:[#allocation76_spill] sm:$0xff] }
 0x185   :  { %v1310_v5 = vadd.f32 %v6061_v48, %v935_v0  ;;  %v1797_v36 = vadd.f32 %v4196_v6, %v1311_v63  ;;  %v636_v47 = vadd.f32 %v630_v33, %v6063_v14  ;;  %v4319_v2 = vstv %s4270_s8  ;;  %v6073_v33 = vld [vmem:[#allocation54_spill] sm:$0xff]  ;;  %s4803_s8 = sld [smem:[#allocation3 + $0x2b]] }
 0x186   :  { %v650_v10 = vmul.f32 %v4303_v50, %v6065_v9  ;;  %v1793_v59 = vadd.f32 %v1781_v3, %v1761_v31  ;;  %v2140_v0 = vadd.f32 %v2128_v20, %v2108_v28  ;;  %v1805_v54 = vmul.f32 %v6066_v4, %v3961_v30  ;;  %v6076_v20 = vld [vmem:[#allocation67_spill] sm:$0xff] }
 0x187   :  { %v4328_v32 = vsel %vm1228_vm13, %v4233_v19, %v4316_v60  ;;  %v4333_v14 = vadd.f32 %v4190_v38, %v1309_v46  ;;  %v4335_v6 = vadd.f32 %v976_v42, %v636_v47  ;;  %v4338_v13 = vstv %s4283_s9  ;;  %s4811_s9 = sld [smem:[#allocation3 + $0x60]] }
 0x188   :  { %6067 = vst [vmem:[#allocation78_spill] sm:$0xff] %v4328_v32  ;;  %v652_v31 = vmul.f32 %v4303_v50, %v3934_v45  ;;  %v4343_v25 = vadd.f32 %v4228_v40, %v1310_v5  ;;  %v4345_v63 = vadd.f32 %v1792_v17, %v1312_v11  ;;  %v4347_v19 = vadd.f32 %v1825_v22, %v1805_v54  ;;  %v6075_v17 = vld [vmem:[#allocation63_spill] sm:$0xff] }
 0x189   :  { %6068 = vst [vmem:[#allocation31_spill] sm:$0xff] %v4333_v14  ;;  %v996_v24 = vmul.f32 %v4319_v2, %v6073_v33  ;;  %v4352_v38 = vadd.f32 %v4247_v34, %v1797_v36  ;;  %v1314_v47 = vadd.f32 %v4216_v37, %v939_v12  ;;  %v662_v48 = vrot.slane %v650_v10, 1  ;;  %v4374_v12 = vpop.permute.xlu2 %1443 }
 0x18a   :  { %6069 = vst [vmem:[#allocation37_spill] sm:$0xff] %v4335_v6  ;;  %v998_v3 = vmul.f32 %v4319_v2, %v4003_v41  ;;  %v4360_v40 = vstv %s4290_s10  ;;  %v4363_v5 = vstv %s4298_s11  ;;  %v4366_v22 = vstv %s4305_s12  ;;  %v1442_v42 = vpop.permute.xlu1 %1441  ;;  %s4826_s10 = sld [smem:[#allocation3 + $0x2e]] }
 0x18b   :  { %6070 = vst [vmem:[#allocation34_spill] sm:$0xff] %v4343_v25  ;;  %v651_v28 = vmul.f32 %v4303_v50, %v6075_v17  ;;  %v642_v34 = vmul.f32 %v4338_v13, %v6065_v9  ;;  %v1857_v37 = vmul.f32 %v4366_v22, %v6076_v20  ;;  %v644_v44 = vmul.f32 %v4338_v13, %v3934_v45  ;;  %s4838_s11 = sld [smem:[#allocation3 + $0x5a]] }
 0x18c   :  { %6071 = vst [vmem:[#allocation46_spill] sm:$0xff] %v4345_v63  ;;  %v664_v46 = vrot.slane %v652_v31, 1  ;;  %v1313_v21 = vadd.f32 %v4226_v51, %v938_v52  ;;  %v1008_v11 = vrot.slane %v996_v24, 1  ;;  %v997_v36 = vmul.f32 %v4319_v2, %v4014_v18  ;;  %s4848_s12 = sld [smem:[#allocation3 + $0x29]] }
 0x18d   :  { %6072 = vst [vmem:[#allocation87_spill] sm:$0xff] %v4347_v19  ;;  %v4383_v10 = vsel %vm1228_vm13, %v1442_v42, %v4374_v12  ;;  %v1800_v54 = vadd.f32 %v1794_v61, %v1314_v47  ;;  %v674_v32 = vadd.f32 %v662_v48, %v642_v34  ;;  %v988_v4 = vmul.f32 %v4360_v40, %v6073_v33  ;;  %v4387_v19 = vpop.permute.xlu0 %1439 }
 0x18e   :  { %6074 = vst [vmem:[#allocation88_spill] sm:$0xff] %v4352_v38  ;;  %v1010_v60 = vrot.slane %v998_v3, 1  ;;  %v4392_v31 = vstv %s4330_s13  ;;  %v663_v51 = vrot.slane %v651_v28, 1  ;;  %v4396_v52 = vsel %vm1228_vm13, %v1438_v57, %v4387_v19  ;;  %s4855_s13 = sld [smem:[#allocation3 + $0x2c]] }
 0x18f   :  { %v1858_v61 = vmul.f32 %v4366_v22, %v3989_v7  ;;  %v1869_v24 = vrot.slane %v1857_v37, 1  ;;  %v676_v47 = vadd.f32 %v664_v46, %v644_v44  ;;  %v990_v48 = vmul.f32 %v4360_v40, %v4003_v41 }
 0x190   :  { %v1859_v3 = vmul.f32 %v4366_v22, %v3961_v30  ;;  %v4408_v28 = vadd.f32 %v1793_v59, %v1313_v21  ;;  %v1020_v34 = vadd.f32 %v1008_v11, %v988_v4  ;;  %v643_v57 = vmul.f32 %v4338_v13, %v6075_v17 }
 0x191   :  { %v1009_v42 = vrot.slane %v997_v36, 1  ;;  %v1849_v37 = vmul.f32 %v4363_v5, %v6076_v20  ;;  %v1022_v44 = vadd.f32 %v1010_v60, %v990_v48  ;;  %v4417_v46 = vstv %s4357_s14  ;;  %v6082_v60 = vld [vmem:[#allocation50_spill] sm:$0xff]  ;;  %s4871_s14 = sld [smem:[#allocation3 + $0x2f]] }
 0x192   :  { %6077 = vst [vmem:[#allocation89_spill] sm:$0xff] %v4408_v28  ;;  %v2205_v63 = vmul.f32 %v4392_v31, %v4064_v55  ;;  %v680_v6 = vadd.f32 %v674_v32, %v6079_v35  ;;  %v675_v59 = vadd.f32 %v663_v51, %v643_v57  ;;  %v989_v4 = vmul.f32 %v4360_v40, %v4014_v18 }
 0x193   :  { %6078 = vst [vmem:[#allocation90_spill] sm:$0xff] %v4417_v46  ;;  %v1870_v21 = vrot.slane %v1858_v61, 1  ;;  %v4426_v11 = vadd.f32 %v2140_v0, %v1800_v54  ;;  %v4428_v36 = vadd.f32 %v1869_v24, %v1849_v37  ;;  %v682_v48 = vadd.f32 %v676_v47, %v6082_v60  ;;  %v6085_v47 = vld [vmem:[#allocation49_spill] sm:$0xff] }
 0x194   :  { %v1871_v28 = vrot.slane %v1859_v3, 1  ;;  %v1026_v25 = vadd.f32 %v1020_v34, %v680_v6  ;;  %v1021_v14 = vadd.f32 %v1009_v42, %v989_v4  ;;  %v1850_v35 = vmul.f32 %v4363_v5, %v3989_v7 }
 0x195   :  { %6080 = vst [vmem:[#allocation47_spill] sm:$0xff] %v4426_v11  ;;  %v1851_v32 = vmul.f32 %v4363_v5, %v3961_v30  ;;  %v4437_v51 = vadd.f32 %v1022_v44, %v682_v48  ;;  %v2197_v0 = vmul.f32 %v4417_v46, %v4064_v55  ;;  %v2217_v54 = vrot.slane %v2205_v63, 1  ;;  %v4441_v61 = vpop.permute.xlu0 %1445 }
 0x196   :  { %6081 = vst [vmem:[#allocation91_spill] sm:$0xff] %v4428_v36  ;;  %v4444_v6 = vstv %s4389_s15  ;;  %v4447_v24 = vadd.f32 %v4312_v1, %v1026_v25  ;;  %v681_v3 = vadd.f32 %v675_v59, %v6085_v47  ;;  %v4450_v34 = vadd.f32 %v1870_v21, %v1850_v35  ;;  %v1510_v1 = vpop.permute.xlu1 %1509  ;;  %v6090_v59 = vld [vmem:[#allocation52_spill] sm:$0xff]  ;;  %s3250_s15 = smov 112  }
 0x197   :  { %6083 = vst [vmem:[#allocation50_spill] sm:$0xff] %v4444_v6  ;;  %v4454_v57 = vmul.f32 %v4363_v5, %v4091_v53  ;;  %v4456_v42 = vadd.f32 %v1871_v28, %v1851_v32  ;;  %v4460_v63 = vmul.f32 %v4366_v22, %v4091_v53  ;;  %v4463_v37 = vstv %s4400_s16  ;;  %v6093_v35 = vld [vmem:[#allocation64_spill] sm:$0xff]  ;;  %s4930_s16 = sld [smem:[#allocation3 + $0xd]] }
 0x198   :  { %6084 = vst [vmem:[#allocation92_spill] sm:$0xff] %v4447_v24  ;;  %v4466_v44 = vstv %s4406_s17  ;;  %v4468_v25 = vadd.f32 %v1021_v14, %v681_v3  ;;  %v645_v4 = vmul.f32 %v4338_v13, %v6090_v59  ;;  %v4473_v21 = vstv %s4412_s0  ;;  %v1512_v14 = vpop.permute.xlu2 %1511  ;;  %v6099_v24 = vld [vmem:[#allocation27_spill] sm:$0xff]  ;;  %s4944_s17 = sld [smem:[#allocation3 + $0x3e]] }
 0x199   :  { %6086 = vst [vmem:[#allocation49_spill] sm:$0xff] %v4450_v34  ;;  %v696_v28 = vmul.f32 %v4444_v6, %v6065_v9  ;;  %v4477_v60 = vadd.f32 %v2217_v54, %v2197_v0  ;;  %v653_v48 = vmul.f32 %v4303_v50, %v6090_v59  ;;  %v4483_v32 = vmul.f32 %v4360_v40, %v6093_v35  ;;  %s5004_s0 = sld [smem:[#allocation3 + $0x30]] }
 0x19a   :  { %6087 = vst [vmem:[#allocation93_spill] sm:$0xff] %v4460_v63  ;;  %v1042_v47 = vmul.f32 %v4466_v44, %v6073_v33  ;;  %v4488_v3 = vstv %s4424_s1  ;;  %v688_v62 = vmul.f32 %v4463_v37, %v6065_v9  ;;  %v1521_v0 = vsel %vm1228_vm13, %v1510_v1, %v1512_v14  ;;  %s5012_s1 = sld [smem:[#allocation3 + $0x61]] }
 0x19b   :  { %6088 = vst [vmem:[#allocation94_spill] sm:$0xff] %v4463_v37  ;;  %v708_v39 = vrot.slane %v696_v28, 1  ;;  %v1034_v11 = vmul.f32 %v4473_v21, %v6073_v33  ;;  %v1903_v26 = vmul.f32 %v4488_v3, %v6076_v20  ;;  %v999_v38 = vmul.f32 %v4319_v2, %v6093_v35 }
 0x19c   :  { %6089 = vst [vmem:[#allocation95_spill] sm:$0xff] %v4466_v44  ;;  %v1054_v16 = vrot.slane %v1042_v47, 1  ;;  %v647_v29 = vmul.f32 %v4338_v13, %v6095_v27  ;;  %v1895_v1 = vmul.f32 %v4503_v8, %v6076_v20  ;;  %v697_v47 = vmul.f32 %v4444_v6, %v6075_v17 }
 0x19d   :  { %6091 = vst [vmem:[#allocation96_spill] sm:$0xff] %v4473_v21  ;;  %v720_v28 = vadd.f32 %v708_v39, %v688_v62  ;;  %v1915_v54 = vrot.slane %v1903_v26, 1  ;;  %v4507_v30 = vpop.permute.xlu0 %1513  ;;  %v665_v41 = vrot.slane %v653_v48, 1  ;;  %v655_v45 = vmul.f32 %v4303_v50, %v6095_v27 }
 0x19e   :  { %6092 = vst [vmem:[#allocation97_spill] sm:$0xff] %v4477_v60  ;;  %v1066_v55 = vadd.f32 %v1054_v16, %v1034_v11  ;;  %v6098_v60 = vld [vmem:[#allocation24_spill] sm:$0xff]  ;;  %v689_v36 = vmul.f32 %v4463_v37, %v6075_v17  ;;  %v709_v16 = vrot.slane %v697_v47, 1  ;;  %v1043_v62 = vmul.f32 %v4466_v44, %v4014_v18 }
 0x19f   :  { %6094 = vst [vmem:[#allocation98_spill] sm:$0xff] %v4488_v3  ;;  %v726_v34 = vadd.f32 %v720_v28, %v6098_v60  ;;  %v1927_v39 = vadd.f32 %v1915_v54, %v1895_v1  ;;  %v1522_v26 = vsel %vm1228_vm13, %v1512_v14, %v4507_v30  ;;  %v993_v11 = vmul.f32 %v4360_v40, %v4050_v15 }
 0x1a0   :  { %6097 = vst [vmem:[#allocation100_spill] sm:$0xff] %v4507_v30  ;;  %v1001_v48 = vmul.f32 %v4319_v2, %v4050_v15  ;;  %v646_v60 = vmul.f32 %v4338_v13, %v3978_v58  ;;  %v721_v27 = vadd.f32 %v709_v16, %v689_v36  ;;  %v1035_v54 = vmul.f32 %v4473_v21, %v4014_v18 }
 0x1a1   :  { %v1072_v28 = vadd.f32 %v1066_v55, %v726_v34  ;;  %v1055_v1 = vrot.slane %v1043_v62, 1  ;;  %v1904_v47 = vmul.f32 %v4488_v3, %v3989_v7  ;;  %v1011_v17 = vrot.slane %v999_v38, 1  ;;  %v1516_v38 = vpop.permute.xlu1 %1515 }
 0x1a2   :  { %v667_v14 = vrot.slane %v655_v45, 1  ;;  %v1896_v20 = vmul.f32 %v4503_v8, %v3989_v7  ;;  %v727_v15 = vadd.f32 %v721_v27, %v6099_v24  ;;  %v1906_v55 = vmul.f32 %v4488_v3, %v4091_v53 }
 0x1a3   :  { %v1531_v30 = vadd.f32 %v1521_v0, %v1072_v28  ;;  %v1067_v46 = vadd.f32 %v1055_v1, %v1035_v54  ;;  %v1916_v63 = vrot.slane %v1904_v47, 1  ;;  %v677_v13 = vadd.f32 %v665_v41, %v645_v4  ;;  %v1518_v54 = vpop.permute.xlu2 %1517 }
 0x1a4   :  { %v1013_v36 = vrot.slane %v1001_v48, 1  ;;  %v1898_v16 = vmul.f32 %v4503_v8, %v4091_v53  ;;  %v1918_v62 = vrot.slane %v1906_v55, 1  ;;  %v699_v28 = vmul.f32 %v4444_v6, %v6090_v59 }
 0x1a5   :  { %v4535_v34 = vadd.f32 %v1927_v39, %v1531_v30  ;;  %v1073_v45 = vadd.f32 %v1067_v46, %v727_v15  ;;  %v1928_v0 = vadd.f32 %v1916_v63, %v1896_v20  ;;  %v679_v27 = vadd.f32 %v667_v14, %v647_v29  ;;  %v4559_v14 = vpop.permute.xlu0 %1519 }
 0x1a6   :  { %v654_v24 = vmul.f32 %v4303_v50, %v3978_v58  ;;  %v691_v41 = vmul.f32 %v4463_v37, %v6090_v59  ;;  %v1045_v30 = vmul.f32 %v4466_v44, %v6093_v35  ;;  %v1930_v39 = vadd.f32 %v1918_v62, %v1898_v16  ;;  %6102 = vst [vmem:[#allocation101_spill] sm:$0xff] %v4559_v14 }
 0x1a7   :  { %6100 = vst [vmem:[#allocation24_spill] sm:$0xff] %v4535_v34  ;;  %v1532_v4 = vadd.f32 %v1522_v26, %v1073_v45  ;;  %v711_v48 = vrot.slane %v699_v28, 1  ;;  %v1523_v15 = vsel %vm1228_vm13, %v1516_v38, %v1518_v54  ;;  %v992_v20 = vmul.f32 %v4360_v40, %v4073_v49  ;;  %v6103_v38 = vld [vmem:[#allocation57_spill] sm:$0xff] }
 0x1a8   :  { %v1000_v29 = vmul.f32 %v4319_v2, %v4073_v49  ;;  %v1037_v50 = vmul.f32 %v4473_v21, %v6093_v35  ;;  %v1057_v46 = vrot.slane %v1045_v30, 1  ;;  %v1459_v63 = vadd.f32 %v4387_v19, %v4437_v51  ;;  %v6104_v51 = vld [vmem:[#allocation25_spill] sm:$0xff] }
 0x1a9   :  { %v1023_v1 = vadd.f32 %v1011_v17, %v4483_v32  ;;  %v4557_v26 = vadd.f32 %v1928_v0, %v1532_v4  ;;  %v723_v47 = vadd.f32 %v711_v48, %v691_v41  ;;  %v1458_v40 = vadd.f32 %v4396_v52, %v4468_v25 }
 0x1aa   :  { %v666_v2 = vrot.slane %v654_v24, 1  ;;  %v1069_v55 = vadd.f32 %v1057_v46, %v1037_v50  ;;  %v700_v16 = vmul.f32 %v4444_v6, %v3978_v58  ;;  %v685_v45 = vadd.f32 %v679_v27, %v6103_v38  ;;  %v6105_v24 = vld [vmem:[#allocation48_spill] sm:$0xff] }
 0x1ab   :  { %6101 = vst [vmem:[#allocation27_spill] sm:$0xff] %v4557_v26  ;;  %v1025_v19 = vadd.f32 %v1013_v36, %v993_v11  ;;  %v729_v17 = vadd.f32 %v723_v47, %v6104_v51  ;;  %v1046_v32 = vmul.f32 %v4466_v44, %v4073_v49  ;;  %v1012_v0 = vrot.slane %v1000_v29, 1  ;;  %v6131_v26 = vld [vmem:[#allocation61_spill] sm:$0xff] }
 0x1ac   :  { %v692_v62 = vmul.f32 %v4463_v37, %v3978_v58  ;;  %v712_v52 = vrot.slane %v700_v16, 1  ;;  %v1524_v25 = vsel %vm1228_vm13, %v1518_v54, %v4559_v14  ;;  %v1862_v28 = vmul.f32 %v4366_v22, %v4055_v43 }
 0x1ad   :  { %v1075_v27 = vadd.f32 %v1069_v55, %v729_v17  ;;  %v1038_v11 = vmul.f32 %v4473_v21, %v4073_v49  ;;  %v1058_v36 = vrot.slane %v1046_v32, 1  ;;  %v683_v41 = vadd.f32 %v677_v13, %v6105_v24  ;;  %v6106_v55 = vld [vmem:[#allocation28_spill] sm:$0xff] }
 0x1ae   :  { %v678_v30 = vadd.f32 %v666_v2, %v646_v60  ;;  %v724_v4 = vadd.f32 %v712_v52, %v692_v62  ;;  %v1907_v48 = vmul.f32 %v4488_v3, %v4182_v23  ;;  %v1031_v29 = vadd.f32 %v1025_v19, %v685_v45 }
 0x1af   :  { %v1861_v54 = vmul.f32 %v4366_v22, %v4182_v23  ;;  %v1534_v50 = vadd.f32 %v1523_v15, %v1075_v27  ;;  %v1070_v46 = vadd.f32 %v1058_v36, %v1038_v11  ;;  %v1024_v47 = vadd.f32 %v1012_v0, %v992_v20  ;;  %v6108_v15 = vld [vmem:[#allocation53_spill] sm:$0xff] }
 0x1b0   :  { %v730_v16 = vadd.f32 %v724_v4, %v6106_v55  ;;  %v1899_v13 = vmul.f32 %v4503_v8, %v4182_v23  ;;  %v1919_v60 = vrot.slane %v1907_v48, 1  ;;  %v1874_v2 = vrot.slane %v1862_v28, 1  ;;  %v6110_v4 = vld [vmem:[#allocation93_spill] sm:$0xff] }
 0x1b1   :  { %v2208_v38 = vmul.f32 %v4392_v31, %v4214_v56  ;;  %v4593_v45 = vadd.f32 %v1930_v39, %v1534_v50  ;;  %v4596_v19 = vstv %s4561_s21  ;;  %v1029_v22 = vadd.f32 %v1023_v1, %v683_v41  ;;  %v6113_v50 = vld [vmem:[#allocation92_spill] sm:$0xff]  ;;  %s5258_s21 = sld [smem:[#allocation3 + $0x44]] }
 0x1b2   :  { %v684_v20 = vadd.f32 %v678_v30, %v6108_v15  ;;  %v1076_v51 = vadd.f32 %v1070_v46, %v730_v16  ;;  %v1931_v17 = vadd.f32 %v1919_v60, %v1899_v13  ;;  %v1450_v32 = vsel %vm1228_vm13, %v4374_v12, %v4441_v61  ;;  %v6114_v46 = vld [vmem:[#allocation91_spill] sm:$0xff]  ;;  %v6118_v60 = vld [vmem:[#allocation97_spill] sm:$0xff] }
 0x1b3   :  { %6107 = vst [vmem:[#allocation57_spill] sm:$0xff] %v4593_v45  ;;  %v1462_v0 = vadd.f32 %v4441_v61, %v1031_v29  ;;  %v1854_v62 = vmul.f32 %v4363_v5, %v4055_v43  ;;  %v4608_v39 = vstv %s4571_s22  ;;  %v1873_v1 = vrot.slane %v1861_v54, 1  ;;  %s5274_s22 = sld [smem:[#allocation3 + $0x45]] }
 0x1b4   :  { %v1030_v52 = vadd.f32 %v1024_v47, %v684_v20  ;;  %v1535_v28 = vadd.f32 %v1524_v25, %v1076_v51  ;;  %v742_v27 = vmul.f32 %v4596_v19, %v6065_v9  ;;  %v1889_v11 = vadd.f32 %v4456_v42, %v1459_v63  ;;  %v6121_v20 = vld [vmem:[#allocation62_spill] sm:$0xff] }
 0x1b5   :  { %v1460_v12 = vadd.f32 %v4383_v10, %v1029_v22  ;;  %v1886_v36 = vadd.f32 %v1874_v2, %v1854_v62  ;;  %v2220_v61 = vrot.slane %v2208_v38, 1  ;;  %v1853_v41 = vmul.f32 %v4363_v5, %v4182_v23  ;;  %v6112_v10 = vld [vmem:[#allocation90_spill] sm:$0xff]  ;;  %v6116_v5 = vld [vmem:[#allocation49_spill] sm:$0xff]  ;;  %v1586_v62 = vpop.permute.xlu2 %1585 }
 0x1b6   :  { %v1461_v24 = vadd.f32 %v1450_v32, %v1030_v52  ;;  %v4620_v30 = vadd.f32 %v1931_v17, %v1535_v28  ;;  %v1088_v25 = vmul.f32 %v4608_v39, %v6073_v33  ;;  %v6111_v48 = vrot.slane %v6110_v4, 1  ;;  %v6127_v4 = vld [vmem:[#allocation30_spill] sm:$0xff] }
 0x1b7   :  { %v1892_v63 = vadd.f32 %v1886_v36, %v1462_v0  ;;  %v2200_v29 = vmul.f32 %v6112_v10, %v4214_v56  ;;  %v4630_v54 = vstv %s4586_s23  ;;  %v4634_v47 = vadd.f32 %v6114_v46, %v6113_v50  ;;  %s5285_s23 = sld [smem:[#allocation3 + $0x13]] }
 0x1b8   :  { %6109 = vst [vmem:[#allocation25_spill] sm:$0xff] %v4620_v30  ;;  %v1884_v42 = vadd.f32 %v6111_v48, %v4454_v57  ;;  %v4637_v55 = vadd.f32 %v6116_v5, %v1458_v40  ;;  %v1885_v16 = vadd.f32 %v1873_v1, %v1853_v41  ;;  %v754_v13 = vrot.slane %v742_v27, 1  ;;  %v1584_v1 = vpop.permute.xlu1 %1583  ;;  %v6128_v48 = vld [vmem:[#allocation45_spill] sm:$0xff]  ;;  %v6133_v30 = vld [vmem:[#allocation51_spill] sm:$0xff] }
 0x1b9   :  { %6115 = vst [vmem:[#allocation48_spill] sm:$0xff] %v4634_v47  ;;  %v4640_v2 = vadd.f32 %v6118_v60, %v1889_v11  ;;  %v2232_v38 = vadd.f32 %v2220_v61, %v2200_v29  ;;  %v4645_v22 = vstv %s4598_s25  ;;  %v4653_v40 = vmul.f32 %v4444_v6, %v6121_v20  ;;  %v6125_v61 = vld [vmem:[#allocation73_spill] sm:$0xff]  ;;  %s5291_s25 = sld [smem:[#allocation3 + $0x14]] }
 0x1ba   :  { %6117 = vst [vmem:[#allocation28_spill] sm:$0xff] %v4637_v55  ;;  %v4642_v57 = vadd.f32 %v1884_v42, %v1460_v12  ;;  %v4649_v15 = vadd.f32 %v1885_v16, %v1461_v24  ;;  %v734_v51 = vmul.f32 %v4630_v54, %v6065_v9  ;;  %v1100_v17 = vrot.slane %v1088_v25, 1  ;;  %v6124_v12 = vld [vmem:[#allocation67_spill] sm:$0xff] }
 0x1bb   :  { %6122 = vst [vmem:[#allocation90_spill] sm:$0xff] %v4653_v40  ;;  %v4659_v32 = vadd.f32 %v2232_v38, %v1892_v63  ;;  %v4663_v0 = vmul.f32 %v4463_v37, %v6121_v20  ;;  %v4666_v52 = vstv %s4610_s26  ;;  %v744_v28 = vmul.f32 %v4596_v19, %v6121_v20  ;;  %v6129_v63 = vld [vmem:[#allocation63_spill] sm:$0xff]  ;;  %v6130_v38 = vld [vmem:[#allocation16_spill] sm:$0xff]  ;;  %s5311_s26 = sld [smem:[#allocation3 + $0x52]] }
 0x1bc   :  { %6119 = vst [vmem:[#allocation53_spill] sm:$0xff] %v4642_v57  ;;  %v766_v27 = vadd.f32 %v754_v13, %v734_v51  ;;  %v1080_v11 = vmul.f32 %v4645_v22, %v6073_v33  ;;  %v1949_v36 = vmul.f32 %v4666_v52, %v6124_v12  ;;  %v1090_v24 = vmul.f32 %v4608_v39, %v6125_v61 }
 0x1bd   :  { %6120 = vst [vmem:[#allocation93_spill] sm:$0xff] %v4649_v15  ;;  %v4678_v41 = vmul.f32 %v4466_v44, %v6125_v61  ;;  %v4681_v25 = vstv %s4616_s24  ;;  %v406_v42 = vmul.f32 %v6128_v48, %v6127_v4  ;;  %v743_v29 = vmul.f32 %v4596_v19, %v6129_v63  ;;  %s5320_s24 = sld [smem:[#allocation3 + $0x53]] }
 0x1be   :  { %6123 = vst [vmem:[#allocation92_spill] sm:$0xff] %v4663_v0  ;;  %v1112_v46 = vadd.f32 %v1100_v17, %v1080_v11  ;;  %v1595_v5 = vsel %vm1228_vm13, %v1584_v1, %v1586_v62  ;;  %v1941_v16 = vmul.f32 %v4681_v25, %v6124_v12  ;;  %v736_v13 = vmul.f32 %v4630_v54, %v6121_v20 }
 0x1bf   :  { %6126 = vst [vmem:[#allocation91_spill] sm:$0xff] %v4678_v41  ;;  %v756_v60 = vrot.slane %v744_v28, 1  ;;  %v405_v51 = vmul.f32 %v6128_v48, %v6130_v38  ;;  %v1089_v45 = vmul.f32 %v4608_v39, %v4014_v18  ;;  %v772_v34 = vadd.f32 %v766_v27, %v6131_v26 }
 0x1c0   :  { %v1961_v50 = vrot.slane %v1949_v36, 1  ;;  %v1082_v17 = vmul.f32 %v4645_v22, %v6125_v61  ;;  %v1102_v1 = vrot.slane %v1090_v24, 1  ;;  %v4701_v11 = vstv %s4647_s27  ;;  %v1588_v36 = vpop.permute.xlu0 %1587  ;;  %s3117_s27 = sld [smem:[#allocation3 + $0x21]] }
 0x1c1   :  { %6132 = vst [vmem:[#allocation49_spill] sm:$0xff] %v4701_v11  ;;  %v398_v14 = vmul.f32 %v6133_v30, %v6127_v4  ;;  %v418_v37 = vrot.slane %v406_v42, 1  ;;  %v755_v28 = vrot.slane %v743_v29, 1  ;;  %v1118_v44 = vadd.f32 %v1112_v46, %v772_v34  ;;  %v6135_v29 = vld [vmem:[#allocation66_spill] sm:$0xff]  ;;  %v4716_v46 = vpop.permute.xlu2 %1591 }
 0x1c2   :  { %v4706_v6 = vstv %s4657_s28  ;;  %v397_v8 = vmul.f32 %v6133_v30, %v6130_v38  ;;  %v1950_v26 = vmul.f32 %v4666_v52, %v3989_v7  ;;  %v768_v27 = vadd.f32 %v756_v60, %v736_v13  ;;  %v6136_v13 = vld [vmem:[#allocation81_spill] sm:$0xff]  ;;  %s3131_s28 = sld [smem:[#allocation3 + $0x22]] }
 0x1c3   :  { %6134 = vst [vmem:[#allocation97_spill] sm:$0xff] %v4706_v6  ;;  %v417_v3 = vrot.slane %v405_v51, 1  ;;  %v735_v24 = vmul.f32 %v4630_v54, %v6129_v63  ;;  %v1101_v21 = vrot.slane %v1089_v45, 1  ;;  %v1605_v40 = vadd.f32 %v1595_v5, %v1118_v44 }
 0x1c4   :  { %v1973_v0 = vadd.f32 %v1961_v50, %v1941_v16  ;;  %v1114_v42 = vadd.f32 %v1102_v1, %v1082_v17  ;;  %v1951_v34 = vmul.f32 %v4666_v52, %v6135_v29  ;;  %v430_v41 = vadd.f32 %v418_v37, %v398_v14  ;;  %v6137_v37 = vld [vmem:[#allocation19_spill] sm:$0xff] }
 0x1c5   :  { %v767_v55 = vadd.f32 %v755_v28, %v735_v24  ;;  %v1081_v57 = vmul.f32 %v4645_v22, %v4014_v18  ;;  %v2297_v60 = vmul.f32 %v4706_v6, %v6136_v13  ;;  %v1596_v51 = vsel %vm1228_vm13, %v1586_v62, %v1588_v36 }
 0x1c6   :  { %v1942_v44 = vmul.f32 %v4681_v25, %v3989_v7  ;;  %v1962_v45 = vrot.slane %v1950_v26, 1  ;;  %v745_v50 = vmul.f32 %v4596_v19, %v6090_v59  ;;  %v429_v5 = vadd.f32 %v417_v3, %v397_v8 }
 0x1c7   :  { %v774_v16 = vadd.f32 %v768_v27, %v430_v41  ;;  %v1113_v17 = vadd.f32 %v1101_v21, %v1081_v57  ;;  %v407_v14 = vmul.f32 %v6128_v48, %v6137_v37  ;;  %v4729_v1 = vadd.f32 %v1973_v0, %v1605_v40 }
 0x1c8   :  { %v1943_v28 = vmul.f32 %v4681_v25, %v6135_v29  ;;  %v1963_v24 = vrot.slane %v1951_v34, 1  ;;  %v1091_v62 = vmul.f32 %v4608_v39, %v6093_v35  ;;  %v773_v47 = vadd.f32 %v767_v55, %v429_v5 }
 0x1c9   :  { %6138 = vst [vmem:[#allocation62_spill] sm:$0xff] %v4729_v1  ;;  %v1120_v26 = vadd.f32 %v1114_v42, %v774_v16  ;;  %v2289_v15 = vmul.f32 %v4701_v11, %v6136_v13  ;;  %v2309_v8 = vrot.slane %v2297_v60, 1  ;;  %v1974_v3 = vadd.f32 %v1962_v45, %v1942_v44  ;;  %v1590_v42 = vpop.permute.xlu1 %1589  ;;  %v6139_v44 = vld [vmem:[#allocation65_spill] sm:$0xff] }
 0x1ca   :  { %v399_v21 = vmul.f32 %v6133_v30, %v6137_v37  ;;  %v1944_v57 = vmul.f32 %v4681_v25, %v4091_v53  ;;  %v757_v40 = vrot.slane %v745_v50, 1  ;;  %v1119_v0 = vadd.f32 %v1113_v17, %v773_v47  ;;  %v6140_v37 = vld [vmem:[#allocation26_spill] sm:$0xff]  ;;  %v6141_v47 = vld [vmem:[#allocation33_spill] sm:$0xff] }
 0x1cb   :  { %v1607_v41 = vadd.f32 %v1588_v36, %v1120_v26  ;;  %v419_v27 = vrot.slane %v407_v14, 1  ;;  %v1952_v34 = vmul.f32 %v4666_v52, %v4091_v53  ;;  %v1975_v55 = vadd.f32 %v1963_v24, %v1943_v28  ;;  %v6142_v28 = vld [vmem:[#allocation79_spill] sm:$0xff] }
 0x1cc   :  { %v737_v5 = vmul.f32 %v4630_v54, %v6090_v59  ;;  %v1103_v60 = vrot.slane %v1091_v62, 1  ;;  %v747_v45 = vmul.f32 %v4596_v19, %v6139_v44  ;;  %v1606_v16 = vadd.f32 %v1596_v51, %v1119_v0  ;;  %v4757_v62 = vpop.permute.xlu0 %1593 }
 0x1cd   :  { %v2321_v1 = vadd.f32 %v2309_v8, %v2289_v15  ;;  %v408_v50 = vmul.f32 %v6128_v48, %v6140_v37  ;;  %v409_v36 = vmul.f32 %v6128_v48, %v6141_v47  ;;  %v1083_v14 = vmul.f32 %v4645_v22, %v6093_v35 }
 0x1ce   :  { %v769_v17 = vadd.f32 %v757_v40, %v737_v5  ;;  %v1093_v24 = vmul.f32 %v4608_v39, %v6142_v28  ;;  %v746_v15 = vmul.f32 %v4596_v19, %v3978_v58  ;;  %v1981_v51 = vadd.f32 %v1975_v55, %v1607_v41  ;;  %v4765_v40 = vpop.permute.xlu2 %2390  ;;  %v6143_v5 = vld [vmem:[#allocation29_spill] sm:$0xff] }
 0x1cf   :  { %v431_v26 = vadd.f32 %v419_v27, %v399_v21  ;;  %v1964_v8 = vrot.slane %v1952_v34, 1  ;;  %v1597_v48 = vsel %vm1228_vm13, %v1590_v42, %v4716_v46  ;;  %v1115_v0 = vadd.f32 %v1103_v60, %v1083_v14 }
 0x1d0   :  { %vm2379_vm8 = vcmp.le.s32.totalorder %v6143_v5, 12  ;;  %v739_v35 = vmul.f32 %v4630_v54, %v6139_v44  ;;  %v759_v59 = vrot.slane %v747_v45, 1  ;;  %v401_v19 = vmul.f32 %v6133_v30, %v6141_v47  ;;  %v6153_v5 = vld [vmem:[#allocation15_spill] sm:$0xff] }
 0x1d1   :  { %v420_v41 = vrot.slane %v408_v50, 1  ;;  %v421_v21 = vrot.slane %v409_v36, 1  ;;  %v1092_v27 = vmul.f32 %v4608_v39, %v4073_v49  ;;  %v4778_v34 = vadd.f32 %v1974_v3, %v1606_v16 }
 0x1d2   :  { %v775_v55 = vadd.f32 %v769_v17, %v431_v26  ;;  %v1105_v42 = vrot.slane %v1093_v24, 1  ;;  %v758_v60 = vrot.slane %v746_v15, 1  ;;  %v4782_v45 = vadd.f32 %v2321_v1, %v1981_v51 }
 0x1d3   :  { %6144 = vst [vmem:[#allocation30_spill] sm:$0xff] %v4778_v34  ;;  %v4784_v14 = vadd.f32 %v1964_v8, %v1944_v57  ;;  %v4789_v50 = vsel %vm2379_vm8, %v4765_v40, 0.0  ;;  %v400_v39 = vmul.f32 %v6133_v30, %v6140_v37  ;;  %v771_v16 = vadd.f32 %v759_v59, %v739_v35 }
 0x1d4   :  { %6146 = vst [vmem:[#allocation61_spill] sm:$0xff] %v4789_v50  ;;  %v1121_v3 = vadd.f32 %v1115_v0, %v775_v55  ;;  %v1085_v1 = vmul.f32 %v4645_v22, %v6142_v28  ;;  %v738_v57 = vmul.f32 %v4630_v54, %v3978_v58  ;;  %v433_v17 = vadd.f32 %v421_v21, %v401_v19  ;;  %v4842_v55 = vpop.permute.xlu1 %2388 }
 0x1d5   :  { %6145 = vst [vmem:[#allocation45_spill] sm:$0xff] %v4784_v14  ;;  %v432_v36 = vadd.f32 %v420_v41, %v400_v39  ;;  %v1084_v24 = vmul.f32 %v4645_v22, %v4073_v49  ;;  %v1104_v15 = vrot.slane %v1092_v27, 1  ;;  %v4806_v26 = vstv %s4751_s30  ;;  %v4836_v41 = vpop.permute.xlu0 %2046  ;;  %s3252_s30 = smov 96  }
 0x1d6   :  { %v1117_v30 = vadd.f32 %v1105_v42, %v1085_v1  ;;  %v770_v51 = vadd.f32 %v758_v60, %v738_v57  ;;  %v4809_v59 = vstv %s4761_s3  ;;  %v4813_v35 = vadd.f32 %v1597_v48, %v1121_v3  ;;  %v4844_v42 = vpop.permute.xlu2 %2386  ;;  %s3040_s3 = sld [smem:[#allocation3 + $0x31]] }
 0x1d7   :  { %v4818_v54 = vsel %vm1228_vm13, %v4716_v46, %v4757_v62  ;;  %v4822_v22 = vmul.f32 %v4666_v52, %v4182_v23  ;;  %v2551_v8 = vmul.f32 %v4809_v59, %v4789_v50  ;;  %v777_v0 = vadd.f32 %v771_v16, %v433_v17 }
 0x1d8   :  { %6147 = vst [vmem:[#allocation51_spill] sm:$0xff] %v4813_v35  ;;  %v4830_v48 = vmul.f32 %v4681_v25, %v4182_v23  ;;  %v1946_v19 = vmul.f32 %v4681_v25, %v4055_v43  ;;  %v1954_v46 = vmul.f32 %v4666_v52, %v4055_v43  ;;  %v1116_v21 = vadd.f32 %v1104_v15, %v1084_v24  ;;  %v6149_v23 = vld [vmem:[#allocation14_spill] sm:$0xff] }
 0x1d9   :  { %v2300_v27 = vmul.f32 %v4706_v6, %v4214_v56  ;;  %v2543_v25 = vmul.f32 %v4806_v26, %v4789_v50  ;;  %v2563_v60 = vrot.slane %v2551_v8, 1  ;;  %v1123_v52 = vadd.f32 %v1117_v30, %v777_v0 }
 0x1da   :  { %v776_v39 = vadd.f32 %v770_v51, %v432_v36  ;;  %v2292_v3 = vmul.f32 %v4701_v11, %v4214_v56  ;;  %v4853_v16 = vstv %s4780_s6  ;;  %v4859_v17 = vstv %s4776_s5  ;;  %s206_s5 = sld [smem:[#allocation3]] }
 0x1db   :  { %v2575_v57 = vadd.f32 %v2563_v60, %v2543_v25  ;;  %v790_v24 = vmul.f32 %v4853_v16, %v6121_v20  ;;  %v1966_v15 = vrot.slane %v1954_v46, 1  ;;  %v446_v36 = vmul.f32 %v4859_v17, %v6127_v4  ;;  %s3053_s6 = sld [smem:[#allocation3 + $0x1]] }
 0x1dc   :  { %v4866_v30 = vstv %s4793_s7  ;;  %v4869_v51 = vstv %s4799_s29  ;;  %v2312_v8 = vrot.slane %v2300_v27, 1  ;;  %v1122_v60 = vadd.f32 %v1116_v21, %v776_v39  ;;  %s3253_s7 = smov 64   ;;  %s5426_s29 = sld [smem:[#allocation3 + $0x33]] }
 0x1dd   :  { %v2581_v0 = vadd.f32 %v2575_v57, %v4640_v2  ;;  %v1136_v25 = vmul.f32 %v4866_v30, %v6125_v61  ;;  %v1610_v46 = vadd.f32 %v4757_v62, %v1123_v52  ;;  %v4878_v1 = vstv %s4803_s8  ;;  %s5468_s8 = sld [smem:[#allocation3 + $0x2]] }
 0x1de   :  { %v4881_v56 = vstv %s4811_s9  ;;  %vm2378_vm11 = vcmp.le.s32.totalorder %v6149_v23, 12  ;;  %v4886_v2 = vstv %s4770_s4  ;;  %v782_v27 = vmul.f32 %v4878_v1, %v6121_v20  ;;  %s3054_s4 = sld [smem:[#allocation3 + $0x32]] }
 0x1df   :  { %6148 = vst [vmem:[#allocation29_spill] sm:$0xff] %v4881_v56  ;;  %2764 = vrot.lane.b32.xlu2 %v2581_v0, %s3250_s15  ;;  %v802_v21 = vrot.slane %v790_v24, 1  ;;  %v1997_v62 = vmul.f32 %v4869_v51, %v6135_v29  ;;  %v1978_v52 = vadd.f32 %v1966_v15, %v1946_v19  ;;  %v438_v39 = vmul.f32 %v4886_v2, %v6127_v4  ;;  %v4915_v15 = vpop.permute.xlu0 %2394  ;;  %s5515_s9 = sld [smem:[#allocation3 + $0x35]] }
 0x1e0   :  { %v458_v57 = vrot.slane %v446_v36, 1  ;;  %v4895_v49 = vstv %s4838_s11  ;;  %v1148_v34 = vrot.slane %v1136_v25, 1  ;;  %v4898_v58 = vstv %s4826_s10  ;;  %v2397_v25 = vpop.permute.xlu1 %2396  ;;  %s5528_s10 = sld [smem:[#allocation3 + $0x4]] }
 0x1e1   :  { %v2343_v0 = vmul.f32 %v4881_v56, %v6136_v13  ;;  %v4903_v6 = vstv %s4848_s12  ;;  %v2324_v20 = vadd.f32 %v2312_v8, %v2292_v3  ;;  %v4908_v19 = vsel %vm2398_vm10, %v4842_v55, %v4765_v40  ;;  %v4919_v3 = vpop.permute.xlu2 %1661  ;;  %s5622_s11 = sld [smem:[#allocation3 + $0x36]] }
 0x1e2   :  { %6150 = vst [vmem:[#allocation14_spill] sm:$0xff] %v4908_v19  ;;  %v4911_v24 = vstv %s4855_s13  ;;  %v2643_v4 = vmul.f32 %v4895_v49, %v4789_v50  ;;  %v1984_v36 = vadd.f32 %v1978_v52, %v1610_v46  ;;  %v814_v11 = vadd.f32 %v802_v21, %v782_v27  ;;  %s5634_s12 = sld [smem:[#allocation3 + $0x37]] }
 0x1e3   :  { %v1128_v56 = vmul.f32 %v4911_v24, %v6125_v61  ;;  %v2009_v53 = vrot.slane %v1997_v62, 1  ;;  %v1989_v40 = vmul.f32 %v4898_v58, %v6135_v29  ;;  %v4924_v8 = vstv %s4871_s14  ;;  %s5641_s13 = sld [smem:[#allocation3 + $0x5]] }
 0x1e4   :  { %6151 = vst [vmem:[#allocation102_spill] sm:$0xff] %v4924_v8  ;;  %v2635_v37 = vmul.f32 %v4903_v6, %v4789_v50  ;;  %v2655_v19 = vrot.slane %v2643_v4, 1  ;;  %v470_v14 = vadd.f32 %v458_v57, %v438_v39  ;;  %v2355_v46 = vrot.slane %v2343_v0, 1  ;;  %s5650_s14 = sld [smem:[#allocation3 + $0x6]] }
 0x1e5   :  { %v1160_v35 = vadd.f32 %v1148_v34, %v1128_v56  ;;  %v2402_v27 = vsel %vm2398_vm10, %v4915_v15, %v2397_v25  ;;  %v4933_v21 = vadd.f32 %v4818_v54, %v1122_v60  ;;  %v4938_v62 = vsel %vm2398_vm10, %v4844_v42, %v4842_v55 }
 0x1e6   :  { %v4942_v52 = vsel %vm2379_vm8, %v2397_v25, 0.0  ;;  %v2667_v39 = vadd.f32 %v2655_v19, %v2635_v37  ;;  %v4946_v56 = vadd.f32 %v2324_v20, %v1984_v36  ;;  %v820_v34 = vadd.f32 %v814_v11, %v470_v14 }
 0x1e7   :  { %6152 = vst [vmem:[#allocation103_spill] sm:$0xff] %v4942_v52  ;;  %v4948_v57 = vadd.f32 %v2009_v53, %v1989_v40  ;;  %v2335_v54 = vmul.f32 %v4924_v8, %v6136_v13  ;;  %v4955_v55 = vsel %vm2378_vm11, %v2402_v27, 0.0  ;;  %v436_v42 = vmul.f32 %v4886_v2, %v6153_v5 }
 0x1e8   :  { %v2673_v60 = vadd.f32 %v2667_v39, %v4782_v45  ;;  %v444_v37 = vmul.f32 %v4859_v17, %v6153_v5  ;;  %v1166_v0 = vadd.f32 %v1160_v35, %v820_v34  ;;  %v4965_v53 = vmul.f32 %v4878_v1, %v6129_v63 }
 0x1e9   :  { %v4961_v20 = vadd.f32 %v2355_v46, %v2335_v54  ;;  %v788_v11 = vmul.f32 %v4853_v16, %v6065_v9  ;;  %v4972_v45 = vmul.f32 %v4853_v16, %v6129_v63  ;;  %v4976_v14 = vmul.f32 %v4911_v24, %v4014_v18  ;;  %v4992_v54 = vpop.permute.xlu1 %1659  ;;  %v1658_v63 = vpop.permute.xlu2 %1657 }
 0x1ea   :  { %2829 = vrot.lane.b32.xlu2 %v2673_v60, %s3250_s15  ;;  %v456_v35 = vrot.slane %v444_v37, 1  ;;  %v1134_v19 = vmul.f32 %v4866_v30, %v6073_v33  ;;  %v4982_v4 = vmul.f32 %v4866_v30, %v4014_v18  ;;  %v780_v36 = vmul.f32 %v4878_v1, %v6065_v9 }
 0x1eb   :  { %v800_v25 = vrot.slane %v788_v11, 1  ;;  %v1995_v40 = vmul.f32 %v4869_v51, %v6124_v12  ;;  %v1126_v27 = vmul.f32 %v4911_v24, %v6073_v33  ;;  %v2554_v34 = vmul.f32 %v4809_v59, %v4942_v52 }
 0x1ec   :  { %v468_v46 = vadd.f32 %v456_v35, %v436_v42  ;;  %v1146_v39 = vrot.slane %v1134_v19, 1  ;;  %v1987_v37 = vmul.f32 %v4898_v58, %v6124_v12  ;;  %v2546_v11 = vmul.f32 %v4806_v26, %v4942_v52 }
 0x1ed   :  { %v812_v60 = vadd.f32 %v800_v25, %v780_v36  ;;  %v2007_v18 = vrot.slane %v1995_v40, 1  ;;  %v2566_v42 = vrot.slane %v2554_v34, 1  ;;  %v4999_v35 = vstv %s4930_s16 }
 0x1ee   :  { %v1158_v9 = vadd.f32 %v1146_v39, %v1126_v27  ;;  %v5002_v33 = vstv %s4944_s17  ;;  %v5008_v19 = vmul.f32 %v4869_v51, %v3989_v7  ;;  %v1669_v27 = vsel %vm1228_vm13, %v1658_v63, %v4992_v54 }
 0x1ef   :  { %v818_v36 = vadd.f32 %v812_v60, %v468_v46  ;;  %v2019_v25 = vadd.f32 %v2007_v18, %v1987_v37  ;;  %v2459_v40 = vmul.f32 %v5002_v33, %v4789_v50  ;;  %v2578_v39 = vadd.f32 %v2566_v42, %v2546_v11 }
 0x1f0   :  { %v441_v34 = vmul.f32 %v4886_v2, %v6141_v47  ;;  %v449_v12 = vmul.f32 %v4859_v17, %v6141_v47  ;;  %v1681_v5 = vadd.f32 %v4919_v3, %v1166_v0  ;;  %v2451_v18 = vmul.f32 %v4999_v35, %v4789_v50 }
 0x1f1   :  { %v1164_v29 = vadd.f32 %v1158_v9, %v818_v36  ;;  %v2471_v46 = vrot.slane %v2459_v40, 1  ;;  %v2584_v60 = vadd.f32 %v2578_v39, %v4659_v32  ;;  %v785_v63 = vmul.f32 %v4878_v1, %v6139_v44  ;;  %v6154_v40 = vld [vmem:[#allocation13_spill] sm:$0xff]  ;;  %v2393_v39 = vpop.permute.xlu0 %2392 }
 0x1f2   :  { %v461_v37 = vrot.slane %v449_v12, 1  ;;  %v793_v11 = vmul.f32 %v4853_v16, %v6139_v44  ;;  %v801_v42 = vrot.slane %v4972_v45, 1  ;;  %v1139_v9 = vmul.f32 %v4866_v30, %v6142_v28 }
 0x1f3   :  { %v1679_v61 = vadd.f32 %v1669_v27, %v1164_v29  ;;  %v2483_v47 = vadd.f32 %v2471_v46, %v2451_v18  ;;  %v445_v0 = vmul.f32 %v4859_v17, %v6130_v38  ;;  %2770 = vrot.lane.b32.xlu1 %v2584_v60, %s3250_s15  ;;  %v2000_v36 = vmul.f32 %v4869_v51, %v4055_v43  ;;  %v6156_v29 = vld [vmem:[#allocation88_spill] sm:$0xff] }
 0x1f4   :  { %v473_v32 = vadd.f32 %v461_v37, %v441_v34  ;;  %v805_v12 = vrot.slane %v793_v11, 1  ;;  %vm2377_vm12 = vcmp.le.s32.totalorder %v6154_v40, 12  ;;  %v1131_v18 = vmul.f32 %v4911_v24, %v6142_v28 }
 0x1f5   :  { %v5037_v45 = vadd.f32 %v2019_v25, %v1679_v61  ;;  %v2489_v27 = vadd.f32 %v2483_v47, %v6156_v29  ;;  %v1151_v46 = vrot.slane %v1139_v9, 1  ;;  %v2027_v60 = vadd.f32 %v4948_v57, %v1681_v5  ;;  %v5055_v5 = vpop.permute.xlu1 %1667 }
 0x1f6   :  { %v817_v34 = vadd.f32 %v805_v12, %v785_v63  ;;  %v1992_v37 = vmul.f32 %v4898_v58, %v4055_v43  ;;  %v2012_v11 = vrot.slane %v2000_v36, 1  ;;  %v2646_v61 = vmul.f32 %v4895_v49, %v4942_v52 }
 0x1f7   :  { %6155 = vst [vmem:[#allocation13_spill] sm:$0xff] %v5037_v45  ;;  %2733 = vrot.lane.b32.xlu2 %v2489_v27, %s3250_s15  ;;  %v1163_v44 = vadd.f32 %v1151_v46, %v1131_v18  ;;  %v5049_v25 = vstv %s5004_s0  ;;  %v5052_v47 = vstv %s5012_s1  ;;  %v1147_v29 = vrot.slane %v4982_v4, 1  ;;  %v6159_v27 = vld [vmem:[#allocation43_spill] sm:$0xff]  ;;  %s3027_s1 = sshll.u32 %s5802_s2, 4  ;;  %s3028_s1 = int_to_ptr.hbm [resolvable:$true] %s3027_s1 }
 0x1f8   :  { %6157 = vst [vmem:[#allocation88_spill] sm:$0xff] %v5049_v25  ;;  %v457_v9 = vrot.slane %v445_v0, 1  ;;  %v823_v45 = vadd.f32 %v817_v34, %v473_v32  ;;  %v2024_v57 = vadd.f32 %v2012_v11, %v1992_v37  ;;  %v2638_v63 = vmul.f32 %v4903_v6, %v4942_v52 }
 0x1f9   :  { %6158 = vst [vmem:[#allocation104_spill] sm:$0xff] %v5052_v47  ;;  %v2658_v12 = vrot.slane %v2646_v61, 1  ;;  %v2689_v36 = vmul.f32 %v5052_v47, %v4789_v50  ;;  %v2207_v18 = vmul.f32 %v4392_v31, %v6159_v27  ;;  %v2373_v46 = vadd.f32 %v4961_v20, %v2027_v60 }
 0x1fa   :  { %v1169_v43 = vadd.f32 %v1163_v44, %v823_v45  ;;  %v2681_v4 = vmul.f32 %v5049_v25, %v4789_v50  ;;  %v2553_v0 = vmul.f32 %v4809_v59, %v4955_v55  ;;  %v2199_v37 = vmul.f32 %v6112_v10, %v6159_v27 }
 0x1fb   :  { %v2670_v32 = vadd.f32 %v2658_v12, %v2638_v63  ;;  %v2701_v34 = vrot.slane %v2689_v36, 1  ;;  %v2219_v11 = vrot.slane %v2207_v18, 1  ;;  %v437_v61 = vmul.f32 %v4886_v2, %v6130_v38  ;;  %v6161_v18 = vld [vmem:[#allocation59_spill] sm:$0xff] }
 0x1fc   :  { %v1684_v28 = vadd.f32 %v5055_v5, %v1169_v43  ;;  %v2545_v44 = vmul.f32 %v4806_v26, %v4955_v55  ;;  %v2565_v20 = vrot.slane %v2553_v0, 1  ;;  %v813_v45 = vadd.f32 %v801_v42, %v4965_v53 }
 0x1fd   :  { %v2676_v60 = vadd.f32 %v2670_v32, %v4946_v56  ;;  %v2713_v50 = vadd.f32 %v2701_v34, %v2681_v4  ;;  %v2231_v63 = vadd.f32 %v2219_v11, %v2199_v37  ;;  %v6160_v12 = vrot.slane %v4822_v22, 1  ;;  %v6163_v56 = vld [vmem:[#allocation93_spill] sm:$0xff]  ;;  %v5088_v4 = vpop.permute.xlu0 %1665  ;;  %v6164_v32 = vld [vmem:[#allocation51_spill] sm:$0xff]  ;;  %v6166_v34 = vld [vmem:[#allocation14_spill] sm:$0xff] }
 0x1fe   :  { %v2055_v38 = vsel %vm2052_vm9, %v4836_v41, %v6161_v18  ;;  %v5083_v13 = vadd.f32 %v2024_v57, %v1684_v28  ;;  %v2577_v43 = vadd.f32 %v2565_v20, %v2545_v44  ;;  %v1159_v25 = vadd.f32 %v1147_v29, %v4976_v14  ;;  %v6165_v22 = vld [vmem:[#allocation45_spill] sm:$0xff] }
 0x1ff   :  { %v1977_v36 = vadd.f32 %v6160_v12, %v4830_v48  ;;  %v469_v0 = vadd.f32 %v457_v9, %v437_v61  ;;  %2835 = vrot.lane.b32.xlu1 %v2676_v60, %s3250_s15  ;;  %v2719_v53 = vadd.f32 %v2713_v50, %v2373_v46  ;;  %v2237_v42 = vadd.f32 %v2231_v63, %v6163_v56  ;;  %v6171_v56 = vld [vmem:[#allocation47_spill] sm:$0xff] }
 0x200   :  { %6162 = vst [vmem:[#allocation43_spill] sm:$0xff] %v5083_v13  ;;  %v5092_v48 = vadd.f32 %v6165_v22, %v6164_v32  ;;  %v5097_v28 = vsel %vm2378_vm11, %v6166_v34, 0.0  ;;  %v5102_v41 = vsel %vm2377_vm12, %v4938_v62, 0.0  ;;  %v2401_v50 = vsel %vm2398_vm10, %v2393_v39, %v4915_v15  ;;  %v6172_v32 = vld [vmem:[#allocation48_spill] sm:$0xff] }
 0x201   :  { %v5107_v14 = vadd.f32 %v1977_v36, %v4933_v21  ;;  %v2008_v29 = vrot.slane %v5008_v19, 1  ;;  %v819_v9 = vadd.f32 %v813_v45, %v469_v0  ;;  %2894 = vrot.lane.b32.xlu2 %v2719_v53, %s3251_s20  ;;  %v2583_v23 = vadd.f32 %v2577_v43, %v2237_v42  ;;  %v6168_v21 = vld [vmem:[#allocation39_spill] sm:$0xff] }
 0x202   :  { %v5113_v57 = vsel %vm2031_vm7, %v2055_v38, 0.0  ;;  %v1670_v62 = vsel %vm1228_vm13, %v4992_v54, %v4919_v3  ;;  %v2462_v15 = vmul.f32 %v5002_v33, %v4942_v52  ;;  %v2203_v39 = vmul.f32 %v4392_v31, %v6168_v21  ;;  %v6170_v0 = vld [vmem:[#allocation19_spill] sm:$0xff] }
 0x203   :  { %6167 = vst [vmem:[#allocation59_spill] sm:$0xff] %v5113_v57  ;;  %v1988_v19 = vmul.f32 %v4898_v58, %v3989_v7  ;;  %v1165_v46 = vadd.f32 %v1159_v25, %v819_v9  ;;  %v5126_v37 = vsel %vm2377_vm12, %v2401_v50, 0.0  ;;  %2768 = vrot.lane.b32.xlu0 %v2583_v23, %s3250_s15  ;;  %v2454_v38 = vmul.f32 %v4999_v35, %v4942_v52 }
 0x204   :  { %6169 = vst [vmem:[#allocation93_spill] sm:$0xff] %v5126_v37  ;;  %v2474_v3 = vrot.slane %v2462_v15, 1  ;;  %v2195_v54 = vmul.f32 %v6112_v10, %v6168_v21  ;;  %v2215_v11 = vrot.slane %v2203_v39, 1  ;;  %v2549_v61 = vmul.f32 %v4809_v59, %v5102_v41 }
 0x205   :  { %v5135_v44 = vadd.f32 %v2008_v29, %v1988_v19  ;;  %v5137_v25 = vadd.f32 %v1670_v62, %v1165_v46  ;;  %v2541_v40 = vmul.f32 %v4806_v26, %v5102_v41  ;;  %v2206_v20 = vmul.f32 %v4392_v31, %v5113_v57  ;;  %v6173_v29 = vld [vmem:[#allocation26_spill] sm:$0xff]  ;;  %v1664_v39 = vpop.permute.xlu0 %1663 }
 0x206   :  { %v2486_v45 = vadd.f32 %v2474_v3, %v2454_v38  ;;  %v2227_v60 = vadd.f32 %v2215_v11, %v2195_v54  ;;  %v2561_v63 = vrot.slane %v2549_v61, 1  ;;  %v2552_v12 = vmul.f32 %v4809_v59, %v5126_v37  ;;  %v6174_v38 = vld [vmem:[#allocation32_spill] sm:$0xff]  ;;  %v6175_v11 = vld [vmem:[#allocation53_spill] sm:$0xff] }
 0x207   :  { %v2198_v36 = vmul.f32 %v6112_v10, %v5113_v57  ;;  %v2218_v18 = vrot.slane %v2206_v20, 1  ;;  %v2544_v43 = vmul.f32 %v4806_v26, %v5126_v37  ;;  %v447_v53 = vmul.f32 %v4859_v17, %v6170_v0 }
 0x208   :  { %v2492_v42 = vadd.f32 %v2486_v45, %v6171_v56  ;;  %v2233_v22 = vadd.f32 %v2227_v60, %v6172_v32  ;;  %v2573_v34 = vadd.f32 %v2561_v63, %v2541_v40  ;;  %v2564_v50 = vrot.slane %v2552_v12, 1  ;;  %v6176_v40 = vld [vmem:[#allocation52_spill] sm:$0xff]  ;;  %v6178_v56 = vld [vmem:[#allocation49_spill] sm:$0xff] }
 0x209   :  { %v5155_v9 = vmul.f32 %v4859_v17, %v6173_v29  ;;  %v2230_v23 = vadd.f32 %v2218_v18, %v2198_v36  ;;  %v439_v62 = vmul.f32 %v4886_v2, %v6170_v0  ;;  %v459_v15 = vrot.slane %v447_v53, 1  ;;  %v6177_v63 = vld [vmem:[#allocation64_spill] sm:$0xff]  ;;  %v6179_v32 = vld [vmem:[#allocation97_spill] sm:$0xff] }
 0x20a   :  { %2739 = vrot.lane.b32.xlu1 %v2492_v42, %s3250_s15  ;;  %v2579_v19 = vadd.f32 %v2573_v34, %v2233_v22  ;;  %v2576_v46 = vadd.f32 %v2564_v50, %v2544_v43  ;;  %v1990_v3 = vmul.f32 %v4898_v58, %v6174_v38  ;;  %v1998_v54 = vmul.f32 %v4869_v51, %v6174_v38 }
 0x20b   :  { %v2236_v61 = vadd.f32 %v2230_v23, %v6175_v11  ;;  %v471_v17 = vadd.f32 %v459_v15, %v439_v62  ;;  %v783_v20 = vmul.f32 %v4878_v1, %v6176_v40  ;;  %v791_v45 = vmul.f32 %v4853_v16, %v6176_v40 }
 0x20c   :  { %2760 = vrot.lane.b32.xlu2 %v2579_v19, %s3250_s15  ;;  %v2010_v60 = vrot.slane %v1998_v54, 1  ;;  %v1129_v12 = vmul.f32 %v4911_v24, %v6177_v63  ;;  %v1137_v36 = vmul.f32 %v4866_v30, %v6177_v63  ;;  %v1671_v18 = vsel %vm1228_vm13, %v1664_v39, %v5088_v4  ;;  %v6180_v19 = vld [vmem:[#allocation35_spill] sm:$0xff] }
 0x20d   :  { %v2582_v43 = vadd.f32 %v2576_v46, %v2236_v61  ;;  %v803_v53 = vrot.slane %v791_v45, 1  ;;  %v2287_v42 = vmul.f32 %v6178_v56, %v6168_v21  ;;  %v2295_v22 = vmul.f32 %v6179_v32, %v6168_v21 }
 0x20e   :  { %v2022_v34 = vadd.f32 %v2010_v60, %v1990_v3  ;;  %v1149_v50 = vrot.slane %v1137_v36, 1  ;;  %v2633_v23 = vmul.f32 %v4903_v6, %v5102_v41  ;;  %v2641_v62 = vmul.f32 %v4895_v49, %v5102_v41 }
 0x20f   :  { %2766 = vrot.lane.b32.xlu0 %v2582_v43, %s3250_s15  ;;  %v815_v15 = vadd.f32 %v803_v53, %v783_v20  ;;  %v2307_v39 = vrot.slane %v2295_v22, 1  ;;  %v2196_v46 = vmul.f32 %v6112_v10, %v6180_v19  ;;  %v2204_v54 = vmul.f32 %v4392_v31, %v6180_v19  ;;  %v6181_v22 = vld [vmem:[#allocation62_spill] sm:$0xff] }
 0x210   :  { %v1161_v11 = vadd.f32 %v1149_v50, %v1129_v12  ;;  %v2653_v61 = vrot.slane %v2641_v62, 1  ;;  %v2542_v3 = vmul.f32 %v4806_v26, %v5097_v28  ;;  %v2550_v45 = vmul.f32 %v4809_v59, %v5097_v28 }
 0x211   :  { %v821_v60 = vadd.f32 %v815_v15, %v471_v17  ;;  %v2319_v36 = vadd.f32 %v2307_v39, %v2287_v42  ;;  %v2216_v13 = vrot.slane %v2204_v54, 1  ;;  %v2299_v20 = vmul.f32 %v6179_v32, %v6159_v27  ;;  %v6182_v15 = vld [vmem:[#allocation36_spill] sm:$0xff] }
 0x212   :  { %v2665_v43 = vadd.f32 %v2653_v61, %v2633_v23  ;;  %v2562_v53 = vrot.slane %v2550_v45, 1  ;;  %v2291_v10 = vmul.f32 %v6178_v56, %v6159_v27  ;;  %v2645_v31 = vmul.f32 %v4895_v49, %v4955_v55  ;;  %v6183_v61 = vld [vmem:[#allocation28_spill] sm:$0xff] }
 0x213   :  { %v1167_v12 = vadd.f32 %v1161_v11, %v821_v60  ;;  %v2325_v26 = vadd.f32 %v2319_v36, %v6181_v22  ;;  %v2228_v50 = vadd.f32 %v2216_v13, %v2196_v46  ;;  %v2311_v62 = vrot.slane %v2299_v20, 1  ;;  %v6184_v11 = vld [vmem:[#allocation38_spill] sm:$0xff]  ;;  %v6185_v46 = vld [vmem:[#allocation69_spill] sm:$0xff] }
 0x214   :  { %v2574_v59 = vadd.f32 %v2562_v53, %v2542_v3  ;;  %v2637_v17 = vmul.f32 %v4903_v6, %v4955_v55  ;;  %v2657_v42 = vrot.slane %v2645_v31, 1  ;;  %v2111_v23 = vmul.f32 %v6182_v15, %v6168_v21 }
 0x215   :  { %v1682_v39 = vadd.f32 %v1671_v18, %v1167_v12  ;;  %v2671_v54 = vadd.f32 %v2665_v43, %v2325_v26  ;;  %v2234_v45 = vadd.f32 %v2228_v50, %v6183_v61  ;;  %v2323_v38 = vadd.f32 %v2311_v62, %v2291_v10 }
 0x216   :  { %v2669_v7 = vadd.f32 %v2657_v42, %v2637_v17  ;;  %v2103_v60 = vmul.f32 %v6184_v11, %v6168_v21  ;;  %v2123_v36 = vrot.slane %v2111_v23, 1  ;;  %v2457_v13 = vmul.f32 %v5002_v33, %v5102_v41 }
 0x217   :  { %v792_v3 = vmul.f32 %v4853_v16, %v6185_v46  ;;  %v5211_v20 = vadd.f32 %v2022_v34, %v1682_v39  ;;  %2825 = vrot.lane.b32.xlu2 %v2671_v54, %s3250_s15  ;;  %v2580_v18 = vadd.f32 %v2574_v59, %v2234_v45  ;;  %v2329_v43 = vadd.f32 %v2323_v38, %v5107_v14  ;;  %v6187_v38 = vld [vmem:[#allocation31_spill] sm:$0xff] }
 0x218   :  { %v2135_v53 = vadd.f32 %v2123_v36, %v2103_v60  ;;  %v2449_v10 = vmul.f32 %v4999_v35, %v5102_v41  ;;  %v2469_v31 = vrot.slane %v2457_v13, 1  ;;  %v2296_v12 = vmul.f32 %v6179_v32, %v6180_v19 }
 0x219   :  { %6186 = vst [vmem:[#allocation51_spill] sm:$0xff] %v5211_v20  ;;  %2762 = vrot.lane.b32.xlu1 %v2580_v18, %s3250_s15  ;;  %v2675_v22 = vadd.f32 %v2669_v7, %v2329_v43  ;;  %v2288_v16 = vmul.f32 %v6178_v56, %v6180_v19  ;;  %v2642_v34 = vmul.f32 %v4895_v49, %v5097_v28  ;;  %v6188_v18 = vld [vmem:[#allocation30_spill] sm:$0xff]  ;;  %vm2741_vm9 = vcmask 916480  }
 0x21a   :  { %v2298_v14 = vmul.f32 %v6179_v32, %v5113_v57  ;;  %v2141_v26 = vadd.f32 %v2135_v53, %v6187_v38  ;;  %v2481_v50 = vadd.f32 %v2469_v31, %v2449_v10  ;;  %v2308_v62 = vrot.slane %v2296_v12, 1  ;;  %v6189_v10 = vld [vmem:[#allocation82_spill] sm:$0xff] }
 0x21b   :  { %v2634_v59 = vmul.f32 %v4903_v6, %v5097_v28  ;;  %2833 = vrot.lane.b32.xlu0 %v2675_v22, %s3250_s15  ;;  %v2654_v17 = vrot.slane %v2642_v34, 1  ;;  %v2290_v7 = vmul.f32 %v6178_v56, %v5113_v57  ;;  %v2644_v23 = vmul.f32 %v4895_v49, %v5126_v37 }
 0x21c   :  { %v2310_v42 = vrot.slane %v2298_v14, 1  ;;  %v2487_v39 = vadd.f32 %v2481_v50, %v2141_v26  ;;  %v2320_v54 = vadd.f32 %v2308_v62, %v2288_v16  ;;  %v2636_v32 = vmul.f32 %v4903_v6, %v5126_v37  ;;  %v6190_v50 = vld [vmem:[#allocation29_spill] sm:$0xff] }
 0x21d   :  { %v2112_v61 = vmul.f32 %v6182_v15, %v6180_v19  ;;  %v2666_v45 = vadd.f32 %v2654_v17, %v2634_v59  ;;  %v2656_v36 = vrot.slane %v2644_v23, 1  ;;  %v2458_v13 = vmul.f32 %v5002_v33, %v5097_v28 }
 0x21e   :  { %v2322_v60 = vadd.f32 %v2310_v42, %v2290_v7  ;;  %v5242_v56 = vadd.f32 %v5135_v44, %v5137_v25  ;;  %v440_v49 = vmul.f32 %v4886_v2, %v6173_v29  ;;  %v2326_v43 = vadd.f32 %v2320_v54, %v6188_v18 }
 0x21f   :  { %v2115_v6 = vmul.f32 %v6182_v15, %v6159_v27  ;;  %v804_v53 = vrot.slane %v792_v3, 1  ;;  %v1138_v31 = vmul.f32 %v4866_v30, %v6189_v10  ;;  %2729 = vrot.lane.b32.xlu2 %v2487_v39, %s3250_s15  ;;  %v2668_v22 = vadd.f32 %v2656_v36, %v2636_v32 }
 0x220   :  { %v2328_v12 = vadd.f32 %v2322_v60, %v5092_v48  ;;  %v2672_v16 = vadd.f32 %v2666_v45, %v2326_v43  ;;  %v2124_v44 = vrot.slane %v2112_v61, 1  ;;  %v2470_v25 = vrot.slane %v2458_v13, 1  ;;  %v6191_v60 = vld [vmem:[#allocation21_spill] sm:$0xff]  ;;  %v6192_v13 = vld [vmem:[#allocation34_spill] sm:$0xff] }
 0x221   :  { %v2461_v2 = vmul.f32 %v5002_v33, %v4955_v55  ;;  %v460_v34 = vrot.slane %v5155_v9, 1  ;;  %v784_v14 = vmul.f32 %v4878_v1, %v6185_v46  ;;  %v2127_v38 = vrot.slane %v2115_v6, 1  ;;  %v6193_v6 = vld [vmem:[#allocation89_spill] sm:$0xff] }
 0x222   :  { %v2674_v3 = vadd.f32 %v2668_v22, %v2328_v12  ;;  %2827 = vrot.lane.b32.xlu1 %v2672_v16, %s3250_s15  ;;  %v2104_v30 = vmul.f32 %v6184_v11, %v6180_v19  ;;  %v2450_v48 = vmul.f32 %v4999_v35, %v5097_v28  ;;  %v2342_v62 = vmul.f32 %v6190_v50, %v6180_v19 }
 0x223   :  { %v2473_v26 = vrot.slane %v2461_v2, 1  ;;  %v1150_v9 = vrot.slane %v1138_v31, 1  ;;  %v2107_v1 = vmul.f32 %v6184_v11, %v6159_v27  ;;  %v2453_v59 = vmul.f32 %v4999_v35, %v4955_v55 }
 0x224   :  { %2831 = vrot.lane.b32.xlu0 %v2674_v3, %s3250_s15  ;;  %v2114_v17 = vmul.f32 %v6182_v15, %v5113_v57  ;;  %v816_v7 = vadd.f32 %v804_v53, %v784_v14  ;;  %v1130_v42 = vmul.f32 %v4911_v24, %v6189_v10  ;;  %v2136_v23 = vadd.f32 %v2124_v44, %v2104_v30 }
 0x225   :  { %v2482_v39 = vadd.f32 %v2470_v25, %v2450_v48  ;;  %v472_v54 = vadd.f32 %v460_v34, %v440_v49  ;;  %v2139_v32 = vadd.f32 %v2127_v38, %v2107_v1  ;;  %v2485_v61 = vadd.f32 %v2473_v26, %v2453_v59  ;;  %v6194_v48 = vld [vmem:[#allocation88_spill] sm:$0xff]  ;;  %v6196_v1 = vld [vmem:[#allocation61_spill] sm:$0xff] }
 0x226   :  { %v2460_v45 = vmul.f32 %v5002_v33, %v5126_v37  ;;  %v1999_v36 = vmul.f32 %v4869_v51, %v6191_v60  ;;  %v2142_v18 = vadd.f32 %v2136_v23, %v6192_v13  ;;  %v2354_v15 = vrot.slane %v2342_v62, 1  ;;  %v6195_v62 = vld [vmem:[#allocation81_spill] sm:$0xff] }
 0x227   :  { %v2688_v43 = vmul.f32 %v5052_v47, %v5097_v28  ;;  %v1162_v24 = vadd.f32 %v1150_v9, %v1130_v42  ;;  %v1672_v49 = vsel %vm1228_vm13, %v5088_v4, %v5055_v5  ;;  %v2145_v53 = vadd.f32 %v2139_v32, %v6193_v6  ;;  %v6199_v42 = vld [vmem:[#allocation91_spill] sm:$0xff]  ;;  %v6201_v32 = vld [vmem:[#allocation90_spill] sm:$0xff] }
 0x228   :  { %v2126_v33 = vrot.slane %v2114_v17, 1  ;;  %v822_v51 = vadd.f32 %v816_v7, %v472_v54  ;;  %v1991_v31 = vmul.f32 %v4898_v58, %v6191_v60  ;;  %v2488_v12 = vadd.f32 %v2482_v39, %v2142_v18  ;;  %v6198_v17 = vld [vmem:[#allocation85_spill] sm:$0xff] }
 0x229   :  { %v2334_v22 = vmul.f32 %v4924_v8, %v6180_v19  ;;  %v2491_v16 = vadd.f32 %v2485_v61, %v2145_v53  ;;  %v2106_v44 = vmul.f32 %v6184_v11, %v5113_v57  ;;  %v2472_v25 = vrot.slane %v2460_v45, 1 }
 0x22a   :  { %v5300_v5 = vstv %s5258_s21  ;;  %v2011_v4 = vrot.slane %v1999_v36, 1  ;;  %2731 = vrot.lane.b32.xlu1 %v2488_v12, %s3250_s15  ;;  %v2700_v34 = vrot.slane %v2688_v43, 1  ;;  %v2345_v58 = vmul.f32 %v6190_v50, %v6159_v27 }
 0x22b   :  { %v2366_v2 = vadd.f32 %v2354_v15, %v2334_v22  ;;  %v1168_v14 = vadd.f32 %v1162_v24, %v822_v51  ;;  %v2138_v3 = vadd.f32 %v2126_v33, %v2106_v44  ;;  %v2452_v38 = vmul.f32 %v4999_v35, %v5126_v37  ;;  %v6197_v35 = vld [vmem:[#allocation37_spill] sm:$0xff]  ;;  %v6203_v15 = vld [vmem:[#allocation46_spill] sm:$0xff]  ;;  %v6205_v51 = vld [vmem:[#allocation96_spill] sm:$0xff] }
 0x22c   :  { %2737 = vrot.lane.b32.xlu0 %v2491_v16, %s3250_s15  ;;  %v5309_v30 = vstv %s5274_s22  ;;  %v2680_v26 = vmul.f32 %v6194_v48, %v5097_v28  ;;  %v2159_v9 = vmul.f32 %v5300_v5, %v6195_v62  ;;  %v1385_v7 = vadd.f32 %v6198_v17, %v6197_v35  ;;  %v6204_v33 = vld [vmem:[#allocation73_spill] sm:$0xff]  ;;  %v6206_v44 = vld [vmem:[#allocation60_spill] sm:$0xff]  ;;  %v6211_v35 = vld [vmem:[#allocation98_spill] sm:$0xff] }
 0x22d   :  { %v2372_v11 = vadd.f32 %v2366_v2, %v5242_v56  ;;  %v2505_v59 = vmul.f32 %v5309_v30, %v6196_v1  ;;  %v1056_v23 = vrot.slane %v6199_v42, 1  ;;  %v1683_v39 = vadd.f32 %v1672_v49, %v1168_v14  ;;  %v6200_v56 = vld [vmem:[#allocation92_spill] sm:$0xff]  ;;  %v6209_v14 = vld [vmem:[#allocation87_spill] sm:$0xff] }
 0x22e   :  { %v2484_v54 = vadd.f32 %v2472_v25, %v2452_v38  ;;  %v6202_v61 = vrot.slane %v6201_v32, 1  ;;  %v2023_v36 = vadd.f32 %v2011_v4, %v1991_v31  ;;  %v2712_v13 = vadd.f32 %v2700_v34, %v2680_v26  ;;  %v6207_v25 = vld [vmem:[#allocation56_spill] sm:$0xff] }
 0x22f   :  { %v2357_v18 = vrot.slane %v2345_v58, 1  ;;  %v2144_v43 = vadd.f32 %v2138_v3, %v6203_v15  ;;  %v2691_v24 = vmul.f32 %v5052_v47, %v4955_v55  ;;  %v5332_v6 = vstv %s5285_s23 }
 0x230   :  { %v722_v45 = vadd.f32 %v6202_v61, %v6200_v56  ;;  %v5335_v53 = vstv %s5291_s25  ;;  %v1036_v49 = vmul.f32 %v6205_v51, %v6204_v33  ;;  %v2718_v12 = vadd.f32 %v2712_v13, %v2372_v11  ;;  %v6212_v33 = vld [vmem:[#allocation100_spill] sm:$0xff] }
 0x231   :  { %v2171_v22 = vrot.slane %v2159_v9, 1  ;;  %v2517_v16 = vrot.slane %v2505_v59, 1  ;;  %v6208_v31 = vrot.slane %v6207_v25, 1  ;;  %v2029_v2 = vadd.f32 %v2023_v36, %v1683_v39  ;;  %v6210_v59 = vld [vmem:[#allocation66_spill] sm:$0xff] }
 0x232   :  { %v2490_v34 = vadd.f32 %v2484_v54, %v2144_v43  ;;  %v2337_v58 = vmul.f32 %v4924_v8, %v6159_v27  ;;  %v1843_v3 = vadd.f32 %v6209_v14, %v1385_v7  ;;  %v1068_v38 = vadd.f32 %v1056_v23, %v1036_v49  ;;  %2892 = vrot.lane.b32.xlu1 %v2718_v12, %s3251_s20  ;;  %v6213_v12 = vld [vmem:[#allocation99_spill] sm:$0xff] }
 0x233   :  { %v390_v4 = vadd.f32 %v6208_v31, %v6206_v44  ;;  %v2151_v11 = vmul.f32 %v5332_v6, %v6195_v62  ;;  %v2497_v26 = vmul.f32 %v5335_v53, %v6196_v1  ;;  %v1905_v17 = vmul.f32 %v6211_v35, %v6210_v59 }
 0x234   :  { %2735 = vrot.lane.b32.xlu0 %v2490_v34, %s3250_s15  ;;  %v2369_v42 = vadd.f32 %v2357_v18, %v2337_v58  ;;  %v2703_v39 = vrot.slane %v2691_v24, 1  ;;  %v5354_v23 = vstv %s5311_s26  ;;  %v5357_v56 = vstv %s5320_s24  ;;  %s3254_s15 = smov [#allocation7]  }
 0x235   :  { %v728_v9 = vadd.f32 %v722_v45, %v390_v4  ;;  %v2183_v54 = vadd.f32 %v2171_v22, %v2151_v11  ;;  %v2529_v7 = vadd.f32 %v2517_v16, %v2497_v26  ;;  %v2683_v61 = vmul.f32 %v6194_v48, %v4955_v55  ;;  %s3025_s16 = sshll.u32 %s3254_s15, 4  ;;  %s3026_s16 = int_to_ptr.vmem [resolvable:$true] %s3025_s16 }
 0x236   :  { %v2375_v32 = vadd.f32 %v2369_v42, %v2029_v2  ;;  %v1917_v45 = vrot.slane %v1905_v17, 1  ;;  %v2251_v43 = vmul.f32 %v5354_v23, %v6195_v62  ;;  %v2597_v18 = vmul.f32 %v5357_v56, %v6196_v1 }
 0x237   :  { %v1074_v36 = vadd.f32 %v1068_v38, %v728_v9  ;;  %v2189_v13 = vadd.f32 %v2183_v54, %v1843_v3  ;;  %v2715_v15 = vadd.f32 %v2703_v39, %v2683_v61  ;;  %v1897_v22 = vmul.f32 %v6213_v12, %v6210_v59 }
 0x238   :  { %v5371_v31 = vstv %s3117_s27  ;;  %v5373_v4 = vstv %s3131_s28  ;;  %v2263_v34 = vrot.slane %v2251_v43, 1  ;;  %v2609_v58 = vrot.slane %v2597_v18, 1  ;;  %v6221_v18 = vld [vmem:[#allocation33_spill] sm:$0xff] }
 0x239   :  { %v2535_v24 = vadd.f32 %v2529_v7, %v2189_v13  ;;  %v1533_v49 = vadd.f32 %v6212_v33, %v1074_v36  ;;  %v2721_v16 = vadd.f32 %v2715_v15, %v2375_v32  ;;  %v5368_v44 = vpop.permute.xlu2 %2764  ;;  %v1929_v2 = vadd.f32 %v1917_v45, %v1897_v22  ;;  %v6217_v32 = vld [vmem:[#allocation41_spill] sm:$0xff]  ;;  %v6219_v13 = vld [vmem:[#allocation44_spill] sm:$0xff] }
 0x23a   :  { %6214 = vst [vmem:[#allocation45_spill] sm:$0xff] %v5368_v44  ;;  %v2243_v3 = vmul.f32 %v5371_v31, %v6195_v62  ;;  %v2589_v38 = vmul.f32 %v5373_v4, %v6196_v1  ;;  %v213_v42 = vstv %s3040_s3  ;;  %v5384_v54 = vstv %s3054_s4  ;;  %v6216_v62 = vld [vmem:[#allocation15_spill] sm:$0xff]  ;;  %v6218_v36 = vld [vmem:[#allocation65_spill] sm:$0xff]  ;;  %v6220_v15 = vld [vmem:[#allocation16_spill] sm:$0xff] }
 0x23b   :  { %v2784_v25 = vadd.f32 %v5368_v44, %v2535_v24  ;;  %v1935_v14 = vadd.f32 %v1929_v2, %v1533_v49  ;;  %v214_v7 = vmul.f32 %v213_v42, %v6216_v62  ;;  %v207_v1 = vstv %s206_s5  ;;  %v6222_v24 = vld [vmem:[#allocation18_spill] sm:$0xff]  ;;  %v6223_v49 = vld [vmem:[#allocation79_spill] sm:$0xff]  ;;  %v6224_v22 = vld [vmem:[#allocation68_spill] sm:$0xff] }
 0x23c   :  { %2898 = vrot.lane.b32.xlu0 %v2721_v16, %s3251_s20  ;;  %v2275_v11 = vadd.f32 %v2263_v34, %v2243_v3  ;;  %v2621_v26 = vadd.f32 %v2609_v58, %v2589_v38  ;;  %v524_v61 = vmul.f32 %v5384_v54, %v6217_v32  ;;  %v609_v45 = vmul.f32 %v6219_v13, %v6218_v36  ;;  %v6225_v38 = vld [vmem:[#allocation55_spill] sm:$0xff] }
 0x23d   :  { %2798 = vrot.lane.b32.xlu2 %v2784_v25, %s3252_s30  ;;  %v215_v43 = vmul.f32 %v213_v42, %v6220_v15  ;;  %v289_v33 = vmul.f32 %v6222_v24, %v6221_v18  ;;  %v955_v16 = vmul.f32 %v6224_v22, %v6223_v49  ;;  %v208_v25 = vmul.f32 %v207_v1, %v6216_v62 }
 0x23e   :  { %v2281_v9 = vadd.f32 %v2275_v11, %v1935_v14  ;;  %v222_v2 = vrot.slane %v214_v7, 1  ;;  %v5398_v34 = vstv %s3053_s6  ;;  %v216_v58 = vmul.f32 %v213_v42, %v6170_v0  ;;  %v6226_v7 = vld [vmem:[#allocation17_spill] sm:$0xff] }
 0x23f   :  { %v532_v14 = vrot.slane %v524_v61, 1  ;;  %v288_v3 = vmul.f32 %v6222_v24, %v6173_v29  ;;  %v601_v11 = vmul.f32 %v6225_v38, %v6218_v36  ;;  %v518_v62 = vmul.f32 %v5398_v34, %v6217_v32 }
 0x240   :  { %v2627_v59 = vadd.f32 %v2621_v26, %v2281_v9  ;;  %v621_v26 = vrot.slane %v609_v45, 1  ;;  %v209_v9 = vmul.f32 %v207_v1, %v6220_v15  ;;  %v281_v20 = vmul.f32 %v6226_v7, %v6221_v18  ;;  %v6227_v45 = vld [vmem:[#allocation50_spill] sm:$0xff] }
 0x241   :  { %v301_v48 = vrot.slane %v289_v33, 1  ;;  %v967_v61 = vrot.slane %v955_v16, 1  ;;  %v224_v47 = vrot.slane %v216_v58, 1  ;;  %v5412_v24 = vmul.f32 %v213_v42, %v6173_v29  ;;  %v6229_v16 = vld [vmem:[#allocation23_spill] sm:$0xff] }
 0x242   :  { %v701_v44 = vmul.f32 %v6227_v45, %v6218_v36  ;;  %v540_v15 = vadd.f32 %v532_v14, %v518_v62  ;;  %v633_v8 = vadd.f32 %v621_v26, %v601_v11  ;;  %v280_v33 = vmul.f32 %v6226_v7, %v6173_v29  ;;  %v6230_v42 = vld [vmem:[#allocation95_spill] sm:$0xff]  ;;  %v6231_v11 = vld [vmem:[#allocation80_spill] sm:$0xff]  ;;  %v6233_v7 = vld [vmem:[#allocation94_spill] sm:$0xff] }
 0x243   :  { %v313_v58 = vadd.f32 %v301_v48, %v281_v20  ;;  %v6232_v26 = vld [vmem:[#allocation72_spill] sm:$0xff]  ;;  %v5435_v62 = vmul.f32 %v207_v1, %v6173_v29  ;;  %v693_v45 = vmul.f32 %v6233_v7, %v6218_v36  ;;  %vm2806_vm13 = vcmask 785408  }
 0x244   :  { %v5381_v17 = vpop.permute.xlu2 %2829 }
 0x245   :  { %6215 = vst [vmem:[#allocation14_spill] sm:$0xff] %v5381_v17  ;;  %v2849_v39 = vadd.f32 %v5381_v17, %v2627_v59  ;;  %v223_v59 = vrot.slane %v215_v43, 1  ;;  %v230_v17 = vadd.f32 %v222_v2, %v208_v25  ;;  %v300_v43 = vrot.slane %v288_v3, 1 }
 0x246   :  { %v369_v25 = vmul.f32 %v6229_v16, %v6221_v18  ;;  %v1047_v2 = vmul.f32 %v6230_v42, %v6223_v49  ;;  %v608_v3 = vmul.f32 %v6219_v13, %v6185_v46  ;;  %v713_v16 = vrot.slane %v701_v44, 1 }
 0x247   :  { %2863 = vrot.lane.b32.xlu2 %v2849_v39, %s3253_s7  ;;  %v210_v39 = vmul.f32 %v207_v1, %v6170_v0  ;;  %v6228_v0 = vld [vmem:[#allocation70_spill] sm:$0xff]  ;;  %v5418_v32 = vadd.f32 %v223_v59, %v209_v9  ;;  %v1816_v9 = vmul.f32 %v6232_v26, %v6231_v11  ;;  %v5439_v42 = vadd.f32 %v540_v15, %v230_v17 }
 0x248   :  { %v947_v50 = vmul.f32 %v6228_v0, %v6223_v49  ;;  %v639_v48 = vadd.f32 %v633_v8, %v313_v58  ;;  %v5444_v13 = vmul.f32 %v5384_v54, %v6176_v40  ;;  %v1059_v29 = vrot.slane %v1047_v2, 1  ;;  %v6236_v2 = vld [vmem:[#allocation76_spill] sm:$0xff] }
 0x249   :  { %v5432_v59 = vadd.f32 %v224_v47, %v210_v39  ;;  %v6234_v47 = vld [vmem:[#allocation22_spill] sm:$0xff]  ;;  %v5450_v1 = vmul.f32 %v5398_v34, %v6176_v40  ;;  %v620_v17 = vrot.slane %v608_v3, 1  ;;  %v1828_v36 = vrot.slane %v1816_v9, 1  ;;  %v6237_v58 = vld [vmem:[#allocation40_spill] sm:$0xff] }
 0x24a   :  { %v979_v14 = vadd.f32 %v967_v61, %v947_v50  ;;  %v312_v50 = vadd.f32 %v300_v43, %v280_v33  ;;  %v361_v39 = vmul.f32 %v6234_v47, %v6221_v18  ;;  %v381_v61 = vrot.slane %v369_v25, 1  ;;  %v6235_v33 = vld [vmem:[#allocation20_spill] sm:$0xff] }
 0x24b   :  { %v600_v8 = vmul.f32 %v6225_v38, %v6185_v46  ;;  %v954_v15 = vmul.f32 %v6224_v22, %v6189_v10  ;;  %v725_v43 = vadd.f32 %v713_v16, %v693_v45  ;;  %v1039_v18 = vmul.f32 %v6205_v51, %v6223_v49 }
 0x24c   :  { %v985_v44 = vadd.f32 %v979_v14, %v639_v48  ;;  %v1808_v40 = vmul.f32 %v6236_v2, %v6231_v11  ;;  %v2162_v14 = vmul.f32 %v5300_v5, %v6237_v58  ;;  %v2508_v3 = vmul.f32 %v5309_v30, %v4942_v52 }
 0x24d   :  { %v393_v9 = vadd.f32 %v381_v61, %v361_v39  ;;  %v1071_v7 = vadd.f32 %v1059_v29, %v1039_v18  ;;  %v1908_v22 = vmul.f32 %v6211_v35, %v6231_v11  ;;  %v5471_v51 = vstv %s5426_s29 }
 0x24e   :  { %v1388_v25 = vadd.f32 %v6235_v33, %v985_v44  ;;  %v632_v49 = vadd.f32 %v620_v17, %v600_v8  ;;  %v946_v45 = vmul.f32 %v6228_v0, %v6189_v10  ;;  %v1840_v16 = vadd.f32 %v1828_v36, %v1808_v40  ;;  %v6238_v40 = vld [vmem:[#allocation101_spill] sm:$0xff] }
 0x24f   :  { %v966_v48 = vrot.slane %v954_v15, 1  ;;  %v5477_v47 = vmul.f32 %v6232_v26, %v6191_v60  ;;  %v731_v44 = vadd.f32 %v725_v43, %v393_v9  ;;  %v2160_v39 = vmul.f32 %v5300_v5, %v5113_v57 }
 0x250   :  { %v1846_v61 = vadd.f32 %v1840_v16, %v1388_v25  ;;  %v2174_v35 = vrot.slane %v2162_v14, 1  ;;  %v2520_v29 = vrot.slane %v2508_v3, 1  ;;  %v2506_v18 = vmul.f32 %v5309_v30, %v5126_v37 }
 0x251   :  { %v1077_v17 = vadd.f32 %v1071_v7, %v731_v44  ;;  %v1920_v8 = vrot.slane %v1908_v22, 1  ;;  %v2152_v0 = vmul.f32 %v5332_v6, %v5113_v57  ;;  %v2172_v36 = vrot.slane %v2160_v39, 1 }
 0x252   :  { %v2154_v26 = vmul.f32 %v5332_v6, %v6237_v58  ;;  %v2500_v15 = vmul.f32 %v5335_v53, %v4942_v52  ;;  %v2498_v43 = vmul.f32 %v5335_v53, %v5126_v37  ;;  %v2518_v33 = vrot.slane %v2506_v18, 1  ;;  %v6239_v37 = vld [vmem:[#allocation86_spill] sm:$0xff] }
 0x253   :  { %v978_v25 = vadd.f32 %v966_v48, %v946_v45  ;;  %v1536_v14 = vadd.f32 %v6238_v40, %v1077_v17  ;;  %v1900_v3 = vmul.f32 %v6213_v12, %v6231_v11  ;;  %v2184_v9 = vadd.f32 %v2172_v36, %v2152_v0  ;;  %v6240_v48 = vld [vmem:[#allocation54_spill] sm:$0xff] }
 0x254   :  { %v2186_v7 = vadd.f32 %v2174_v35, %v2154_v26  ;;  %v2532_v22 = vadd.f32 %v2520_v29, %v2500_v15  ;;  %v2254_v16 = vmul.f32 %v5354_v23, %v6237_v58  ;;  %v2530_v44 = vadd.f32 %v2518_v33, %v2498_v43 }
 0x255   :  { %v638_v39 = vadd.f32 %v632_v49, %v312_v50  ;;  %v1932_v20 = vadd.f32 %v1920_v8, %v1900_v3  ;;  %v2600_v38 = vmul.f32 %v5357_v56, %v4942_v52  ;;  %v2190_v18 = vadd.f32 %v2184_v9, %v6239_v37 }
 0x256   :  { %v5500_v45 = vstv %s5468_s8  ;;  %v5504_v17 = vmul.f32 %v5471_v51, %v6240_v48  ;;  %v1807_v12 = vmul.f32 %v6236_v2, %v6191_v60  ;;  %v2192_v11 = vadd.f32 %v2186_v7, %v1846_v61 }
 0x257   :  { %v984_v35 = vadd.f32 %v978_v25, %v638_v39  ;;  %v1827_v29 = vrot.slane %v5477_v47, 1  ;;  %v1938_v50 = vadd.f32 %v1932_v20, %v1536_v14  ;;  %v5509_v49 = vadd.f32 %v2530_v44, %v2190_v18 }
 0x258   :  { %v2538_v8 = vadd.f32 %v2532_v22, %v2192_v11  ;;  %v2266_v0 = vrot.slane %v2254_v16, 1  ;;  %v2157_v37 = vmul.f32 %v5300_v5, %v6168_v21  ;;  %v2158_v36 = vmul.f32 %v5300_v5, %v6180_v19 }
 0x259   :  { %v2612_v2 = vrot.slane %v2600_v38, 1  ;;  %v2149_v61 = vmul.f32 %v5332_v6, %v6168_v21  ;;  %v2503_v20 = vmul.f32 %v5309_v30, %v5102_v41  ;;  %v2504_v47 = vmul.f32 %v5309_v30, %v5097_v28 }
 0x25a   :  { %v2150_v43 = vmul.f32 %v5332_v6, %v6180_v19  ;;  %v2169_v33 = vrot.slane %v2157_v37, 1  ;;  %v2170_v25 = vrot.slane %v2158_v36, 1  ;;  %v2495_v38 = vmul.f32 %v5335_v53, %v5102_v41  ;;  %v6242_v36 = vld [vmem:[#allocation78_spill] sm:$0xff] }
 0x25b   :  { %v2496_v40 = vmul.f32 %v5335_v53, %v5097_v28  ;;  %v2515_v14 = vrot.slane %v2503_v20, 1  ;;  %v2516_v3 = vrot.slane %v2504_v47, 1  ;;  %v2161_v9 = vmul.f32 %v5300_v5, %v6159_v27  ;;  %v6243_v5 = vld [vmem:[#allocation84_spill] sm:$0xff] }
 0x25c   :  { %v2507_v7 = vmul.f32 %v5309_v30, %v4955_v55  ;;  %v2181_v22 = vadd.f32 %v2169_v33, %v2149_v61  ;;  %v2182_v16 = vadd.f32 %v2170_v25, %v2150_v43  ;;  %v2246_v44 = vmul.f32 %v5371_v31, %v6237_v58 }
 0x25d   :  { %v2592_v39 = vmul.f32 %v5373_v4, %v4942_v52  ;;  %v2527_v18 = vadd.f32 %v2515_v14, %v2495_v38  ;;  %v2528_v11 = vadd.f32 %v2516_v3, %v2496_v40  ;;  %v1387_v20 = vadd.f32 %v6242_v36, %v984_v35 }
 0x25e   :  { %v2187_v47 = vadd.f32 %v2181_v22, %v6243_v5  ;;  %v872_v61 = vmul.f32 %v5471_v51, %v6177_v63  ;;  %v1839_v43 = vadd.f32 %v1827_v29, %v1807_v12  ;;  %v2278_v33 = vadd.f32 %v2266_v0, %v2246_v44 }
 0x25f   :  { %v2624_v25 = vadd.f32 %v2612_v2, %v2592_v39  ;;  %v2173_v57 = vrot.slane %v2161_v9, 1  ;;  %v2519_v52 = vrot.slane %v2507_v7, 1  ;;  %v1730_v14 = vstv %s5515_s9  ;;  %v6246_v7 = vld [vmem:[#allocation75_spill] sm:$0xff] }
 0x260   :  { %v5550_v38 = vadd.f32 %v2527_v18, %v2187_v47  ;;  %v878_v35 = vrot.slane %v5504_v17, 1  ;;  %v6245_v3 = vrot.slane %v5444_v13, 1  ;;  %v527_v36 = vmul.f32 %v5384_v54, %v6185_v46  ;;  %v6247_v39 = vld [vmem:[#allocation67_spill] sm:$0xff] }
 0x261   :  { %v1845_v12 = vadd.f32 %v1839_v43, %v1387_v20  ;;  %v2153_v29 = vmul.f32 %v5332_v6, %v6159_v27  ;;  %v2499_v0 = vmul.f32 %v5335_v53, %v4955_v55  ;;  %v1724_v2 = vstv %s5528_s10 }
 0x262   :  { %v542_v22 = vadd.f32 %v6245_v3, %v5450_v1  ;;  %v871_v17 = vmul.f32 %v5471_v51, %v6246_v7  ;;  %v1731_v13 = vmul.f32 %v1730_v14, %v6247_v39  ;;  %v880_v1 = vrot.slane %v872_v61, 1 }
 0x263   :  { %v2185_v18 = vadd.f32 %v2173_v57, %v2153_v29  ;;  %v873_v53 = vmul.f32 %v5471_v51, %v6189_v10  ;;  %v866_v20 = vmul.f32 %v5500_v45, %v6177_v63  ;;  %v535_v5 = vrot.slane %v527_v36, 1  ;;  %v6249_v36 = vld [vmem:[#allocation32_spill] sm:$0xff] }
 0x264   :  { %v521_v51 = vmul.f32 %v5398_v34, %v6185_v46  ;;  %v865_v63 = vmul.f32 %v5500_v45, %v6246_v7  ;;  %v546_v46 = vadd.f32 %v542_v22, %v5432_v59  ;;  %v6251_v59 = vld [vmem:[#allocation58_spill] sm:$0xff] }
 0x265   :  { %v5517_v26 = vpop.permute.xlu1 %2770  ;;  %v2191_v47 = vadd.f32 %v2185_v18, %v1845_v12  ;;  %v888_v61 = vadd.f32 %v880_v1, %v866_v20  ;;  %v881_v3 = vrot.slane %v873_v53, 1  ;;  %v1733_v12 = vmul.f32 %v1730_v14, %v6249_v36 }
 0x266   :  { %v2787_v15 = vadd.f32 %v5517_v26, %v2538_v8  ;;  %v6241_v8 = vld [vmem:[#allocation63_spill] sm:$0xff]  ;;  %v543_v29 = vadd.f32 %v535_v5, %v521_v51  ;;  %v2253_v53 = vmul.f32 %v5354_v23, %v6159_v27  ;;  %v2249_v20 = vmul.f32 %v5354_v23, %v6168_v21 }
 0x267   :  { %v525_v37 = vmul.f32 %v5384_v54, %v6241_v8  ;;  %v2531_v54 = vadd.f32 %v2519_v52, %v2499_v0  ;;  %v519_v6 = vmul.f32 %v5398_v34, %v6241_v8  ;;  %v1725_v52 = vmul.f32 %v1724_v2, %v6247_v39 }
 0x268   :  { %2804 = vrot.lane.b32.xlu1 %v2787_v15, %s3252_s30  ;;  %v6244_v15 = vld [vmem:[#allocation42_spill] sm:$0xff]  ;;  %v1739_v8 = vrot.slane %v1731_v13, 1  ;;  %v1734_v0 = vmul.f32 %v1730_v14, %v6191_v60  ;;  %v867_v34 = vmul.f32 %v5500_v45, %v6189_v10  ;;  %v892_v18 = vadd.f32 %v888_v61, %v546_v46 }
 0x269   :  { %v2188_v30 = vadd.f32 %v2182_v16, %v6244_v15  ;;  %v2284_v16 = vadd.f32 %v2278_v33, %v1938_v50  ;;  %v533_v9 = vrot.slane %v525_v37, 1  ;;  %v2537_v43 = vadd.f32 %v2531_v54, %v2191_v47 }
 0x26a   :  { %v889_v54 = vadd.f32 %v881_v3, %v867_v34  ;;  %v2250_v5 = vmul.f32 %v5354_v23, %v6180_v19  ;;  %v2591_v34 = vmul.f32 %v5373_v4, %v4955_v55 }
 0x26b   :  { %v5552_v40 = vadd.f32 %v2528_v11, %v2188_v30  ;;  %v2630_v44 = vadd.f32 %v2624_v25, %v2284_v16  ;;  %v864_v11 = vmul.f32 %v5500_v45, %v6240_v48  ;;  %v541_v57 = vadd.f32 %v533_v9, %v519_v6  ;;  %v5581_v48 = vpop.permute.xlu2 %2733  ;;  %v6248_v25 = vld [vmem:[#allocation71_spill] sm:$0xff] }
 0x26c   :  { %v879_v30 = vrot.slane %v871_v17, 1  ;;  %v1742_v45 = vrot.slane %v1734_v0, 1  ;;  %v1727_v6 = vmul.f32 %v1724_v2, %v6249_v36 }
 0x26d   :  { %v886_v15 = vadd.f32 %v878_v35, %v864_v11  ;;  %v1732_v35 = vmul.f32 %v1730_v14, %v6248_v25  ;;  %v545_v39 = vadd.f32 %v541_v57, %v5418_v32  ;;  %v1726_v14 = vmul.f32 %v1724_v2, %v6248_v25  ;;  %v6255_v25 = vld [vmem:[#allocation102_spill] sm:$0xff] }
 0x26e   :  { %v887_v17 = vadd.f32 %v879_v30, %v865_v63  ;;  %v1741_v11 = vrot.slane %v1733_v12, 1  ;;  %v1728_v32 = vmul.f32 %v1724_v2, %v6191_v60  ;;  %v2595_v60 = vmul.f32 %v5357_v56, %v5102_v41  ;;  %v6253_v30 = vld [vmem:[#allocation77_spill] sm:$0xff] }
 0x26f   :  { %v890_v7 = vadd.f32 %v886_v15, %v5439_v42  ;;  %v1740_v1 = vrot.slane %v1732_v35, 1  ;;  %v2596_v2 = vmul.f32 %v5357_v56, %v5097_v28  ;;  %v2338_v35 = vmul.f32 %v6255_v25, %v6237_v58 }
 0x270   :  { %v891_v42 = vadd.f32 %v887_v17, %v545_v39  ;;  %v5627_v61 = vadd.f32 %v1741_v11, %v1727_v6  ;;  %v1750_v51 = vadd.f32 %v1742_v45, %v1728_v32  ;;  %v2262_v17 = vrot.slane %v2250_v5, 1  ;;  %v6258_v6 = vld [vmem:[#allocation93_spill] sm:$0xff] }
 0x271   :  { %v5569_v50 = vpop.permute.xlu1 %2835  ;;  %v1237_v22 = vadd.f32 %v6251_v59, %v890_v7  ;;  %v1748_v47 = vadd.f32 %v1740_v1, %v1726_v14  ;;  %v2607_v7 = vrot.slane %v2595_v60, 1  ;;  %v2241_v39 = vmul.f32 %v5371_v31, %v6168_v21 }
 0x272   :  { %v2852_v37 = vadd.f32 %v5569_v50, %v2630_v44  ;;  %v1747_v44 = vadd.f32 %v1739_v8, %v1725_v52  ;;  %v1238_v8 = vadd.f32 %v6253_v30, %v891_v42  ;;  %v2587_v59 = vmul.f32 %v5373_v4, %v5102_v41  ;;  %v6261_v30 = vld [vmem:[#allocation24_spill] sm:$0xff] }
 0x273   :  { %v5616_v52 = vpop.permute.xlu2 %2894  ;;  %v5663_v32 = vstv %s5622_s11 }
 0x274   :  { %2869 = vrot.lane.b32.xlu1 %v2852_v37, %s3253_s7  ;;  %v2599_v37 = vmul.f32 %v5357_v56, %v4955_v55  ;;  %v5624_v57 = vadd.f32 %v1747_v44, %v1237_v22 }
 0x275   :  { %v2769_v33 = vpop.permute.xlu0 %2768 }
 0x276   :  { %v2775_v16 = vsel %vm2741_vm9, %v2769_v33, %v5517_v26  ;;  %v6250_v26 = vrot.slane %v5412_v24, 1  ;;  %v6252_v24 = vld [vmem:[#allocation29_spill] sm:$0xff]  ;;  %v2611_v0 = vrot.slane %v2599_v37, 1 }
 0x277   :  { %v2786_v9 = vadd.f32 %v2775_v16, %v2537_v43  ;;  %v6254_v43 = vld [vmem:[#allocation83_spill] sm:$0xff]  ;;  %v2245_v16 = vmul.f32 %v5371_v31, %v6159_v27  ;;  %v6259_v37 = vld [vmem:[#allocation25_spill] sm:$0xff] }
 0x278   :  { %v233_v13 = vadd.f32 %v6250_v26, %v5435_v62  ;;  %v2346_v62 = vmul.f32 %v6252_v24, %v6237_v58  ;;  %v2608_v58 = vrot.slane %v2596_v2, 1  ;;  %v2242_v26 = vmul.f32 %v5371_v31, %v6180_v19 }
 0x279   :  { %2802 = vrot.lane.b32.xlu0 %v2786_v9, %s3252_s30  ;;  %v2261_v9 = vrot.slane %v2249_v20, 1  ;;  %v2623_v11 = vadd.f32 %v2611_v0, %v2591_v34  ;;  %v5685_v0 = vstv %s5641_s13  ;;  %v5690_v34 = vstv %s5650_s14 }
 0x27a   :  { %v547_v10 = vadd.f32 %v543_v29, %v233_v13  ;;  %v2358_v3 = vrot.slane %v2346_v62, 1  ;;  %v2265_v29 = vrot.slane %v2253_v53, 1  ;;  %v6256_v13 = vld [vmem:[#allocation59_spill] sm:$0xff]  ;;  %v2274_v45 = vadd.f32 %v2262_v17, %v2242_v26 }
 0x27b   :  { %v2252_v14 = vmul.f32 %v5354_v23, %v6256_v13  ;;  %v2619_v23 = vadd.f32 %v2607_v7, %v2587_v59  ;;  %v5665_v62 = vadd.f32 %v1748_v47, %v1238_v8  ;;  %v2761_v2 = vpop.permute.xlu2 %2760  ;;  %v2244_v47 = vmul.f32 %v5371_v31, %v6256_v13  ;;  %v6263_v7 = vld [vmem:[#allocation45_spill] sm:$0xff] }
 0x27c   :  { %v893_v15 = vadd.f32 %v889_v54, %v547_v10  ;;  %v5636_v36 = vpop.permute.xlu1 %2739  ;;  %v2370_v54 = vadd.f32 %v2358_v3, %v2338_v35  ;;  %v2277_v22 = vadd.f32 %v2265_v29, %v2245_v16  ;;  %v2273_v10 = vadd.f32 %v2261_v9, %v2241_v39  ;;  %v6262_v35 = vld [vmem:[#allocation27_spill] sm:$0xff] }
 0x27d   :  { %v2264_v5 = vrot.slane %v2252_v14, 1  ;;  %v2280_v3 = vadd.f32 %v2274_v45, %v6262_v35  ;;  %v2590_v8 = vmul.f32 %v5373_v4, %v6258_v6  ;;  %v2341_v39 = vmul.f32 %v6252_v24, %v6168_v21 }
 0x27e   :  { %v1240_v63 = vadd.f32 %v6254_v43, %v893_v15  ;;  %v2283_v20 = vadd.f32 %v2277_v22, %v6259_v37  ;;  %v6260_v15 = vld [vmem:[#allocation43_spill] sm:$0xff]  ;;  %v2279_v43 = vadd.f32 %v2273_v10, %v6261_v30  ;;  %v2417_v10 = vmul.f32 %v5690_v34, %v5102_v41 }
 0x27f   :  { %v5671_v60 = vadd.f32 %v2370_v54, %v6260_v15  ;;  %v2276_v17 = vadd.f32 %v2264_v5, %v2244_v47  ;;  %v2071_v54 = vmul.f32 %v5685_v0, %v6168_v21  ;;  %v2418_v5 = vmul.f32 %v5690_v34, %v5097_v28 }
 0x280   :  { %v5667_v53 = vadd.f32 %v1750_v51, %v1240_v63  ;;  %v2629_v16 = vadd.f32 %v2623_v11, %v2283_v20  ;;  %v2077_v51 = vmul.f32 %v5663_v32, %v6168_v21  ;;  %v2625_v63 = vadd.f32 %v2619_v23, %v2279_v43 }
 0x281   :  { %v2767_v12 = vpop.permute.xlu0 %2766  ;;  %v2072_v11 = vmul.f32 %v5685_v0, %v6180_v19  ;;  %v2080_v23 = vmul.f32 %v5663_v32, %v6159_v27  ;;  %v2074_v15 = vmul.f32 %v5685_v0, %v6159_v27  ;;  %v2420_v35 = vmul.f32 %v5690_v34, %v4955_v55 }
 0x282   :  { %v2774_v46 = vsel %vm2741_vm9, %v2767_v12, %v2769_v33  ;;  %v6257_v33 = vld [vmem:[#allocation74_spill] sm:$0xff]  ;;  %v2085_v59 = vrot.slane %v2077_v51, 1 }
 0x283   :  { %v2785_v44 = vadd.f32 %v2774_v46, %v5509_v49  ;;  %v5653_v1 = vadd.f32 %v6257_v33, %v892_v18  ;;  %v2588_v49 = vmul.f32 %v5373_v4, %v5097_v28  ;;  %v2598_v18 = vmul.f32 %v5357_v56, %v6258_v6  ;;  %v2826_v30 = vpop.permute.xlu2 %2825 }
 0x284   :  { %v5676_v56 = vstv %s5634_s12  ;;  %v2078_v46 = vmul.f32 %v5663_v32, %v6180_v19  ;;  %v2353_v19 = vrot.slane %v2341_v39, 1  ;;  %v2093_v20 = vadd.f32 %v2085_v59, %v2071_v54 }
 0x285   :  { %2800 = vrot.lane.b32.xlu0 %v2785_v44, %s3252_s30  ;;  %v2620_v42 = vadd.f32 %v2608_v58, %v2588_v49  ;;  %v2610_v29 = vrot.slane %v2598_v18, 1  ;;  %v2423_v31 = vmul.f32 %v5676_v56, %v5102_v41  ;;  %v2424_v44 = vmul.f32 %v5676_v56, %v5097_v28 }
 0x286   :  { %v2426_v37 = vmul.f32 %v5676_v56, %v4955_v55  ;;  %v2097_v28 = vadd.f32 %v2093_v20, %v5624_v57 }
 0x287   :  { %v2626_v12 = vadd.f32 %v2620_v42, %v2280_v3  ;;  %v2622_v22 = vadd.f32 %v2610_v29, %v2590_v8  ;;  %v6264_v42 = vld [vmem:[#allocation57_spill] sm:$0xff]  ;;  %v2333_v3 = vmul.f32 %v6255_v25, %v6168_v21  ;;  %v2088_v29 = vrot.slane %v2080_v23, 1 }
 0x288   :  { %v2282_v18 = vadd.f32 %v2276_v17, %v6264_v42  ;;  %v2434_v17 = vrot.slane %v2426_v37, 1 }
 0x289   :  { %v2096_v59 = vadd.f32 %v2088_v29, %v2074_v15 }
 0x28a   :  { %v2628_v43 = vadd.f32 %v2622_v22, %v2282_v18  ;;  %v2079_v22 = vmul.f32 %v5663_v32, %v6256_v13  ;;  %v2425_v32 = vmul.f32 %v5676_v56, %v6258_v6  ;;  %v2073_v56 = vmul.f32 %v5685_v0, %v6256_v13 }
 0x28b   :  { %v2763_v9 = vpop.permute.xlu1 %2762  ;;  %v2100_v42 = vadd.f32 %v2096_v59, %v5667_v53 }
 0x28c   :  { %v2772_v4 = vsel %vm2741_vm9, %v2761_v2, %v2763_v9  ;;  %v2773_v58 = vsel %vm2741_vm9, %v2763_v9, %v6263_v7  ;;  %v2344_v2 = vmul.f32 %v6252_v24, %v6256_v13  ;;  %v2365_v24 = vadd.f32 %v2353_v19, %v2333_v3  ;;  %v6270_v19 = vld [vmem:[#allocation51_spill] sm:$0xff] }
 0x28d   :  { %v2782_v26 = vadd.f32 %v2772_v4, %v5550_v38  ;;  %v2783_v14 = vadd.f32 %v2773_v58, %v5552_v40  ;;  %v2834_v33 = vpop.permute.xlu0 %2833  ;;  %v2086_v38 = vrot.slane %v2078_v46, 1  ;;  %v2431_v40 = vrot.slane %v2423_v31, 1  ;;  %v6266_v46 = vld [vmem:[#allocation103_spill] sm:$0xff]  ;;  %v6267_v4 = vld [vmem:[#allocation14_spill] sm:$0xff] }
 0x28e   :  { %v2840_v49 = vsel %vm2741_vm9, %v2834_v33, %v5569_v50  ;;  %v2432_v50 = vrot.slane %v2424_v44, 1  ;;  %v2356_v58 = vrot.slane %v2344_v2, 1 }
 0x28f   :  { %v2851_v45 = vadd.f32 %v2840_v49, %v2629_v16  ;;  %2794 = vrot.lane.b32.xlu2 %v2782_v26, %s3252_s30  ;;  %2796 = vrot.lane.b32.xlu1 %v2783_v14, %s3252_s30  ;;  %v6265_v16 = vld [vmem:[#allocation104_spill] sm:$0xff]  ;;  %v2094_v8 = vadd.f32 %v2086_v38, %v2072_v11  ;;  %v2439_v51 = vadd.f32 %v2431_v40, %v2417_v10  ;;  %v6268_v10 = vld [vmem:[#allocation13_spill] sm:$0xff] }
 0x290   :  { %v2687_v47 = vmul.f32 %v6265_v16, %v5102_v41  ;;  %v2440_v9 = vadd.f32 %v2432_v50, %v2418_v5  ;;  %v2692_v31 = vmul.f32 %v6265_v16, %v6266_v46  ;;  %v2690_v44 = vmul.f32 %v6265_v16, %v6258_v6 }
 0x291   :  { %2867 = vrot.lane.b32.xlu0 %v2851_v45, %s3253_s7  ;;  %v2336_v49 = vmul.f32 %v6255_v25, %v6256_v13  ;;  %v2442_v11 = vadd.f32 %v2434_v17, %v2420_v35  ;;  %v2371_v45 = vadd.f32 %v2365_v24, %v6268_v10  ;;  %v2098_v38 = vadd.f32 %v2094_v8, %v5665_v62  ;;  %v2730_v62 = vpop.permute.xlu2 %2729 }
 0x292   :  { %v2699_v14 = vrot.slane %v2687_v47, 1  ;;  %v2702_v25 = vrot.slane %v2690_v44, 1  ;;  %v2443_v23 = vadd.f32 %v2439_v51, %v2097_v28  ;;  %v2087_v5 = vrot.slane %v2079_v22, 1 }
 0x293   :  { %v2368_v40 = vadd.f32 %v2356_v58, %v2336_v49  ;;  %v2444_v37 = vadd.f32 %v2440_v9, %v2098_v38  ;;  %v2446_v2 = vadd.f32 %v2442_v11, %v2100_v42  ;;  %v2433_v47 = vrot.slane %v2425_v32, 1 }
 0x294   :  { %v2828_v27 = vpop.permute.xlu1 %2827  ;;  %v2095_v17 = vadd.f32 %v2087_v5, %v2073_v56  ;;  %v2419_v13 = vmul.f32 %v5690_v34, %v6258_v6 }
 0x295   :  { %v2837_v55 = vsel %vm2741_vm9, %v2826_v30, %v2828_v27  ;;  %v2838_v21 = vsel %vm2741_vm9, %v2828_v27, %v6267_v4 }
 0x296   :  { %v2832_v7 = vpop.permute.xlu0 %2831  ;;  %v2847_v57 = vadd.f32 %v2837_v55, %v2625_v63  ;;  %v2848_v39 = vadd.f32 %v2838_v21, %v2626_v12  ;;  %v6269_v63 = vld [vmem:[#allocation88_spill] sm:$0xff]  ;;  %v2441_v0 = vadd.f32 %v2433_v47, %v2419_v13 }
 0x297   :  { %v2839_v26 = vsel %vm2741_vm9, %v2832_v7, %v2834_v33  ;;  %v2679_v12 = vmul.f32 %v6269_v63, %v5102_v41  ;;  %v2704_v33 = vrot.slane %v2692_v31, 1  ;;  %v2684_v50 = vmul.f32 %v6269_v63, %v6266_v46 }
 0x298   :  { %v2850_v54 = vadd.f32 %v2839_v26, %v2628_v43  ;;  %2859 = vrot.lane.b32.xlu2 %v2847_v57, %s3253_s7  ;;  %2861 = vrot.lane.b32.xlu1 %v2848_v39, %s3253_s7  ;;  %v2374_v41 = vadd.f32 %v2368_v40, %v6270_v19  ;;  %v2682_v20 = vmul.f32 %v6269_v63, %v6258_v6 }
 0x299   :  { %v2711_v18 = vadd.f32 %v2699_v14, %v2679_v12  ;;  %v2716_v43 = vadd.f32 %v2704_v33, %v2684_v50  ;;  %v2799_v55 = vpop.permute.xlu2 %2798 }
 0x29a   :  { %2865 = vrot.lane.b32.xlu0 %v2850_v54, %s3253_s7  ;;  %v2714_v16 = vadd.f32 %v2702_v25, %v2682_v20 }
 0x29b   :  { %v2717_v30 = vadd.f32 %v2711_v18, %v2371_v45  ;;  %v2722_v29 = vadd.f32 %v2716_v43, %v5671_v60 }
 0x29c   :  { %v2732_v15 = vpop.permute.xlu1 %2731  ;;  %v2720_v9 = vadd.f32 %v2714_v16, %v2374_v41 }
 0x29d   :  { %v2742_v53 = vsel %vm2741_vm9, %v2730_v62, %v2732_v15  ;;  %v2743_v35 = vsel %vm2741_vm9, %v2732_v15, %v5581_v48  ;;  %v1753_v48 = vadd.f32 %v5627_v61, %v5653_v1 }
 0x29e   :  { %v2738_v3 = vpop.permute.xlu0 %2737  ;;  %v2750_v8 = vadd.f32 %v2742_v53, %v2443_v23  ;;  %v2751_v28 = vadd.f32 %v2743_v35, %v2444_v37 }
 0x29f   :  { %v2745_v51 = vsel %vm2741_vm9, %v2738_v3, %v5636_v36  ;;  %v2099_v24 = vadd.f32 %v2095_v17, %v1753_v48 }
 0x2a0   :  { %v2753_v27 = vadd.f32 %v2745_v51, %v2446_v2  ;;  %2890 = vrot.lane.b32.xlu2 %v2717_v30, %s3251_s20  ;;  %2900 = vrot.lane.b32.xlu1 %v2722_v29, %s3251_s20 }
 0x2a1   :  { %v2445_v36 = vadd.f32 %v2441_v0, %v2099_v24  ;;  %v2864_v6 = vpop.permute.xlu2 %2863 }
 0x2a2   :  { %2896 = vrot.lane.b32.xlu0 %v2720_v9, %s3251_s20 }
 0x2a4   :  { %v2893_v4 = vpop.permute.xlu1 %2892 }
 0x2a5   :  { %v2904_v38 = vsel %vm2902_vm14, %v2893_v4, %v5616_v52 }
 0x2a6   :  { %v2736_v46 = vpop.permute.xlu0 %2735 }
 0x2a7   :  { %v2744_v60 = vsel %vm2741_vm9, %v2736_v46, %v2738_v3 }
 0x2a8   :  { %v2752_v31 = vadd.f32 %v2744_v60, %v2445_v36 }
 0x2ae   :  { %v2899_v21 = vpop.permute.xlu0 %2898 }
 0x2da   :  { %v2805_v34 = vpop.permute.xlu1 %2804 }
 0x2e6   :  { %v2870_v44 = vpop.permute.xlu1 %2869 }
 0x2e9   :  { %v2795_v58 = vpop.permute.xlu2 %2794 }
 0x2eb   :  { %v2803_v7 = vpop.permute.xlu0 %2802 }
 0x2ec   :  { %v2810_v63 = vsel %vm2806_vm13, %v2803_v7, %v2805_v34 }
 0x2ed   :  { %v2818_v42 = vadd.f32 %v2810_v63, %v2753_v27 }
 0x2f2   :  { %v2860_v39 = vpop.permute.xlu2 %2859 }
 0x2f7   :  { %v2801_v57 = vpop.permute.xlu0 %2800 }
 0x2f8   :  { %v2809_v25 = vsel %vm2806_vm13, %v2801_v57, %v2803_v7 }
 0x2f9   :  { %v2817_v41 = vadd.f32 %v2809_v25, %v2752_v31 }
 0x2fa   :  { %v2891_v54 = vpop.permute.xlu2 %2890 }
 0x2fb   :  { %v2903_v40 = vsel %vm2902_vm14, %v2891_v54, %v2893_v4 }
 0x301   :  { %v2797_v61 = vpop.permute.xlu1 %2796 }
 0x302   :  { %v2807_v26 = vsel %vm2806_vm13, %v2795_v58, %v2797_v61  ;;  %v2808_v14 = vsel %vm2806_vm13, %v2797_v61, %v2799_v55 }
 0x303   :  { %v2868_v1 = vpop.permute.xlu0 %2867  ;;  %v2815_v59 = vadd.f32 %v2807_v26, %v2750_v8  ;;  %v2816_v49 = vadd.f32 %v2808_v14, %v2751_v28 }
 0x304   :  { %v2875_v18 = vsel %vm2871_vm15, %v2868_v1, %v2870_v44 }
 0x305   :  { %v2883_v20 = vadd.f32 %v2875_v18, %v2818_v42 }
 0x30a   :  { %v2862_v22 = vpop.permute.xlu1 %2861 }
 0x30b   :  { %v2872_v11 = vsel %vm2871_vm15, %v2860_v39, %v2862_v22  ;;  %v2873_v10 = vsel %vm2871_vm15, %v2862_v22, %v2864_v6 }
 0x30c   :  { %v2866_v45 = vpop.permute.xlu0 %2865  ;;  %v2880_v12 = vadd.f32 %v2872_v11, %v2815_v59  ;;  %v2881_v33 = vadd.f32 %v2873_v10, %v2816_v49 }
 0x30d   :  { %v2874_v50 = vsel %vm2871_vm15, %v2866_v45, %v2868_v1 }
 0x30e   :  { %v2911_v32 = vadd.f32 %v2903_v40, %v2880_v12  ;;  %v2912_v23 = vadd.f32 %v2904_v38, %v2881_v33  ;;  %v2882_v30 = vadd.f32 %v2874_v50, %v2817_v41 }
 0x310   :  { %vm2915_vm1 = vcmp.ge.f32.partialorder %v2911_v32, 0.0  ;;  %vm2916_vm2 = vcmp.ge.f32.partialorder %v2912_v23, 0.0  ;;  %v2919_v37 = vmul.f32 0.1, %v2911_v32  ;;  %v2920_v19 = vmul.f32 0.1, %v2912_v23 }
 0x312   :  { %v2923_v5 = vsel %vm2915_vm1, %v2911_v32, %v2919_v37  ;;  %v2924_v62 = vsel %vm2916_vm2, %v2912_v23, %v2920_v19  ;;  %v2901_v15 = vpop.permute.xlu1 %2900 }
 0x313   :  { %v3137_v2 = vmul.f32 -1.442695, %v2923_v5  ;;  %v3138_v52 = vmul.f32 -1.442695, %v2924_v62  ;;  %v2906_v43 = vsel %vm2902_vm14, %v2899_v21, %v2901_v15 }
 0x314   :  { %v2897_v56 = vpop.permute.xlu0 %2896  ;;  %v2914_v53 = vadd.f32 %v2906_v43, %v2883_v20 }
 0x315   :  { %v2905_v35 = vsel %vm2902_vm14, %v2897_v56, %v2899_v21  ;;  %3157 = vpow2.f32 %v3137_v2  ;;  %v6273_v56 = vld [vmem:[#allocation12_spill] sm:$0xff] }
 0x316   :  { %v2913_v3 = vadd.f32 %v2905_v35, %v2882_v30  ;;  %3159 = vpow2.f32 %v3138_v52  ;;  %vm2918_vm3 = vcmp.ge.f32.partialorder %v2914_v53, 0.0  ;;  %v2922_v16 = vmul.f32 0.1, %v2914_v53 }
 0x318   :  { %vm2917_vm4 = vcmp.ge.f32.partialorder %v2913_v3, 0.0  ;;  %v2921_v47 = vmul.f32 0.1, %v2913_v3  ;;  %v2926_v8 = vsel %vm2918_vm3, %v2914_v53, %v2922_v16 }
 0x319   :  { %v3140_v28 = vmul.f32 -1.442695, %v2926_v8 }
 0x31a   :  { %v2925_v51 = vsel %vm2917_vm4, %v2913_v3, %v2921_v47  ;;  %v6274_v47 = vld [vmem:[#allocation11_spill] sm:$0xff] }
 0x31b   :  { %v3139_v29 = vmul.f32 -1.442695, %v2925_v51  ;;  %v3158_v27 = vpop.eup %3157  ;;  %3161 = vpow2.f32 %v3140_v28 }
 0x31c   :  { %v3160_v9 = vpop.eup %3159  ;;  %v2939_v17 = vadd.f32 1.0, %v3158_v27 }
 0x31d   :  { %3163 = vpow2.f32 %v3139_v29  ;;  %v2940_v13 = vadd.f32 1.0, %v3160_v9 }
 0x31e   :  { %3165 = vrcp.f32 %v2939_v17  ;;  %v2952_v21 = vand.u32 2147483647, %v2939_v17  ;;  %v2954_v6 = vand.u32 2147483648, %v2939_v17  ;;  %vm2948_vm6 = vweird.f32 %v2939_v17 }
 0x31f   :  { %3167 = vrcp.f32 %v2940_v13  ;;  %v2967_v7 = vand.u32 2147483647, %v2940_v13  ;;  %v2969_v44 = vand.u32 2147483648, %v2940_v13  ;;  %vm2963_vm10 = vweird.f32 %v2940_v13 }
 0x320   :  { %vm5784_vm8 = vcmp.eq.f32.partialorder %v2952_v21, 8.507059e+37  ;;  %v2955_v59 = vor.u32 1.1754944e-38, %v2954_v6 }
 0x321   :  { %v3162_v48 = vpop.eup %3161  ;;  %vm2968_vm12 = vcmp.eq.f32.partialorder %v2967_v7, 8.507059e+37  ;;  %v2970_v10 = vor.u32 1.1754944e-38, %v2969_v44 }
 0x322   :  { %v2942_v24 = vadd.f32 1.0, %v3162_v48 }
 0x323   :  { %v3164_v0 = vpop.eup %3163 }
 0x324   :  { %v2941_v36 = vadd.f32 1.0, %v3164_v0  ;;  %v3166_v46 = vpop.eup %3165  ;;  %3169 = vrcp.f32 %v2942_v24  ;;  %v2997_v45 = vand.u32 2147483647, %v2942_v24  ;;  %v2999_v38 = vand.u32 2147483648, %v2942_v24 }
 0x325   :  { %v3168_v60 = vpop.eup %3167  ;;  %v2944_v31 = vmul.f32 %v3166_v46, %v2939_v17  ;;  %vm2949_vm5 = vweird.f32 %v3166_v46  ;;  %vm2993_vm1 = vweird.f32 %v2942_v24 }
 0x326   :  { %3171 = vrcp.f32 %v2941_v36  ;;  %v2959_v55 = vmul.f32 %v3168_v60, %v2940_v13  ;;  %vm2964_vm7 = vweird.f32 %v3168_v60  ;;  %vm2950_vm11 = vmor %vm2948_vm6, %vm2949_vm5  ;;  %v2984_v33 = vand.u32 2147483648, %v2941_v36 }
 0x327   :  { %v2945_v4 = vsub.f32 1.0, %v2944_v31  ;;  %vm2965_vm9 = vmor %vm2963_vm10, %vm2964_vm7  ;;  %v2982_v42 = vand.u32 2147483647, %v2941_v36  ;;  %vm2978_vm15 = vweird.f32 %v2941_v36  ;;  %v3000_v19 = vor.u32 1.1754944e-38, %v2999_v38 }
 0x328   :  { %v2960_v34 = vsub.f32 1.0, %v2959_v55  ;;  %v2985_v5 = vor.u32 1.1754944e-38, %v2984_v33  ;;  %vm2998_vm4 = vcmp.eq.f32.partialorder %v2997_v45, 8.507059e+37 }
 0x329   :  { %v2946_v58 = vmul.f32 %v3166_v46, %v2945_v4  ;;  %vm2983_vm5 = vcmp.eq.f32.partialorder %v2982_v42, 8.507059e+37 }
 0x32a   :  { %v3170_v57 = vpop.eup %3169  ;;  %v2961_v39 = vmul.f32 %v3168_v60, %v2960_v34 }
 0x32b   :  { %v2989_v1 = vmul.f32 %v3170_v57, %v2942_v24  ;;  %v2947_v26 = vadd.f32 %v3166_v46, %v2946_v58  ;;  %vm2994_vm13 = vweird.f32 %v3170_v57 }
 0x32c   :  { %v3172_v61 = vpop.eup %3171  ;;  %v2962_v49 = vadd.f32 %v3168_v60, %v2961_v39  ;;  %vm2995_vm2 = vmor %vm2993_vm1, %vm2994_vm13 }
 0x32d   :  { %v2974_v54 = vmul.f32 %v3172_v61, %v2941_v36  ;;  %v2990_v22 = vsub.f32 1.0, %v2989_v1  ;;  %v2951_v11 = vsel %vm2950_vm11, %v3166_v46, %v2947_v26  ;;  %vm2979_vm14 = vweird.f32 %v3172_v61 }
 0x32e   :  { %v2966_v12 = vsel %vm2965_vm9, %v3168_v60, %v2962_v49  ;;  %v2956_v40 = vsel %vm5784_vm8, %v2955_v59, %v2951_v11  ;;  %vm2980_vm3 = vmor %vm2978_vm15, %vm2979_vm14 }
 0x32f   :  { %v2975_v63 = vsub.f32 1.0, %v2974_v54  ;;  %v2971_v25 = vsel %vm2968_vm12, %v2970_v10, %v2966_v12  ;;  %v2991_v32 = vmul.f32 %v3170_v57, %v2990_v22  ;;  %v3003_v41 = vperm.slane %v2956_v40, 0 }
 0x330   :  { %v3004_v18 = vperm.slane %v2971_v25, 0 }
 0x331   :  { %v2976_v23 = vmul.f32 %v3172_v61, %v2975_v63  ;;  %v2992_v50 = vadd.f32 %v3170_v57, %v2991_v32 }
 0x332   :  { %v3011_v20 = vrot.slane %v3004_v18, 4 }
 0x333   :  { %v2977_v37 = vadd.f32 %v3172_v61, %v2976_v23  ;;  %v2996_v62 = vsel %vm2995_vm2, %v3170_v57, %v2992_v50 }
 0x334   :  { %v3001_v2 = vsel %vm2998_vm4, %v3000_v19, %v2996_v62  ;;  %v3013_v52 = vsel %vm49_vm0, %v3003_v41, %v3011_v20 }
 0x335   :  { %v2981_v15 = vsel %vm2980_vm3, %v3172_v61, %v2977_v37  ;;  %v3006_v43 = vperm.slane %v3001_v2, 0  ;;  %v3017_v53 = vmul.f32 %v3013_v52, %v6273_v56 }
 0x336   :  { %v2986_v30 = vsel %vm2983_vm5, %v2985_v5, %v2981_v15 }
 0x337   :  { %v3005_v35 = vperm.slane %v2986_v30, 0  ;;  %v3012_v3 = vrot.slane %v3006_v43, 4  ;;  %3019 = vst [vmem:[#allocation7] sm:$0xff] %v3017_v53 }
 0x339   :  { %v3014_v16 = vsel %vm49_vm0, %v3005_v35, %v3012_v3 }
 0x33a   :  { %v3018_v8 = vmul.f32 %v3014_v16, %v6274_v47 }
 0x33c   :  { %3020 = vst [vmem:[#allocation7 + $0x8] sm:$0xff] %v3018_v8 }
 0x33d   :  { %3033 = dma.vmem_to_hbm [thread:$0]  %s3026_s16, 256, %s3028_s1, [#allocation6], %s3241_s18, %s3241_s18, %s3242_s19  }
 0x33e   :  { %3237 = dma.done.wait [#allocation6], 256  }
 0x33f   :  { %3238 = vsyncadd [#allocation6], 4294967040 }
 0x340   :  { %3038 = vsyncpa [#allocation5], 1 }
 0x341   :  { %3039 = vsyncpa [#allocation6], 1 }

</bundles_post_ra>
